<compile_context>
chip_gen: v7x
topology: tpu7x:2x2x1
jax: 0.10.0
libtpu: 0.0.40
codegen_flags: <defaults>
</compile_context>

<pallas_src>
import functools

import numpy as np

import jax
import jax.numpy as jnp
from jax.experimental import pallas as pl
from jax.experimental.pallas import tpu as pltpu

BN_EPS = 1e-5  # PyTorch BatchNorm1d default eps


# ----------------------------------------------------------------------------
# Fused encoder kernel
# ----------------------------------------------------------------------------
def _encoder_kernel(p1_ref, w1_ref, w2_ref, w3_ref, w4_ref,
                    gb1_ref, gb2_ref, gb3_ref, gb4_ref,
                    m2_ref, m34_ref, sel_ref,
                    o_ref,
                    a1s, a1p, a2s, a2p_pad, a3_pad,
                    *, B, L1, L2, OUT):
    f32 = jnp.float32
    bf16 = jnp.bfloat16

    L1p = L1 // 2            # length after pool1 (per batch)
    L2p = L2 // 2            # length after pool2 (per batch) == layer3/4 length
    LPAD = L2p + 2           # rows per batch in the zero-padded scratches
    R2 = B * L1p - 2         # rows of the batch-fused layer-2 conv output
    R34 = B * LPAD - 2       # rows of the batch-fused layer-3/4 conv outputs

    def bn_scale_shift(y_sum, y_sqsum, n, gb_ref):
        """BatchNorm (train mode, batch stats) folded into a per-channel affine."""
        inv_n = 1.0 / float(n)
        mean = y_sum * inv_n
        var = y_sqsum * inv_n - mean * mean          # single-pass stats
        gamma = gb_ref[0:1, :]
        beta = gb_ref[1:2, :]
        scale = gamma * jax.lax.rsqrt(var + BN_EPS)  # rsqrt -> EUP slot
        shift = beta - mean * scale
        return scale, shift

    def conv_k(src_ref, rows, w_ref):
        """Batch-fused K-tap conv: out[t] = sum_k src[t + k] @ W_k."""
        acc = jnp.dot(src_ref[pl.ds(0, rows), :].astype(bf16), w_ref[0],
                      preferred_element_type=f32)
        for k in range(1, w_ref.shape[0]):
            acc += jnp.dot(src_ref[pl.ds(k, rows), :].astype(bf16),
                           w_ref[k], preferred_element_type=f32)
        return acc

    # Zero-fill the padded scratches; only the border pad rows stay zero.
    a2p_pad[...] = jnp.zeros(a2p_pad.shape, a2p_pad.dtype)
    a3_pad[...] = jnp.zeros(a3_pad.shape, a3_pad.dtype)

    # ---------------- layer 1: Conv1d(1,64,k=10,s=3) + BN + ReLU -------------
    y1 = jnp.dot(p1_ref[...], w1_ref[...], preferred_element_type=f32)  # (B*L1, 64)
    s1 = jnp.sum(y1, axis=0, keepdims=True)
    q1 = jnp.sum(y1 * y1, axis=0, keepdims=True)
    scale, shift = bn_scale_shift(s1, q1, B * L1, gb1_ref)
    a1s[...] = jnp.maximum(y1 * scale + shift, 0.0)

    # ---------------- MaxPool1d(2): sublane-strided reads --------------------
    if L1 % 2 == 0:
        # batch-fused: L1 even => even/odd pairs never straddle a batch boundary
        ev = a1s[pl.ds(0, B * L1p, stride=2), :]
        od = a1s[pl.ds(1, B * L1p, stride=2), :]
        a1p[...] = jnp.maximum(ev, od)
    else:
        for b in range(B):
            ev = a1s[pl.ds(b * L1, L1p, stride=2), :]
            od = a1s[pl.ds(b * L1 + 1, L1p, stride=2), :]
            a1p[pl.ds(b * L1p, L1p), :] = jnp.maximum(ev, od)

    # ---------------- layer 2: Conv1d(64,64,k=3,valid) + BN + ReLU -----------
    # One batch-fused conv over the contiguous (B*L1p, 64) buffer; the 2
    # cross-batch rows per boundary are masked out of the BN statistics and
    # are simply never read by pool2 afterwards.
    y2 = conv_k(a1p, R2, w2_ref)                     # (R2, 64)
    y2m = y2 * m2_ref[...]
    s2 = jnp.sum(y2m, axis=0, keepdims=True)
    q2 = jnp.sum(y2m * y2m, axis=0, keepdims=True)
    scale, shift = bn_scale_shift(s2, q2, B * L2, gb2_ref)
    a2s[pl.ds(0, R2), :] = jnp.maximum(y2 * scale + shift, 0.0)

    # ---------------- MaxPool1d(2) -> interior rows of a2p_pad ---------------
    for b in range(B):
        ev = a2s[pl.ds(b * L1p, L2p, stride=2), :]
        od = a2s[pl.ds(b * L1p + 1, L2p, stride=2), :]
        a2p_pad[pl.ds(b * LPAD + 1, L2p), :] = jnp.maximum(ev, od)

    # ---------------- layer 3: Conv1d(64,64,k=3,pad=1) + BN + ReLU -----------
    m34 = m34_ref[...]
    y3 = conv_k(a2p_pad, R34, w3_ref)                # (R34, 64)
    y3m = y3 * m34
    s3 = jnp.sum(y3m, axis=0, keepdims=True)
    q3 = jnp.sum(y3m * y3m, axis=0, keepdims=True)
    scale, shift = bn_scale_shift(s3, q3, B * L2p, gb3_ref)
    # masked store: garbage rows land on pad rows of a3_pad and must stay zero
    a3_pad[pl.ds(1, R34), :] = jnp.maximum(y3 * scale + shift, 0.0) * m34

    # ---------------- layer 4: Conv1d(64,F,k=3,pad=1) + BN + ReLU ------------
    y4 = conv_k(a3_pad, R34, w4_ref)                 # (R34, F)
    y4m = y4 * m34
    s4 = jnp.sum(y4m, axis=0, keepdims=True)
    q4 = jnp.sum(y4m * y4m, axis=0, keepdims=True)
    scale, shift = bn_scale_shift(s4, q4, B * L2p, gb4_ref)
    act4 = jnp.maximum(y4 * scale + shift, 0.0)      # (R34, F)

    # ---------------- AdaptiveMaxPool1d(OUT) fused epilogue ------------------
    # Window i = [floor(i*L/OUT), ceil((i+1)*L/OUT)); max window size <= 3.
    # Block-diagonal one-hot selectors gather one candidate per window offset
    # for ALL batches at once; the window max is the max over the offsets.
    pooled = jnp.dot(sel_ref[0], act4, preferred_element_type=f32)   # (B*OUT, F)
    for j in range(1, sel_ref.shape[0]):
        pooled = jnp.maximum(
            pooled, jnp.dot(sel_ref[j], act4, preferred_element_type=f32))
    o_ref[...] = pooled


# ----------------------------------------------------------------------------
# Wrapper-side constants (folded at trace time)
# ----------------------------------------------------------------------------
def _valid_row_mask(B, row_stride, valid):
    """(B*row_stride - 2, 1) float mask: 1 for in-batch conv-output rows."""
    m = np.zeros((B * row_stride - 2, 1), np.float32)
    for b in range(B):
        m[b * row_stride: b * row_stride + valid, 0] = 1.0
    return jnp.asarray(m)


def _adaptive_pool_selectors(B, row_stride, length, out_size):
    """Block-diag one-hot selection matrices covering every adaptive window."""
    starts = [(i * length) // out_size for i in range(out_size)]
    ends = [-((-(i + 1) * length) // out_size) for i in range(out_size)]
    n_sel = max(e - s for s, e in zip(starts, ends))
    sel = np.zeros((n_sel, B * out_size, B * row_stride - 2), np.float32)
    for b in range(B):
        for i, (s, e) in enumerate(zip(starts, ends)):
            for j in range(n_sel):
                sel[j, b * out_size + i, b * row_stride + min(s + j, e - 1)] = 1.0
    return jnp.asarray(sel)


# ----------------------------------------------------------------------------
# Params + forward
# ----------------------------------------------------------------------------
def init_params(key, feature_dim):
    ks = jax.random.split(key, 8)

    def conv(kw, kb, cout, cin, ksz):
        w = jax.random.normal(kw, (cout, cin, ksz), jnp.float32) * 0.1
        b = jax.random.normal(kb, (cout,), jnp.float32) * 0.01
        return w, b

    p = {}
    p["w1"], p["b1"] = conv(ks[0], ks[1], 64, 1, 10)
    p["w2"], p["b2"] = conv(ks[2], ks[3], 64, 64, 3)
    p["w3"], p["b3"] = conv(ks[4], ks[5], 64, 64, 3)
    p["w4"], p["b4"] = conv(ks[6], ks[7], feature_dim, 64, 3)
    # BatchNorm affine params (PyTorch init: gamma=1, beta=0)
    for i, c in zip((1, 2, 3, 4), (64, 64, 64, feature_dim)):
        p[f"g{i}"] = jnp.ones((c,), jnp.float32)
        p[f"be{i}"] = jnp.zeros((c,), jnp.float32)
    # NOTE: conv biases b1..b4 are kept for parity with the PyTorch module but
    # are NOT used: with batch-stat BatchNorm a per-channel bias cancels
    # exactly (mean subtraction), so dropping it is equivalent.
    return p


@jax.jit
def cnn_encoder1d_forward(params, x):
    """x: (B, 1, L) NCW float32 -> (B, feature_dim, 25) float32."""
    B, Cin, L = x.shape
    assert Cin == 1
    K1, S1 = 10, 3
    L1 = (L - K1) // S1 + 1        # after conv1           (168 for L=512)
    L1p = L1 // 2                  # after pool1            (84)
    L2 = L1p - 2                   # after conv2 (valid)    (82)
    L2p = L2 // 2                  # after pool2 == L3 == L4 (41)
    LPAD = L2p + 2                 # padded rows per batch for pad=1 convs
    OUT = 25
    F = params["w4"].shape[0]

    # layer-1 im2col patches (tiny, wrapper-side):
    # patches[b*L1 + t, k] = x[b, 0, S1*t + k]
    x2 = x[:, 0, :]
    idx = jnp.arange(L1)[:, None] * S1 + jnp.arange(K1)[None, :]   # (L1, K1)
    patches = x2[:, idx].reshape(B * L1, K1).astype(jnp.bfloat16)

    # weights, channels-last, bf16 for the MXU
    w1_2d = params["w1"][:, 0, :].T.astype(jnp.bfloat16)                  # (10, 64)
    w2_t = jnp.transpose(params["w2"], (2, 1, 0)).astype(jnp.bfloat16)    # (3, 64, 64)
    w3_t = jnp.transpose(params["w3"], (2, 1, 0)).astype(jnp.bfloat16)    # (3, 64, 64)
    w4_t = jnp.transpose(params["w4"], (2, 1, 0)).astype(jnp.bfloat16)    # (3, 64, F)

    def gb(i):
        return jnp.stack([params[f"g{i}"], params[f"be{i}"]]).astype(jnp.float32)

    m2 = _valid_row_mask(B, L1p, L2)                 # (B*L1p-2, 1)
    m34 = _valid_row_mask(B, LPAD, L2p)              # (B*LPAD-2, 1)
    sel = _adaptive_pool_selectors(B, LPAD, L2p, OUT)  # (3, B*25, B*LPAD-2)

    kernel = functools.partial(_encoder_kernel, B=B, L1=L1, L2=L2, OUT=OUT)
    vmem = pl.BlockSpec(memory_space=pltpu.MemorySpace.VMEM)

    out_flat = pl.pallas_call(
        kernel,
        out_shape=jax.ShapeDtypeStruct((B * OUT, F), jnp.float32),
        in_specs=[vmem] * 12,
        out_specs=vmem,
        scratch_shapes=[
            pltpu.VMEM((B * L1, 64), jnp.float32),    # a1s : layer1 activations
            pltpu.VMEM((B * L1p, 64), jnp.float32),   # a1p : pooled layer1
            pltpu.VMEM((B * L1p, 64), jnp.float32),   # a2s : layer2 activations
            pltpu.VMEM((B * LPAD, 64), jnp.float32),  # a2p_pad : pooled l2 (+pad)
            pltpu.VMEM((B * LPAD, 64), jnp.float32),  # a3_pad  : layer3 out (+pad)
        ],
    )(patches, w1_2d, w2_t, w3_t, w4_t, gb(1), gb(2), gb(3), gb(4), m2, m34, sel)

    # back to PyTorch NCW convention: (B*25, F) -> (B, F, 25)
    return out_flat.reshape(B, OUT, F).transpose(0, 2, 1)


if __name__ == "__main__":
    feature_dim = 32
    B, Cin, L = 2, 1, 512  # NCW input, like PyTorch Conv1d

    key = jax.random.PRNGKey(0)
    k_params, k_x = jax.random.split(key)
    params = init_params(k_params, feature_dim)
    x = jax.random.normal(k_x, (B, Cin, L), jnp.float32)

    out = cnn_encoder1d_forward(params, x)
    out = jax.block_until_ready(out)

    assert out.shape == (B, feature_dim, 25), out.shape
    assert bool(jnp.all(jnp.isfinite(out)))
    print("KERNEL_OK")
</pallas_src>

<mosaic_0001>
module attributes {stable_mosaic.version = 11 : i64} {
  func.func @_encoder_kernel(%arg0: memref<336x10xbf16, #tpu.memory_space<vmem>>, %arg1: memref<10x64xbf16, #tpu.memory_space<vmem>>, %arg2: memref<3x64x64xbf16, #tpu.memory_space<vmem>>, %arg3: memref<3x64x64xbf16, #tpu.memory_space<vmem>>, %arg4: memref<3x64x32xbf16, #tpu.memory_space<vmem>>, %arg5: memref<2x64xf32, #tpu.memory_space<vmem>>, %arg6: memref<2x64xf32, #tpu.memory_space<vmem>>, %arg7: memref<2x64xf32, #tpu.memory_space<vmem>>, %arg8: memref<2x32xf32, #tpu.memory_space<vmem>>, %arg9: memref<166x1xf32, #tpu.memory_space<vmem>>, %arg10: memref<84x1xf32, #tpu.memory_space<vmem>>, %arg11: memref<3x50x84xf32, #tpu.memory_space<vmem>>, %arg12: memref<50x32xf32, #tpu.memory_space<vmem>>, %arg13: memref<336x64xf32, #tpu.memory_space<vmem>>, %arg14: memref<168x64xf32, #tpu.memory_space<vmem>>, %arg15: memref<168x64xf32, #tpu.memory_space<vmem>>, %arg16: memref<86x64xf32, #tpu.memory_space<vmem>>, %arg17: memref<86x64xf32, #tpu.memory_space<vmem>>) attributes {dimension_semantics = [], scalar_prefetch = 0 : i64, scratch_operands = 5 : i64, tpu.core_type = #tpu.core_type<tc>} {
    %cst = arith.constant 0.000000e+00 : f32
    %0 = vector.broadcast %cst : f32 to vector<86x64xf32>
    %c0 = arith.constant 0 : index
    %c0_0 = arith.constant 0 : index
    %1 = vector.load %arg16[%c0, %c0_0] : memref<86x64xf32, #tpu.memory_space<vmem>>, vector<86x64xf32>
    tpu.vector_store %arg16[%c0, %c0_0], %0 {strides = array<i32>} : memref<86x64xf32, #tpu.memory_space<vmem>>, vector<86x64xf32>,
    %cst_1 = arith.constant 0.000000e+00 : f32
    %2 = vector.broadcast %cst_1 : f32 to vector<86x64xf32>
    %c0_2 = arith.constant 0 : index
    %c0_3 = arith.constant 0 : index
    %3 = vector.load %arg17[%c0_2, %c0_3] : memref<86x64xf32, #tpu.memory_space<vmem>>, vector<86x64xf32>
    tpu.vector_store %arg17[%c0_2, %c0_3], %2 {strides = array<i32>} : memref<86x64xf32, #tpu.memory_space<vmem>>, vector<86x64xf32>,
    %c0_4 = arith.constant 0 : index
    %c0_5 = arith.constant 0 : index
    %4 = vector.load %arg0[%c0_4, %c0_5] : memref<336x10xbf16, #tpu.memory_space<vmem>>, vector<336x10xbf16>
    %c0_6 = arith.constant 0 : index
    %c0_7 = arith.constant 0 : index
    %5 = vector.load %arg1[%c0_6, %c0_7] : memref<10x64xbf16, #tpu.memory_space<vmem>>, vector<10x64xbf16>
    %cst_8 = arith.constant dense<0.000000e+00> : vector<336x64xf32>
    %6 = tpu.matmul %4, %5, %cst_8 {dimension_numbers = #tpu.dot_dimension_numbers<[1], [0], [0], [1], [0, 0, 1, 1], [], []>} : vector<336x10xbf16>, vector<10x64xbf16>, vector<336x64xf32> -> vector<336x64xf32>
    %cst_9 = arith.constant dense<0.000000e+00> : vector<64xf32>
    %7 = vector.multi_reduction <add>, %6, %cst_9 [0] : vector<336x64xf32> to vector<64xf32>
    %8 = vector.shape_cast %7 : vector<64xf32> to vector<1x64xf32>
    %9 = arith.mulf %6, %6 : vector<336x64xf32>
    %cst_10 = arith.constant dense<0.000000e+00> : vector<64xf32>
    %10 = vector.multi_reduction <add>, %9, %cst_10 [0] : vector<336x64xf32> to vector<64xf32>
    %11 = vector.shape_cast %10 : vector<64xf32> to vector<1x64xf32>
    %cst_11 = arith.constant 0.00297619053 : f32
    %12 = vector.broadcast %cst_11 : f32 to vector<1x64xf32>
    %13 = arith.mulf %8, %12 : vector<1x64xf32>
    %cst_12 = arith.constant 0.00297619053 : f32
    %14 = vector.broadcast %cst_12 : f32 to vector<1x64xf32>
    %15 = arith.mulf %11, %14 : vector<1x64xf32>
    %16 = arith.mulf %13, %13 : vector<1x64xf32>
    %17 = arith.subf %15, %16 : vector<1x64xf32>
    %c0_13 = arith.constant 0 : index
    %c0_14 = arith.constant 0 : index
    %18 = vector.load %arg5[%c0_13, %c0_14] : memref<2x64xf32, #tpu.memory_space<vmem>>, vector<1x64xf32>
    %c1 = arith.constant 1 : index
    %c0_15 = arith.constant 0 : index
    %19 = vector.load %arg5[%c1, %c0_15] : memref<2x64xf32, #tpu.memory_space<vmem>>, vector<1x64xf32>
    %cst_16 = arith.constant 9.99999974E-6 : f32
    %20 = vector.broadcast %cst_16 : f32 to vector<1x64xf32>
    %21 = arith.addf %17, %20 : vector<1x64xf32>
    %22 = math.rsqrt %21 : vector<1x64xf32>
    %23 = arith.mulf %18, %22 : vector<1x64xf32>
    %24 = arith.mulf %13, %23 : vector<1x64xf32>
    %25 = arith.subf %19, %24 : vector<1x64xf32>
    %26 = vector.broadcast %23 : vector<1x64xf32> to vector<336x64xf32>
    %27 = arith.mulf %6, %26 : vector<336x64xf32>
    %28 = vector.broadcast %25 : vector<1x64xf32> to vector<336x64xf32>
    %29 = arith.addf %27, %28 : vector<336x64xf32>
    %cst_17 = arith.constant 0.000000e+00 : f32
    %30 = vector.broadcast %cst_17 : f32 to vector<336x64xf32>
    %31 = arith.maximumf %29, %30 : vector<336x64xf32>
    %c0_18 = arith.constant 0 : index
    %c0_19 = arith.constant 0 : index
    %32 = vector.load %arg13[%c0_18, %c0_19] : memref<336x64xf32, #tpu.memory_space<vmem>>, vector<336x64xf32>
    tpu.vector_store %arg13[%c0_18, %c0_19], %31 {strides = array<i32>} : memref<336x64xf32, #tpu.memory_space<vmem>>, vector<336x64xf32>,
    %c0_20 = arith.constant 0 : index
    %c0_21 = arith.constant 0 : index
    %33 = tpu.strided_load %arg13[%c0_20, %c0_21] {strides = array<i32: 2, 1>} : memref<336x64xf32, #tpu.memory_space<vmem>>, vector<168x64xf32>
    %c1_22 = arith.constant 1 : index
    %c0_23 = arith.constant 0 : index
    %34 = tpu.strided_load %arg13[%c1_22, %c0_23] {strides = array<i32: 2, 1>} : memref<336x64xf32, #tpu.memory_space<vmem>>, vector<168x64xf32>
    %35 = arith.maximumf %33, %34 : vector<168x64xf32>
    %c0_24 = arith.constant 0 : index
    %c0_25 = arith.constant 0 : index
    %36 = vector.load %arg14[%c0_24, %c0_25] : memref<168x64xf32, #tpu.memory_space<vmem>>, vector<168x64xf32>
    tpu.vector_store %arg14[%c0_24, %c0_25], %35 {strides = array<i32>} : memref<168x64xf32, #tpu.memory_space<vmem>>, vector<168x64xf32>,
    %c0_26 = arith.constant 0 : index
    %c0_27 = arith.constant 0 : index
    %37 = vector.load %arg14[%c0_26, %c0_27] : memref<168x64xf32, #tpu.memory_space<vmem>>, vector<166x64xf32>
    %38 = arith.truncf %37 : vector<166x64xf32> to vector<166x64xbf16>
    %c0_28 = arith.constant 0 : index
    %c0_29 = arith.constant 0 : index
    %c0_30 = arith.constant 0 : index
    %39 = vector.load %arg2[%c0_28, %c0_29, %c0_30] : memref<3x64x64xbf16, #tpu.memory_space<vmem>>, vector<1x64x64xbf16>
    %40 = vector.shape_cast %39 : vector<1x64x64xbf16> to vector<64x64xbf16>
    %cst_31 = arith.constant dense<0.000000e+00> : vector<166x64xf32>
    %41 = tpu.matmul %38, %40, %cst_31 {dimension_numbers = #tpu.dot_dimension_numbers<[1], [0], [0], [1], [0, 0, 1, 1], [], []>} : vector<166x64xbf16>, vector<64x64xbf16>, vector<166x64xf32> -> vector<166x64xf32>
    %c1_32 = arith.constant 1 : index
    %c0_33 = arith.constant 0 : index
    %42 = vector.load %arg14[%c1_32, %c0_33] : memref<168x64xf32, #tpu.memory_space<vmem>>, vector<166x64xf32>
    %43 = arith.truncf %42 : vector<166x64xf32> to vector<166x64xbf16>
    %c1_34 = arith.constant 1 : index
    %c0_35 = arith.constant 0 : index
    %c0_36 = arith.constant 0 : index
    %44 = vector.load %arg2[%c1_34, %c0_35, %c0_36] : memref<3x64x64xbf16, #tpu.memory_space<vmem>>, vector<1x64x64xbf16>
    %45 = vector.shape_cast %44 : vector<1x64x64xbf16> to vector<64x64xbf16>
    %cst_37 = arith.constant dense<0.000000e+00> : vector<166x64xf32>
    %46 = tpu.matmul %43, %45, %cst_37 {dimension_numbers = #tpu.dot_dimension_numbers<[1], [0], [0], [1], [0, 0, 1, 1], [], []>} : vector<166x64xbf16>, vector<64x64xbf16>, vector<166x64xf32> -> vector<166x64xf32>
    %47 = arith.addf %41, %46 : vector<166x64xf32>
    %c2 = arith.constant 2 : index
    %c0_38 = arith.constant 0 : index
    %48 = vector.load %arg14[%c2, %c0_38] : memref<168x64xf32, #tpu.memory_space<vmem>>, vector<166x64xf32>
    %49 = arith.truncf %48 : vector<166x64xf32> to vector<166x64xbf16>
    %c2_39 = arith.constant 2 : index
    %c0_40 = arith.constant 0 : index
    %c0_41 = arith.constant 0 : index
    %50 = vector.load %arg2[%c2_39, %c0_40, %c0_41] : memref<3x64x64xbf16, #tpu.memory_space<vmem>>, vector<1x64x64xbf16>
    %51 = vector.shape_cast %50 : vector<1x64x64xbf16> to vector<64x64xbf16>
    %cst_42 = arith.constant dense<0.000000e+00> : vector<166x64xf32>
    %52 = tpu.matmul %49, %51, %cst_42 {dimension_numbers = #tpu.dot_dimension_numbers<[1], [0], [0], [1], [0, 0, 1, 1], [], []>} : vector<166x64xbf16>, vector<64x64xbf16>, vector<166x64xf32> -> vector<166x64xf32>
    %53 = arith.addf %47, %52 : vector<166x64xf32>
    %c0_43 = arith.constant 0 : index
    %c0_44 = arith.constant 0 : index
    %54 = vector.load %arg9[%c0_43, %c0_44] : memref<166x1xf32, #tpu.memory_space<vmem>>, vector<166x1xf32>
    %55 = vector.broadcast %54 : vector<166x1xf32> to vector<166x64xf32>
    %56 = arith.mulf %53, %55 : vector<166x64xf32>
    %cst_45 = arith.constant dense<0.000000e+00> : vector<64xf32>
    %57 = vector.multi_reduction <add>, %56, %cst_45 [0] : vector<166x64xf32> to vector<64xf32>
    %58 = vector.shape_cast %57 : vector<64xf32> to vector<1x64xf32>
    %59 = arith.mulf %56, %56 : vector<166x64xf32>
    %cst_46 = arith.constant dense<0.000000e+00> : vector<64xf32>
    %60 = vector.multi_reduction <add>, %59, %cst_46 [0] : vector<166x64xf32> to vector<64xf32>
    %61 = vector.shape_cast %60 : vector<64xf32> to vector<1x64xf32>
    %cst_47 = arith.constant 0.00609756075 : f32
    %62 = vector.broadcast %cst_47 : f32 to vector<1x64xf32>
    %63 = arith.mulf %58, %62 : vector<1x64xf32>
    %cst_48 = arith.constant 0.00609756075 : f32
    %64 = vector.broadcast %cst_48 : f32 to vector<1x64xf32>
    %65 = arith.mulf %61, %64 : vector<1x64xf32>
    %66 = arith.mulf %63, %63 : vector<1x64xf32>
    %67 = arith.subf %65, %66 : vector<1x64xf32>
    %c0_49 = arith.constant 0 : index
    %c0_50 = arith.constant 0 : index
    %68 = vector.load %arg6[%c0_49, %c0_50] : memref<2x64xf32, #tpu.memory_space<vmem>>, vector<1x64xf32>
    %c1_51 = arith.constant 1 : index
    %c0_52 = arith.constant 0 : index
    %69 = vector.load %arg6[%c1_51, %c0_52] : memref<2x64xf32, #tpu.memory_space<vmem>>, vector<1x64xf32>
    %cst_53 = arith.constant 9.99999974E-6 : f32
    %70 = vector.broadcast %cst_53 : f32 to vector<1x64xf32>
    %71 = arith.addf %67, %70 : vector<1x64xf32>
    %72 = math.rsqrt %71 : vector<1x64xf32>
    %73 = arith.mulf %68, %72 : vector<1x64xf32>
    %74 = arith.mulf %63, %73 : vector<1x64xf32>
    %75 = arith.subf %69, %74 : vector<1x64xf32>
    %76 = vector.broadcast %73 : vector<1x64xf32> to vector<166x64xf32>
    %77 = arith.mulf %53, %76 : vector<166x64xf32>
    %78 = vector.broadcast %75 : vector<1x64xf32> to vector<166x64xf32>
    %79 = arith.addf %77, %78 : vector<166x64xf32>
    %cst_54 = arith.constant 0.000000e+00 : f32
    %80 = vector.broadcast %cst_54 : f32 to vector<166x64xf32>
    %81 = arith.maximumf %79, %80 : vector<166x64xf32>
    %c0_55 = arith.constant 0 : index
    %c0_56 = arith.constant 0 : index
    %82 = vector.load %arg15[%c0_55, %c0_56] : memref<168x64xf32, #tpu.memory_space<vmem>>, vector<166x64xf32>
    tpu.vector_store %arg15[%c0_55, %c0_56], %81 {strides = array<i32>} : memref<168x64xf32, #tpu.memory_space<vmem>>, vector<166x64xf32>,
    %c0_57 = arith.constant 0 : index
    %c0_58 = arith.constant 0 : index
    %83 = tpu.strided_load %arg15[%c0_57, %c0_58] {strides = array<i32: 2, 1>} : memref<168x64xf32, #tpu.memory_space<vmem>>, vector<41x64xf32>
    %c1_59 = arith.constant 1 : index
    %c0_60 = arith.constant 0 : index
    %84 = tpu.strided_load %arg15[%c1_59, %c0_60] {strides = array<i32: 2, 1>} : memref<168x64xf32, #tpu.memory_space<vmem>>, vector<41x64xf32>
    %85 = arith.maximumf %83, %84 : vector<41x64xf32>
    %c1_61 = arith.constant 1 : index
    %c0_62 = arith.constant 0 : index
    %86 = vector.load %arg16[%c1_61, %c0_62] : memref<86x64xf32, #tpu.memory_space<vmem>>, vector<41x64xf32>
    tpu.vector_store %arg16[%c1_61, %c0_62], %85 {strides = array<i32>} : memref<86x64xf32, #tpu.memory_space<vmem>>, vector<41x64xf32>,
    %c84 = arith.constant 84 : index
    %c0_63 = arith.constant 0 : index
    %87 = tpu.strided_load %arg15[%c84, %c0_63] {strides = array<i32: 2, 1>} : memref<168x64xf32, #tpu.memory_space<vmem>>, vector<41x64xf32>
    %c85 = arith.constant 85 : index
    %c0_64 = arith.constant 0 : index
    %88 = tpu.strided_load %arg15[%c85, %c0_64] {strides = array<i32: 2, 1>} : memref<168x64xf32, #tpu.memory_space<vmem>>, vector<41x64xf32>
    %89 = arith.maximumf %87, %88 : vector<41x64xf32>
    %c44 = arith.constant 44 : index
    %c0_65 = arith.constant 0 : index
    %90 = vector.load %arg16[%c44, %c0_65] : memref<86x64xf32, #tpu.memory_space<vmem>>, vector<41x64xf32>
    tpu.vector_store %arg16[%c44, %c0_65], %89 {strides = array<i32>} : memref<86x64xf32, #tpu.memory_space<vmem>>, vector<41x64xf32>,
    %c0_66 = arith.constant 0 : index
    %c0_67 = arith.constant 0 : index
    %91 = vector.load %arg10[%c0_66, %c0_67] : memref<84x1xf32, #tpu.memory_space<vmem>>, vector<84x1xf32>
    %c0_68 = arith.constant 0 : index
    %c0_69 = arith.constant 0 : index
    %92 = vector.load %arg16[%c0_68, %c0_69] : memref<86x64xf32, #tpu.memory_space<vmem>>, vector<84x64xf32>
    %93 = arith.truncf %92 : vector<84x64xf32> to vector<84x64xbf16>
    %c0_70 = arith.constant 0 : index
    %c0_71 = arith.constant 0 : index
    %c0_72 = arith.constant 0 : index
    %94 = vector.load %arg3[%c0_70, %c0_71, %c0_72] : memref<3x64x64xbf16, #tpu.memory_space<vmem>>, vector<1x64x64xbf16>
    %95 = vector.shape_cast %94 : vector<1x64x64xbf16> to vector<64x64xbf16>
    %cst_73 = arith.constant dense<0.000000e+00> : vector<84x64xf32>
    %96 = tpu.matmul %93, %95, %cst_73 {dimension_numbers = #tpu.dot_dimension_numbers<[1], [0], [0], [1], [0, 0, 1, 1], [], []>} : vector<84x64xbf16>, vector<64x64xbf16>, vector<84x64xf32> -> vector<84x64xf32>
    %c1_74 = arith.constant 1 : index
    %c0_75 = arith.constant 0 : index
    %97 = vector.load %arg16[%c1_74, %c0_75] : memref<86x64xf32, #tpu.memory_space<vmem>>, vector<84x64xf32>
    %98 = arith.truncf %97 : vector<84x64xf32> to vector<84x64xbf16>
    %c1_76 = arith.constant 1 : index
    %c0_77 = arith.constant 0 : index
    %c0_78 = arith.constant 0 : index
    %99 = vector.load %arg3[%c1_76, %c0_77, %c0_78] : memref<3x64x64xbf16, #tpu.memory_space<vmem>>, vector<1x64x64xbf16>
    %100 = vector.shape_cast %99 : vector<1x64x64xbf16> to vector<64x64xbf16>
    %cst_79 = arith.constant dense<0.000000e+00> : vector<84x64xf32>
    %101 = tpu.matmul %98, %100, %cst_79 {dimension_numbers = #tpu.dot_dimension_numbers<[1], [0], [0], [1], [0, 0, 1, 1], [], []>} : vector<84x64xbf16>, vector<64x64xbf16>, vector<84x64xf32> -> vector<84x64xf32>
    %102 = arith.addf %96, %101 : vector<84x64xf32>
    %c2_80 = arith.constant 2 : index
    %c0_81 = arith.constant 0 : index
    %103 = vector.load %arg16[%c2_80, %c0_81] : memref<86x64xf32, #tpu.memory_space<vmem>>, vector<84x64xf32>
    %104 = arith.truncf %103 : vector<84x64xf32> to vector<84x64xbf16>
    %c2_82 = arith.constant 2 : index
    %c0_83 = arith.constant 0 : index
    %c0_84 = arith.constant 0 : index
    %105 = vector.load %arg3[%c2_82, %c0_83, %c0_84] : memref<3x64x64xbf16, #tpu.memory_space<vmem>>, vector<1x64x64xbf16>
    %106 = vector.shape_cast %105 : vector<1x64x64xbf16> to vector<64x64xbf16>
    %cst_85 = arith.constant dense<0.000000e+00> : vector<84x64xf32>
    %107 = tpu.matmul %104, %106, %cst_85 {dimension_numbers = #tpu.dot_dimension_numbers<[1], [0], [0], [1], [0, 0, 1, 1], [], []>} : vector<84x64xbf16>, vector<64x64xbf16>, vector<84x64xf32> -> vector<84x64xf32>
    %108 = arith.addf %102, %107 : vector<84x64xf32>
    %109 = vector.broadcast %91 : vector<84x1xf32> to vector<84x64xf32>
    %110 = arith.mulf %108, %109 : vector<84x64xf32>
    %cst_86 = arith.constant dense<0.000000e+00> : vector<64xf32>
    %111 = vector.multi_reduction <add>, %110, %cst_86 [0] : vector<84x64xf32> to vector<64xf32>
    %112 = vector.shape_cast %111 : vector<64xf32> to vector<1x64xf32>
    %113 = arith.mulf %110, %110 : vector<84x64xf32>
    %cst_87 = arith.constant dense<0.000000e+00> : vector<64xf32>
    %114 = vector.multi_reduction <add>, %113, %cst_87 [0] : vector<84x64xf32> to vector<64xf32>
    %115 = vector.shape_cast %114 : vector<64xf32> to vector<1x64xf32>
    %cst_88 = arith.constant 0.0121951215 : f32
    %116 = vector.broadcast %cst_88 : f32 to vector<1x64xf32>
    %117 = arith.mulf %112, %116 : vector<1x64xf32>
    %cst_89 = arith.constant 0.0121951215 : f32
    %118 = vector.broadcast %cst_89 : f32 to vector<1x64xf32>
    %119 = arith.mulf %115, %118 : vector<1x64xf32>
    %120 = arith.mulf %117, %117 : vector<1x64xf32>
    %121 = arith.subf %119, %120 : vector<1x64xf32>
    %c0_90 = arith.constant 0 : index
    %c0_91 = arith.constant 0 : index
    %122 = vector.load %arg7[%c0_90, %c0_91] : memref<2x64xf32, #tpu.memory_space<vmem>>, vector<1x64xf32>
    %c1_92 = arith.constant 1 : index
    %c0_93 = arith.constant 0 : index
    %123 = vector.load %arg7[%c1_92, %c0_93] : memref<2x64xf32, #tpu.memory_space<vmem>>, vector<1x64xf32>
    %cst_94 = arith.constant 9.99999974E-6 : f32
    %124 = vector.broadcast %cst_94 : f32 to vector<1x64xf32>
    %125 = arith.addf %121, %124 : vector<1x64xf32>
    %126 = math.rsqrt %125 : vector<1x64xf32>
    %127 = arith.mulf %122, %126 : vector<1x64xf32>
    %128 = arith.mulf %117, %127 : vector<1x64xf32>
    %129 = arith.subf %123, %128 : vector<1x64xf32>
    %130 = vector.broadcast %127 : vector<1x64xf32> to vector<84x64xf32>
    %131 = arith.mulf %108, %130 : vector<84x64xf32>
    %132 = vector.broadcast %129 : vector<1x64xf32> to vector<84x64xf32>
    %133 = arith.addf %131, %132 : vector<84x64xf32>
    %cst_95 = arith.constant 0.000000e+00 : f32
    %134 = vector.broadcast %cst_95 : f32 to vector<84x64xf32>
    %135 = arith.maximumf %133, %134 : vector<84x64xf32>
    %136 = vector.broadcast %91 : vector<84x1xf32> to vector<84x64xf32>
    %137 = arith.mulf %135, %136 : vector<84x64xf32>
    %c1_96 = arith.constant 1 : index
    %c0_97 = arith.constant 0 : index
    %138 = vector.load %arg17[%c1_96, %c0_97] : memref<86x64xf32, #tpu.memory_space<vmem>>, vector<84x64xf32>
    tpu.vector_store %arg17[%c1_96, %c0_97], %137 {strides = array<i32>} : memref<86x64xf32, #tpu.memory_space<vmem>>, vector<84x64xf32>,
    %c0_98 = arith.constant 0 : index
    %c0_99 = arith.constant 0 : index
    %139 = vector.load %arg17[%c0_98, %c0_99] : memref<86x64xf32, #tpu.memory_space<vmem>>, vector<84x64xf32>
    %140 = arith.truncf %139 : vector<84x64xf32> to vector<84x64xbf16>
    %c0_100 = arith.constant 0 : index
    %c0_101 = arith.constant 0 : index
    %c0_102 = arith.constant 0 : index
    %141 = vector.load %arg4[%c0_100, %c0_101, %c0_102] : memref<3x64x32xbf16, #tpu.memory_space<vmem>>, vector<1x64x32xbf16>
    %142 = vector.shape_cast %141 : vector<1x64x32xbf16> to vector<64x32xbf16>
    %cst_103 = arith.constant dense<0.000000e+00> : vector<84x32xf32>
    %143 = tpu.matmul %140, %142, %cst_103 {dimension_numbers = #tpu.dot_dimension_numbers<[1], [0], [0], [1], [0, 0, 1, 1], [], []>} : vector<84x64xbf16>, vector<64x32xbf16>, vector<84x32xf32> -> vector<84x32xf32>
    %c1_104 = arith.constant 1 : index
    %c0_105 = arith.constant 0 : index
    %144 = vector.load %arg17[%c1_104, %c0_105] : memref<86x64xf32, #tpu.memory_space<vmem>>, vector<84x64xf32>
    %145 = arith.truncf %144 : vector<84x64xf32> to vector<84x64xbf16>
    %c1_106 = arith.constant 1 : index
    %c0_107 = arith.constant 0 : index
    %c0_108 = arith.constant 0 : index
    %146 = vector.load %arg4[%c1_106, %c0_107, %c0_108] : memref<3x64x32xbf16, #tpu.memory_space<vmem>>, vector<1x64x32xbf16>
    %147 = vector.shape_cast %146 : vector<1x64x32xbf16> to vector<64x32xbf16>
    %cst_109 = arith.constant dense<0.000000e+00> : vector<84x32xf32>
    %148 = tpu.matmul %145, %147, %cst_109 {dimension_numbers = #tpu.dot_dimension_numbers<[1], [0], [0], [1], [0, 0, 1, 1], [], []>} : vector<84x64xbf16>, vector<64x32xbf16>, vector<84x32xf32> -> vector<84x32xf32>
    %149 = arith.addf %143, %148 : vector<84x32xf32>
    %c2_110 = arith.constant 2 : index
    %c0_111 = arith.constant 0 : index
    %150 = vector.load %arg17[%c2_110, %c0_111] : memref<86x64xf32, #tpu.memory_space<vmem>>, vector<84x64xf32>
    %151 = arith.truncf %150 : vector<84x64xf32> to vector<84x64xbf16>
    %c2_112 = arith.constant 2 : index
    %c0_113 = arith.constant 0 : index
    %c0_114 = arith.constant 0 : index
    %152 = vector.load %arg4[%c2_112, %c0_113, %c0_114] : memref<3x64x32xbf16, #tpu.memory_space<vmem>>, vector<1x64x32xbf16>
    %153 = vector.shape_cast %152 : vector<1x64x32xbf16> to vector<64x32xbf16>
    %cst_115 = arith.constant dense<0.000000e+00> : vector<84x32xf32>
    %154 = tpu.matmul %151, %153, %cst_115 {dimension_numbers = #tpu.dot_dimension_numbers<[1], [0], [0], [1], [0, 0, 1, 1], [], []>} : vector<84x64xbf16>, vector<64x32xbf16>, vector<84x32xf32> -> vector<84x32xf32>
    %155 = arith.addf %149, %154 : vector<84x32xf32>
    %156 = vector.broadcast %91 : vector<84x1xf32> to vector<84x32xf32>
    %157 = arith.mulf %155, %156 : vector<84x32xf32>
    %cst_116 = arith.constant dense<0.000000e+00> : vector<32xf32>
    %158 = vector.multi_reduction <add>, %157, %cst_116 [0] : vector<84x32xf32> to vector<32xf32>
    %159 = vector.shape_cast %158 : vector<32xf32> to vector<1x32xf32>
    %160 = arith.mulf %157, %157 : vector<84x32xf32>
    %cst_117 = arith.constant dense<0.000000e+00> : vector<32xf32>
    %161 = vector.multi_reduction <add>, %160, %cst_117 [0] : vector<84x32xf32> to vector<32xf32>
    %162 = vector.shape_cast %161 : vector<32xf32> to vector<1x32xf32>
    %cst_118 = arith.constant 0.0121951215 : f32
    %163 = vector.broadcast %cst_118 : f32 to vector<1x32xf32>
    %164 = arith.mulf %159, %163 : vector<1x32xf32>
    %cst_119 = arith.constant 0.0121951215 : f32
    %165 = vector.broadcast %cst_119 : f32 to vector<1x32xf32>
    %166 = arith.mulf %162, %165 : vector<1x32xf32>
    %167 = arith.mulf %164, %164 : vector<1x32xf32>
    %168 = arith.subf %166, %167 : vector<1x32xf32>
    %c0_120 = arith.constant 0 : index
    %c0_121 = arith.constant 0 : index
    %169 = vector.load %arg8[%c0_120, %c0_121] : memref<2x32xf32, #tpu.memory_space<vmem>>, vector<1x32xf32>
    %c1_122 = arith.constant 1 : index
    %c0_123 = arith.constant 0 : index
    %170 = vector.load %arg8[%c1_122, %c0_123] : memref<2x32xf32, #tpu.memory_space<vmem>>, vector<1x32xf32>
    %cst_124 = arith.constant 9.99999974E-6 : f32
    %171 = vector.broadcast %cst_124 : f32 to vector<1x32xf32>
    %172 = arith.addf %168, %171 : vector<1x32xf32>
    %173 = math.rsqrt %172 : vector<1x32xf32>
    %174 = arith.mulf %169, %173 : vector<1x32xf32>
    %175 = arith.mulf %164, %174 : vector<1x32xf32>
    %176 = arith.subf %170, %175 : vector<1x32xf32>
    %177 = vector.broadcast %174 : vector<1x32xf32> to vector<84x32xf32>
    %178 = arith.mulf %155, %177 : vector<84x32xf32>
    %179 = vector.broadcast %176 : vector<1x32xf32> to vector<84x32xf32>
    %180 = arith.addf %178, %179 : vector<84x32xf32>
    %cst_125 = arith.constant 0.000000e+00 : f32
    %181 = vector.broadcast %cst_125 : f32 to vector<84x32xf32>
    %182 = arith.maximumf %180, %181 : vector<84x32xf32>
    %c0_126 = arith.constant 0 : index
    %c0_127 = arith.constant 0 : index
    %c0_128 = arith.constant 0 : index
    %183 = vector.load %arg11[%c0_126, %c0_127, %c0_128] : memref<3x50x84xf32, #tpu.memory_space<vmem>>, vector<1x50x84xf32>
    %184 = vector.shape_cast %183 : vector<1x50x84xf32> to vector<50x84xf32>
    %cst_129 = arith.constant dense<0.000000e+00> : vector<50x32xf32>
    %185 = tpu.matmul %184, %182, %cst_129 {dimension_numbers = #tpu.dot_dimension_numbers<[1], [0], [0], [1], [0, 0, 1, 1], [], []>} : vector<50x84xf32>, vector<84x32xf32>, vector<50x32xf32> -> vector<50x32xf32>
    %c1_130 = arith.constant 1 : index
    %c0_131 = arith.constant 0 : index
    %c0_132 = arith.constant 0 : index
    %186 = vector.load %arg11[%c1_130, %c0_131, %c0_132] : memref<3x50x84xf32, #tpu.memory_space<vmem>>, vector<1x50x84xf32>
    %187 = vector.shape_cast %186 : vector<1x50x84xf32> to vector<50x84xf32>
    %cst_133 = arith.constant dense<0.000000e+00> : vector<50x32xf32>
    %188 = tpu.matmul %187, %182, %cst_133 {dimension_numbers = #tpu.dot_dimension_numbers<[1], [0], [0], [1], [0, 0, 1, 1], [], []>} : vector<50x84xf32>, vector<84x32xf32>, vector<50x32xf32> -> vector<50x32xf32>
    %189 = arith.maximumf %185, %188 : vector<50x32xf32>
    %c2_134 = arith.constant 2 : index
    %c0_135 = arith.constant 0 : index
    %c0_136 = arith.constant 0 : index
    %190 = vector.load %arg11[%c2_134, %c0_135, %c0_136] : memref<3x50x84xf32, #tpu.memory_space<vmem>>, vector<1x50x84xf32>
    %191 = vector.shape_cast %190 : vector<1x50x84xf32> to vector<50x84xf32>
    %cst_137 = arith.constant dense<0.000000e+00> : vector<50x32xf32>
    %192 = tpu.matmul %191, %182, %cst_137 {dimension_numbers = #tpu.dot_dimension_numbers<[1], [0], [0], [1], [0, 0, 1, 1], [], []>} : vector<50x84xf32>, vector<84x32xf32>, vector<50x32xf32> -> vector<50x32xf32>
    %193 = arith.maximumf %189, %192 : vector<50x32xf32>
    %c0_138 = arith.constant 0 : index
    %c0_139 = arith.constant 0 : index
    %194 = vector.load %arg12[%c0_138, %c0_139] : memref<50x32xf32, #tpu.memory_space<vmem>>, vector<50x32xf32>
    tpu.vector_store %arg12[%c0_138, %c0_139], %193 {strides = array<i32>} : memref<50x32xf32, #tpu.memory_space<vmem>>, vector<50x32xf32>,
    return
  }
}

</mosaic_0001>

<bundles_post_ra>
// kernel: cnn_encoder1d_forward.1
= control target key start
LH: loop header
LB: loop body
LE: loop exit
PB: predicated region body
PF: predicated region fallthrough
CT: control target
= control target key end

     0   :  { %vm284_vm0 = vcmask 1044480   ;;  %v6744_v0 = vmov 0.0   ;;  %vm4976_vm1 = vmmov 0   ;;  %vm220_vm2 = vcmask 80896   ;;  %s6731_s1 = inlined_call_operand.vmem [shape: bf16[10,64], index: 1, kind: input, shape index: {}]   ;;  %s6732_s0 = inlined_call_operand.vmem [shape: bf16[336,10], index: 0, kind: input, shape index: {}]   ;;  %s6733_s2 = inlined_call_operand.vmem [shape: bf16[3,64,64], index: 2, kind: input, shape index: {}]   ;;  %s6734_s5 = inlined_call_operand.vmem [shape: f32[2,64], index: 5, kind: input, shape index: {}]   ;;  %s6735_s9 = inlined_call_operand.vmem [shape: f32[166,1], index: 9, kind: input, shape index: {}]   ;;  %s6736_s10 = inlined_call_operand.vmem [shape: f32[84,1], index: 10, kind: input, shape index: {}]   ;;  %s6737_s3 = inlined_call_operand.vmem [shape: bf16[3,64,64], index: 3, kind: input, shape index: {}]   ;;  %s6738_s6 = inlined_call_operand.vmem [shape: f32[2,64], index: 6, kind: input, shape index: {}]   ;;  %s6739_s4 = inlined_call_operand.vmem [shape: bf16[3,64,32], index: 4, kind: input, shape index: {}]   ;;  %s6740_s7 = inlined_call_operand.vmem [shape: f32[2,64], index: 7, kind: input, shape index: {}]   ;;  %s6741_s8 = inlined_call_operand.vmem [shape: f32[2,32], index: 8, kind: input, shape index: {}]   ;;  %s6742_s11 = inlined_call_operand.vmem [shape: f32[3,50,84], index: 11, kind: input, shape index: {}]   ;;  %s6743_s12 = inlined_call_operand.vmem [shape: f32[50,32], index: 12, kind: output, shape index: {}]  }
   0x1   :  { %4219 = vmatprep.subr.bf16.mxu0 %v6744_v0  ;;  %v4909_v1 = vld [vmem:[%s6731_s1] sm:$0x1f]   ;;  %4221 = vmatprep.mubr.msk.bf16.mxu0 %vm4976_vm1, %v6744_v0  ;;  %v4911_v4 = vld [vmem:[%s6732_s0 + $0x8] sm:$0xff]   ;;  %v4912_v5 = vld [vmem:[%s6732_s0 + $0x10] sm:$0xff]   ;;  %vm42_vm3 = vcmask 523264   ;;  %vm53_vm4 = vcmask 521216  }
   0x2   :  { %4305 = vmatprep.subr.bf16.mxu1 %v6744_v0  ;;  %4313 = vmatprep.mubr.msk.bf16.mxu1 %vm4976_vm1, %v6744_v0  ;;  %v286_v2 = vsel %vm284_vm0, %v4909_v1, 0  ;;  %v4910_v3 = vld [vmem:[%s6732_s0] sm:$0xff]   ;;  %v4913_v6 = vld [vmem:[%s6732_s0 + $0x18] sm:$0xff]   ;;  %43 = vst.msk [vmem:[#allocation5] sm:$0xff] %vm42_vm3, %v6744_v0  ;;  %44 = vst.msk [vmem:[#allocation5 + $0x8] sm:$0xff] %vm42_vm3, %v6744_v0  ;;  %vm2094_vm5 = vcmask 516096  }
   0x3   :  { %4220 = vmatpush3.bf16.msra.mxu0 %v286_v2  ;;  %v4914_v7 = vld [vmem:[%s6732_s0 + $0x20] sm:$0xff]   ;;  %45 = vst.msk [vmem:[#allocation5 + $0x10] sm:$0xff] %vm42_vm3, %v6744_v0  ;;  %46 = vst.msk [vmem:[#allocation5 + $0x18] sm:$0xff] %vm42_vm3, %v6744_v0  ;;  %v4915_v8 = vld [vmem:[%s6732_s0 + $0x28] sm:$0xff]   ;;  %vm2682_vm6 = vcmask 519168   ;;  %vm3268_vm7 = vcmask 261120  }
   0x4   :  { %47 = vst.msk [vmem:[#allocation5 + $0x20] sm:$0xff] %vm42_vm3, %v6744_v0  ;;  %48 = vst.msk [vmem:[#allocation5 + $0x28] sm:$0xff] %vm42_vm3, %v6744_v0  ;;  %v4916_v9 = vld [vmem:[%s6732_s0 + $0x30] sm:$0xff]   ;;  %v4917_v10 = vld [vmem:[%s6732_s0 + $0x38] sm:$0xff]   ;;  %vm3288_vm8 = vcmask 257024   ;;  %vm3416_vm9 = vcmask 1043456  }
   0x5   :  { %49 = vst.msk [vmem:[#allocation5 + $0x30] sm:$0xff] %vm42_vm3, %v6744_v0  ;;  %50 = vst.msk [vmem:[#allocation5 + $0x38] sm:$0xff] %vm42_vm3, %v6744_v0  ;;  %v4918_v11 = vld [vmem:[%s6732_s0 + $0x40] sm:$0xff]   ;;  %v4919_v12 = vld [vmem:[%s6732_s0 + $0x48] sm:$0xff]   ;;  %vm3394_vm10 = vcmask 687104   ;;  %vm3798_vm11 = vcmask 254976  }
   0x6   :  { %4222 = vmatmul.mubr.msk.bf16.vlgmr.msra.gmra.mrb[0].mxu0 %vm220_vm2, %v4910_v3  ;;  %51 = vst.msk [vmem:[#allocation5 + $0x40] sm:$0xff] %vm42_vm3, %v6744_v0  ;;  %52 = vst.msk [vmem:[#allocation5 + $0x48] sm:$0xff] %vm42_vm3, %v6744_v0  ;;  %v4920_v13 = vld [vmem:[%s6732_s0 + $0x50] sm:$0xff]   ;;  %v4921_v14 = vld [vmem:[%s6732_s0 + $0x58] sm:$0xff]  }
   0x7   :  { %4225 = vmatprep.mubr.msk.bf16.mxu0 %vm4976_vm1, %v6744_v0  ;;  %55 = vst.msk [vmem:[#allocation6] sm:$0xff] %vm42_vm3, %v6744_v0  ;;  %56 = vst.msk [vmem:[#allocation6 + $0x8] sm:$0xff] %vm42_vm3, %v6744_v0  ;;  %v4922_v15 = vld [vmem:[%s6732_s0 + $0x60] sm:$0xff]   ;;  %v4923_v16 = vld [vmem:[%s6732_s0 + $0x68] sm:$0xff]  }
   0x8   :  { %57 = vst.msk [vmem:[#allocation6 + $0x10] sm:$0xff] %vm42_vm3, %v6744_v0  ;;  %58 = vst.msk [vmem:[#allocation6 + $0x18] sm:$0xff] %vm42_vm3, %v6744_v0  ;;  %v4924_v17 = vld [vmem:[%s6732_s0 + $0x70] sm:$0xff]   ;;  %v4925_v18 = vld [vmem:[%s6732_s0 + $0x78] sm:$0xff]  }
   0x9   :  { %59 = vst.msk [vmem:[#allocation6 + $0x20] sm:$0xff] %vm42_vm3, %v6744_v0  ;;  %60 = vst.msk [vmem:[#allocation6 + $0x28] sm:$0xff] %vm42_vm3, %v6744_v0  ;;  %v4926_v19 = vld [vmem:[%s6732_s0 + $0x80] sm:$0xff]   ;;  %v4927_v20 = vld [vmem:[%s6732_s0 + $0x88] sm:$0xff]  }
   0xa   :  { %61 = vst.msk [vmem:[#allocation6 + $0x30] sm:$0xff] %vm42_vm3, %v6744_v0  ;;  %62 = vst.msk [vmem:[#allocation6 + $0x38] sm:$0xff] %vm42_vm3, %v6744_v0  ;;  %v4928_v21 = vld [vmem:[%s6732_s0 + $0x90] sm:$0xff]   ;;  %v4929_v22 = vld [vmem:[%s6732_s0 + $0x98] sm:$0xff]  }
   0xb   :  { %63 = vst.msk [vmem:[#allocation6 + $0x40] sm:$0xff] %vm42_vm3, %v6744_v0  ;;  %64 = vst.msk [vmem:[#allocation6 + $0x48] sm:$0xff] %vm42_vm3, %v6744_v0  ;;  %v4930_v23 = vld [vmem:[%s6732_s0 + $0xa0] sm:$0xff]  }
   0xe   :  { %4226 = vmatmul.mubr.msk.bf16.gmra.mrb[4].mxu0 %vm220_vm2, %v4911_v4 }
   0xf   :  { %4229 = vmatprep.mubr.msk.bf16.mxu0 %vm4976_vm1, %v6744_v0 }
  0x16   :  { %4230 = vmatmul.mubr.msk.bf16.gmra.mrb[8].mxu0 %vm220_vm2, %v4912_v5 }
  0x17   :  { %4233 = vmatprep.mubr.msk.bf16.mxu0 %vm4976_vm1, %v6744_v0 }
  0x1e   :  { %4234 = vmatmul.mubr.msk.bf16.gmra.mrb[12].mxu0 %vm220_vm2, %v4913_v6 }
  0x1f   :  { %4237 = vmatprep.mubr.msk.bf16.mxu0 %vm4976_vm1, %v6744_v0 }
  0x26   :  { %4238 = vmatmul.mubr.msk.bf16.gmra.mrb[16].mxu0 %vm220_vm2, %v4914_v7 }
  0x27   :  { %4241 = vmatprep.mubr.msk.bf16.mxu0 %vm4976_vm1, %v6744_v0 }
  0x2e   :  { %4242 = vmatmul.mubr.msk.bf16.gmra.mrb[20].mxu0 %vm220_vm2, %v4915_v8 }
  0x2f   :  { %4245 = vmatprep.mubr.msk.bf16.mxu0 %vm4976_vm1, %v6744_v0 }
  0x36   :  { %4246 = vmatmul.mubr.msk.bf16.gmra.mrb[24].mxu0 %vm220_vm2, %v4916_v9 }
  0x37   :  { %4249 = vmatprep.mubr.msk.bf16.mxu0 %vm4976_vm1, %v6744_v0 }
  0x3e   :  { %4250 = vmatmul.mubr.msk.bf16.gmra.mrb[28].mxu0 %vm220_vm2, %v4917_v10 }
  0x3f   :  { %4253 = vmatprep.mubr.msk.bf16.mxu0 %vm4976_vm1, %v6744_v0 }
  0x46   :  { %4254 = vmatmul.mubr.msk.bf16.gmra.mrb[32].mxu0 %vm220_vm2, %v4918_v11 }
  0x47   :  { %4257 = vmatprep.mubr.msk.bf16.mxu0 %vm4976_vm1, %v6744_v0 }
  0x4e   :  { %4258 = vmatmul.mubr.msk.bf16.gmra.mrb[36].mxu0 %vm220_vm2, %v4919_v12 }
  0x4f   :  { %4261 = vmatprep.mubr.msk.bf16.mxu0 %vm4976_vm1, %v6744_v0 }
  0x56   :  { %4262 = vmatmul.mubr.msk.bf16.gmra.mrb[40].mxu0 %vm220_vm2, %v4920_v13 }
  0x57   :  { %4265 = vmatprep.mubr.msk.bf16.mxu0 %vm4976_vm1, %v6744_v0 }
  0x5e   :  { %4266 = vmatmul.mubr.msk.bf16.gmra.mrb[44].mxu0 %vm220_vm2, %v4921_v14 }
  0x5f   :  { %4269 = vmatprep.mubr.msk.bf16.mxu0 %vm4976_vm1, %v6744_v0 }
  0x66   :  { %4270 = vmatmul.mubr.msk.bf16.gmra.mrb[48].mxu0 %vm220_vm2, %v4922_v15 }
  0x67   :  { %4273 = vmatprep.mubr.msk.bf16.mxu0 %vm4976_vm1, %v6744_v0 }
  0x6e   :  { %4274 = vmatmul.mubr.msk.bf16.gmra.mrb[52].mxu0 %vm220_vm2, %v4923_v16 }
  0x6f   :  { %4277 = vmatprep.mubr.msk.bf16.mxu0 %vm4976_vm1, %v6744_v0 }
  0x76   :  { %4278 = vmatmul.mubr.msk.bf16.gmra.mrb[56].mxu0 %vm220_vm2, %v4924_v17 }
  0x77   :  { %4281 = vmatprep.mubr.msk.bf16.mxu0 %vm4976_vm1, %v6744_v0 }
  0x7e   :  { %4282 = vmatmul.mubr.msk.bf16.gmra.mrb[60].mxu0 %vm220_vm2, %v4925_v18 }
  0x7f   :  { %4285 = vmatprep.mubr.msk.bf16.mxu0 %vm4976_vm1, %v6744_v0 }
  0x86   :  { %4286 = vmatmul.mubr.msk.bf16.gmra.mrb[64].mxu0 %vm220_vm2, %v4926_v19 }
  0x87   :  { %4289 = vmatprep.mubr.msk.bf16.mxu0 %vm4976_vm1, %v6744_v0 }
  0x8e   :  { %4290 = vmatmul.mubr.msk.bf16.gmra.mrb[68].mxu0 %vm220_vm2, %v4927_v20 }
  0x8f   :  { %4293 = vmatprep.mubr.msk.bf16.mxu0 %vm4976_vm1, %v6744_v0 }
  0x96   :  { %4294 = vmatmul.mubr.msk.bf16.gmra.mrb[72].mxu0 %vm220_vm2, %v4928_v21 }
  0x97   :  { %4297 = vmatprep.mubr.msk.bf16.mxu0 %vm4976_vm1, %v6744_v0 }
  0x9e   :  { %4298 = vmatmul.mubr.msk.bf16.gmra.mrb[76].mxu0 %vm220_vm2, %v4929_v22 }
  0x9f   :  { %4301 = vmatprep.mubr.msk.bf16.mxu0 %vm4976_vm1, %v6744_v0 }
  0xa6   :  { %4302 = vmatmul.mubr.msk.bf16.gmra.mrb[80].mxu0 %vm220_vm2, %v4930_v23 }
  0xd9   :  { %v5217_v24 = vpop.f32.mrb[0].mxu0 }
  0xda   :  { %v578_v25 = vmul.f32 %v5217_v24, %v5217_v24  ;;  %v4223_v26 = vpop.f32.mrb[1].mxu0  ;;  %v489_v28 = vsel %vm42_vm3, %v5217_v24, 0.0 }
  0xdb   :  { %v5221_v27 = vpop.f32.mrb[2].mxu0 }
  0xdc   :  { %v490_v29 = vsel %vm42_vm3, %v5221_v27, 0.0  ;;  %v579_v30 = vmul.f32 %v5221_v27, %v5221_v27  ;;  %v4224_v31 = vpop.f32.mrb[3].mxu0  ;;  %v620_v33 = vsel %vm42_vm3, %v578_v25, 0.0 }
  0xdd   :  { %v491_v32 = vadd.f32 %v490_v29, %v489_v28 }
  0xde   :  { %v621_v34 = vsel %vm42_vm3, %v579_v30, 0.0 }
  0xdf   :  { %v622_v35 = vadd.f32 %v621_v34, %v620_v33 }
  0xe1   :  { %v5231_v36 = vpop.f32.mrb[4].mxu0 }
  0xe2   :  { %v492_v37 = vsel %vm42_vm3, %v5231_v36, 0.0  ;;  %v580_v38 = vmul.f32 %v5231_v36, %v5231_v36  ;;  %v4227_v39 = vpop.f32.mrb[5].mxu0 }
  0xe3   :  { %v493_v40 = vadd.f32 %v492_v37, %v491_v32  ;;  %v5237_v41 = vpop.f32.mrb[6].mxu0 }
  0xe4   :  { %v623_v42 = vsel %vm42_vm3, %v580_v38, 0.0  ;;  %v494_v43 = vsel %vm42_vm3, %v5237_v41, 0.0  ;;  %v581_v44 = vmul.f32 %v5237_v41, %v5237_v41  ;;  %v4228_v45 = vpop.f32.mrb[7].mxu0 }
  0xe5   :  { %v624_v46 = vadd.f32 %v623_v42, %v622_v35  ;;  %v495_v47 = vadd.f32 %v494_v43, %v493_v40 }
  0xe6   :  { %v625_v48 = vsel %vm42_vm3, %v581_v44, 0.0 }
  0xe7   :  { %v626_v49 = vadd.f32 %v625_v48, %v624_v46 }
  0xe9   :  { %v5245_v50 = vpop.f32.mrb[8].mxu0 }
  0xea   :  { %v496_v51 = vsel %vm42_vm3, %v5245_v50, 0.0  ;;  %v582_v52 = vmul.f32 %v5245_v50, %v5245_v50  ;;  %v4231_v53 = vpop.f32.mrb[9].mxu0 }
  0xeb   :  { %v497_v54 = vadd.f32 %v496_v51, %v495_v47  ;;  %v5251_v55 = vpop.f32.mrb[10].mxu0 }
  0xec   :  { %v627_v56 = vsel %vm42_vm3, %v582_v52, 0.0  ;;  %v498_v57 = vsel %vm42_vm3, %v5251_v55, 0.0  ;;  %v583_v58 = vmul.f32 %v5251_v55, %v5251_v55  ;;  %v4232_v59 = vpop.f32.mrb[11].mxu0 }
  0xed   :  { %v628_v60 = vadd.f32 %v627_v56, %v626_v49  ;;  %v499_v61 = vadd.f32 %v498_v57, %v497_v54 }
  0xee   :  { %v629_v62 = vsel %vm42_vm3, %v583_v58, 0.0 }
  0xef   :  { %v630_v63 = vadd.f32 %v629_v62, %v628_v60 }
  0xf1   :  { %v5259_v1 = vpop.f32.mrb[12].mxu0 }
  0xf2   :  { %v500_v2 = vsel %vm42_vm3, %v5259_v1, 0.0  ;;  %v584_v3 = vmul.f32 %v5259_v1, %v5259_v1  ;;  %v4235_v4 = vpop.f32.mrb[13].mxu0 }
  0xf3   :  { %v501_v5 = vadd.f32 %v500_v2, %v499_v61  ;;  %v5265_v6 = vpop.f32.mrb[14].mxu0 }
  0xf4   :  { %v631_v7 = vsel %vm42_vm3, %v584_v3, 0.0  ;;  %v502_v8 = vsel %vm42_vm3, %v5265_v6, 0.0  ;;  %v585_v9 = vmul.f32 %v5265_v6, %v5265_v6  ;;  %v4236_v10 = vpop.f32.mrb[15].mxu0 }
  0xf5   :  { %v632_v11 = vadd.f32 %v631_v7, %v630_v63  ;;  %v503_v12 = vadd.f32 %v502_v8, %v501_v5 }
  0xf6   :  { %v633_v13 = vsel %vm42_vm3, %v585_v9, 0.0 }
  0xf7   :  { %v634_v14 = vadd.f32 %v633_v13, %v632_v11 }
  0xf9   :  { %v5273_v15 = vpop.f32.mrb[16].mxu0 }
  0xfa   :  { %v504_v16 = vsel %vm42_vm3, %v5273_v15, 0.0  ;;  %v586_v17 = vmul.f32 %v5273_v15, %v5273_v15  ;;  %v4239_v18 = vpop.f32.mrb[17].mxu0 }
  0xfb   :  { %v505_v19 = vadd.f32 %v504_v16, %v503_v12  ;;  %v5279_v20 = vpop.f32.mrb[18].mxu0 }
  0xfc   :  { %v635_v21 = vsel %vm42_vm3, %v586_v17, 0.0  ;;  %v506_v22 = vsel %vm42_vm3, %v5279_v20, 0.0  ;;  %v587_v23 = vmul.f32 %v5279_v20, %v5279_v20  ;;  %v4240_v25 = vpop.f32.mrb[19].mxu0 }
  0xfd   :  { %v636_v26 = vadd.f32 %v635_v21, %v634_v14  ;;  %v507_v28 = vadd.f32 %v506_v22, %v505_v19 }
  0xfe   :  { %v637_v29 = vsel %vm42_vm3, %v587_v23, 0.0 }
  0xff   :  { %v638_v30 = vadd.f32 %v637_v29, %v636_v26 }
 0x101   :  { %v5287_v31 = vpop.f32.mrb[20].mxu0 }
 0x102   :  { %v508_v32 = vsel %vm42_vm3, %v5287_v31, 0.0  ;;  %v588_v33 = vmul.f32 %v5287_v31, %v5287_v31  ;;  %v4243_v34 = vpop.f32.mrb[21].mxu0 }
 0x103   :  { %v509_v35 = vadd.f32 %v508_v32, %v507_v28  ;;  %v5293_v37 = vpop.f32.mrb[22].mxu0 }
 0x104   :  { %v639_v38 = vsel %vm42_vm3, %v588_v33, 0.0  ;;  %v510_v39 = vsel %vm42_vm3, %v5293_v37, 0.0  ;;  %v589_v40 = vmul.f32 %v5293_v37, %v5293_v37  ;;  %v4244_v42 = vpop.f32.mrb[23].mxu0 }
 0x105   :  { %v640_v43 = vadd.f32 %v639_v38, %v638_v30  ;;  %v511_v44 = vadd.f32 %v510_v39, %v509_v35 }
 0x106   :  { %v641_v45 = vsel %vm42_vm3, %v589_v40, 0.0 }
 0x107   :  { %v642_v46 = vadd.f32 %v641_v45, %v640_v43 }
 0x109   :  { %v5301_v47 = vpop.f32.mrb[24].mxu0 }
 0x10a   :  { %v512_v48 = vsel %vm42_vm3, %v5301_v47, 0.0  ;;  %v590_v49 = vmul.f32 %v5301_v47, %v5301_v47  ;;  %v4247_v51 = vpop.f32.mrb[25].mxu0 }
 0x10b   :  { %v513_v52 = vadd.f32 %v512_v48, %v511_v44  ;;  %v5307_v53 = vpop.f32.mrb[26].mxu0 }
 0x10c   :  { %v643_v54 = vsel %vm42_vm3, %v590_v49, 0.0  ;;  %v514_v56 = vsel %vm42_vm3, %v5307_v53, 0.0  ;;  %v591_v57 = vmul.f32 %v5307_v53, %v5307_v53  ;;  %v4248_v58 = vpop.f32.mrb[27].mxu0 }
 0x10d   :  { %v644_v59 = vadd.f32 %v643_v54, %v642_v46  ;;  %v515_v60 = vadd.f32 %v514_v56, %v513_v52 }
 0x10e   :  { %v645_v61 = vsel %vm42_vm3, %v591_v57, 0.0 }
 0x10f   :  { %v646_v62 = vadd.f32 %v645_v61, %v644_v59 }
 0x111   :  { %v5315_v63 = vpop.f32.mrb[28].mxu0 }
 0x112   :  { %v516_v2 = vsel %vm42_vm3, %v5315_v63, 0.0  ;;  %v592_v3 = vmul.f32 %v5315_v63, %v5315_v63  ;;  %v4251_v4 = vpop.f32.mrb[29].mxu0 }
 0x113   :  { %v517_v5 = vadd.f32 %v516_v2, %v515_v60  ;;  %v5321_v7 = vpop.f32.mrb[30].mxu0 }
 0x114   :  { %v647_v8 = vsel %vm42_vm3, %v592_v3, 0.0  ;;  %v518_v9 = vsel %vm42_vm3, %v5321_v7, 0.0  ;;  %v593_v10 = vmul.f32 %v5321_v7, %v5321_v7  ;;  %v4252_v11 = vpop.f32.mrb[31].mxu0 }
 0x115   :  { %v648_v12 = vadd.f32 %v647_v8, %v646_v62  ;;  %v519_v13 = vadd.f32 %v518_v9, %v517_v5 }
 0x116   :  { %v649_v14 = vsel %vm42_vm3, %v593_v10, 0.0 }
 0x117   :  { %v650_v16 = vadd.f32 %v649_v14, %v648_v12 }
 0x119   :  { %v5329_v17 = vpop.f32.mrb[32].mxu0 }
 0x11a   :  { %v520_v18 = vsel %vm42_vm3, %v5329_v17, 0.0  ;;  %v594_v19 = vmul.f32 %v5329_v17, %v5329_v17  ;;  %v4255_v21 = vpop.f32.mrb[33].mxu0 }
 0x11b   :  { %v521_v22 = vadd.f32 %v520_v18, %v519_v13  ;;  %v5335_v23 = vpop.f32.mrb[34].mxu0 }
 0x11c   :  { %v651_v25 = vsel %vm42_vm3, %v594_v19, 0.0  ;;  %v522_v26 = vsel %vm42_vm3, %v5335_v23, 0.0  ;;  %v595_v28 = vmul.f32 %v5335_v23, %v5335_v23  ;;  %v4256_v29 = vpop.f32.mrb[35].mxu0 }
 0x11d   :  { %v652_v30 = vadd.f32 %v651_v25, %v650_v16  ;;  %v523_v32 = vadd.f32 %v522_v26, %v521_v22 }
 0x11e   :  { %v653_v33 = vsel %vm42_vm3, %v595_v28, 0.0 }
 0x11f   :  { %v654_v34 = vadd.f32 %v653_v33, %v652_v30 }
 0x121   :  { %v5343_v35 = vpop.f32.mrb[36].mxu0 }
 0x122   :  { %v524_v38 = vsel %vm42_vm3, %v5343_v35, 0.0  ;;  %v596_v39 = vmul.f32 %v5343_v35, %v5343_v35  ;;  %v4259_v40 = vpop.f32.mrb[37].mxu0 }
 0x123   :  { %v525_v42 = vadd.f32 %v524_v38, %v523_v32  ;;  %v5349_v43 = vpop.f32.mrb[38].mxu0 }
 0x124   :  { %v655_v44 = vsel %vm42_vm3, %v596_v39, 0.0  ;;  %v526_v45 = vsel %vm42_vm3, %v5349_v43, 0.0  ;;  %v597_v46 = vmul.f32 %v5349_v43, %v5349_v43  ;;  %v4260_v48 = vpop.f32.mrb[39].mxu0 }
 0x125   :  { %v656_v49 = vadd.f32 %v655_v44, %v654_v34  ;;  %v527_v51 = vadd.f32 %v526_v45, %v525_v42 }
 0x126   :  { %v657_v52 = vsel %vm42_vm3, %v597_v46, 0.0 }
 0x127   :  { %v658_v54 = vadd.f32 %v657_v52, %v656_v49 }
 0x129   :  { %v5357_v56 = vpop.f32.mrb[40].mxu0 }
 0x12a   :  { %v528_v57 = vsel %vm42_vm3, %v5357_v56, 0.0  ;;  %v598_v58 = vmul.f32 %v5357_v56, %v5357_v56  ;;  %v4263_v59 = vpop.f32.mrb[41].mxu0 }
 0x12b   :  { %v529_v60 = vadd.f32 %v528_v57, %v527_v51  ;;  %v5363_v61 = vpop.f32.mrb[42].mxu0 }
 0x12c   :  { %v659_v62 = vsel %vm42_vm3, %v598_v58, 0.0  ;;  %v530_v2 = vsel %vm42_vm3, %v5363_v61, 0.0  ;;  %v599_v3 = vmul.f32 %v5363_v61, %v5363_v61  ;;  %v4264_v4 = vpop.f32.mrb[43].mxu0 }
 0x12d   :  { %v660_v5 = vadd.f32 %v659_v62, %v658_v54  ;;  %v531_v8 = vadd.f32 %v530_v2, %v529_v60 }
 0x12e   :  { %v661_v9 = vsel %vm42_vm3, %v599_v3, 0.0 }
 0x12f   :  { %v662_v10 = vadd.f32 %v661_v9, %v660_v5 }
 0x131   :  { %v5371_v11 = vpop.f32.mrb[44].mxu0 }
 0x132   :  { %v532_v12 = vsel %vm42_vm3, %v5371_v11, 0.0  ;;  %v600_v13 = vmul.f32 %v5371_v11, %v5371_v11  ;;  %v4267_v14 = vpop.f32.mrb[45].mxu0 }
 0x133   :  { %v533_v16 = vadd.f32 %v532_v12, %v531_v8  ;;  %v5377_v18 = vpop.f32.mrb[46].mxu0 }
 0x134   :  { %v663_v19 = vsel %vm42_vm3, %v600_v13, 0.0  ;;  %v534_v21 = vsel %vm42_vm3, %v5377_v18, 0.0  ;;  %v601_v22 = vmul.f32 %v5377_v18, %v5377_v18  ;;  %v4268_v25 = vpop.f32.mrb[47].mxu0 }
 0x135   :  { %v664_v26 = vadd.f32 %v663_v19, %v662_v10  ;;  %v535_v28 = vadd.f32 %v534_v21, %v533_v16  ;;  %v4931_v25 = vld [vmem:[%s6733_s2 + $0x20] sm:$0xff]  }
 0x136   :  { %v665_v29 = vsel %vm42_vm3, %v601_v22, 0.0  ;;  %4306 = vmatpush3.bf16.msra.mxu1 %v4931_v25 }
 0x137   :  { %v666_v30 = vadd.f32 %v665_v29, %v664_v26  ;;  %4307 = vmatprep.subr.bf16.mxu1 %v6744_v0 }
 0x139   :  { %v5385_v32 = vpop.f32.mrb[48].mxu0 }
 0x13a   :  { %v536_v33 = vsel %vm42_vm3, %v5385_v32, 0.0  ;;  %v602_v34 = vmul.f32 %v5385_v32, %v5385_v32  ;;  %v4271_v38 = vpop.f32.mrb[49].mxu0 }
 0x13b   :  { %v537_v39 = vadd.f32 %v536_v33, %v535_v28  ;;  %v5391_v40 = vpop.f32.mrb[50].mxu0 }
 0x13c   :  { %v667_v42 = vsel %vm42_vm3, %v602_v34, 0.0  ;;  %v538_v44 = vsel %vm42_vm3, %v5391_v40, 0.0  ;;  %v603_v45 = vmul.f32 %v5391_v40, %v5391_v40  ;;  %v4272_v46 = vpop.f32.mrb[51].mxu0 }
 0x13d   :  { %v668_v48 = vadd.f32 %v667_v42, %v666_v30  ;;  %v539_v49 = vadd.f32 %v538_v44, %v537_v39  ;;  %v4932_v42 = vld [vmem:[%s6733_s2 + $0x28] sm:$0xff]  }
 0x13e   :  { %v669_v51 = vsel %vm42_vm3, %v603_v45, 0.0  ;;  %4308 = vmatpush3.bf16.msra.mxu1 %v4932_v42 }
 0x13f   :  { %v670_v52 = vadd.f32 %v669_v51, %v668_v48  ;;  %4309 = vmatprep.subr.bf16.mxu1 %v6744_v0 }
 0x141   :  { %v5399_v54 = vpop.f32.mrb[52].mxu0 }
 0x142   :  { %v540_v57 = vsel %vm42_vm3, %v5399_v54, 0.0  ;;  %v604_v58 = vmul.f32 %v5399_v54, %v5399_v54  ;;  %v4275_v59 = vpop.f32.mrb[53].mxu0 }
 0x143   :  { %v541_v60 = vadd.f32 %v540_v57, %v539_v49  ;;  %v5405_v62 = vpop.f32.mrb[54].mxu0  ;;  %v4933_v49 = vld [vmem:[%s6733_s2 + $0x30] sm:$0xff]  }
 0x144   :  { %v671_v2 = vsel %vm42_vm3, %v604_v58, 0.0  ;;  %v542_v3 = vsel %vm42_vm3, %v5405_v62, 0.0  ;;  %v605_v4 = vmul.f32 %v5405_v62, %v5405_v62  ;;  %v4276_v5 = vpop.f32.mrb[55].mxu0  ;;  %4310 = vmatpush3.bf16.msra.mxu1 %v4933_v49 }
 0x145   :  { %v672_v8 = vadd.f32 %v671_v2, %v670_v52  ;;  %v543_v9 = vadd.f32 %v542_v3, %v541_v60  ;;  %v4934_v2 = vld [vmem:[%s6733_s2 + $0x38] sm:$0xff]   ;;  %4311 = vmatprep.subr.bf16.mxu1 %v6744_v0 }
 0x146   :  { %v673_v10 = vsel %vm42_vm3, %v605_v4, 0.0 }
 0x147   :  { %v674_v12 = vadd.f32 %v673_v10, %v672_v8 }
 0x148   :  { %4312 = vmatpush3.bf16.msra.mxu1 %v4934_v2 }
 0x149   :  { %v5413_v13 = vpop.f32.mrb[56].mxu0  ;;  %4357 = vmatprep.subr.bf16.mxu1 %v6744_v0 }
 0x14a   :  { %v544_v14 = vsel %vm42_vm3, %v5413_v13, 0.0  ;;  %v606_v16 = vmul.f32 %v5413_v13, %v5413_v13  ;;  %v4279_v19 = vpop.f32.mrb[57].mxu0 }
 0x14b   :  { %v545_v21 = vadd.f32 %v544_v14, %v543_v9  ;;  %v5419_v22 = vpop.f32.mrb[58].mxu0 }
 0x14c   :  { %v675_v26 = vsel %vm42_vm3, %v606_v16, 0.0  ;;  %v546_v28 = vsel %vm42_vm3, %v5419_v22, 0.0  ;;  %v607_v29 = vmul.f32 %v5419_v22, %v5419_v22  ;;  %v4280_v30 = vpop.f32.mrb[59].mxu0 }
 0x14d   :  { %v676_v33 = vadd.f32 %v675_v26, %v674_v12  ;;  %v547_v34 = vadd.f32 %v546_v28, %v545_v21 }
 0x14e   :  { %v677_v38 = vsel %vm42_vm3, %v607_v29, 0.0 }
 0x14f   :  { %v678_v39 = vadd.f32 %v677_v38, %v676_v33 }
 0x151   :  { %v5434_v44 = vpop.f32.mrb[60].mxu0 }
 0x152   :  { %v548_v45 = vsel %vm42_vm3, %v5434_v44, 0.0  ;;  %v608_v46 = vmul.f32 %v5434_v44, %v5434_v44  ;;  %v4283_v48 = vpop.f32.mrb[61].mxu0 }
 0x153   :  { %v549_v51 = vadd.f32 %v548_v45, %v547_v34  ;;  %v5444_v52 = vpop.f32.mrb[62].mxu0 }
 0x154   :  { %v679_v57 = vsel %vm42_vm3, %v608_v46, 0.0  ;;  %v550_v58 = vsel %vm42_vm3, %v5444_v52, 0.0  ;;  %v609_v59 = vmul.f32 %v5444_v52, %v5444_v52  ;;  %v4284_v60 = vpop.f32.mrb[63].mxu0 }
 0x155   :  { %v680_v3 = vadd.f32 %v679_v57, %v678_v39  ;;  %v551_v4 = vadd.f32 %v550_v58, %v549_v51 }
 0x156   :  { %v681_v5 = vsel %vm42_vm3, %v609_v59, 0.0 }
 0x157   :  { %v682_v8 = vadd.f32 %v681_v5, %v680_v3 }
 0x159   :  { %v5456_v9 = vpop.f32.mrb[64].mxu0 }
 0x15a   :  { %v552_v10 = vsel %vm42_vm3, %v5456_v9, 0.0  ;;  %v610_v12 = vmul.f32 %v5456_v9, %v5456_v9  ;;  %v4287_v14 = vpop.f32.mrb[65].mxu0 }
 0x15b   :  { %v553_v16 = vadd.f32 %v552_v10, %v551_v4  ;;  %v5463_v19 = vpop.f32.mrb[66].mxu0 }
 0x15c   :  { %v683_v21 = vsel %vm42_vm3, %v610_v12, 0.0  ;;  %v554_v25 = vsel %vm42_vm3, %v5463_v19, 0.0  ;;  %v611_v26 = vmul.f32 %v5463_v19, %v5463_v19  ;;  %v4288_v28 = vpop.f32.mrb[67].mxu0 }
 0x15d   :  { %v684_v29 = vadd.f32 %v683_v21, %v682_v8  ;;  %v555_v30 = vadd.f32 %v554_v25, %v553_v16 }
 0x15e   :  { %v685_v33 = vsel %vm42_vm3, %v611_v26, 0.0 }
 0x15f   :  { %v686_v34 = vadd.f32 %v685_v33, %v684_v29 }
 0x161   :  { %v5471_v38 = vpop.f32.mrb[68].mxu0 }
 0x162   :  { %v556_v39 = vsel %vm42_vm3, %v5471_v38, 0.0  ;;  %v612_v42 = vmul.f32 %v5471_v38, %v5471_v38  ;;  %v4291_v45 = vpop.f32.mrb[69].mxu0 }
 0x163   :  { %v557_v46 = vadd.f32 %v556_v39, %v555_v30  ;;  %v5477_v48 = vpop.f32.mrb[70].mxu0 }
 0x164   :  { %v687_v49 = vsel %vm42_vm3, %v612_v42, 0.0  ;;  %v558_v51 = vsel %vm42_vm3, %v5477_v48, 0.0  ;;  %v613_v57 = vmul.f32 %v5477_v48, %v5477_v48  ;;  %v4292_v58 = vpop.f32.mrb[71].mxu0 }
 0x165   :  { %v688_v59 = vadd.f32 %v687_v49, %v686_v34  ;;  %v559_v60 = vadd.f32 %v558_v51, %v557_v46 }
 0x166   :  { %v689_v2 = vsel %vm42_vm3, %v613_v57, 0.0 }
 0x167   :  { %v690_v3 = vadd.f32 %v689_v2, %v688_v59 }
 0x169   :  { %v5485_v4 = vpop.f32.mrb[72].mxu0 }
 0x16a   :  { %v560_v5 = vsel %vm42_vm3, %v5485_v4, 0.0  ;;  %v614_v8 = vmul.f32 %v5485_v4, %v5485_v4  ;;  %v4295_v10 = vpop.f32.mrb[73].mxu0 }
 0x16b   :  { %v561_v12 = vadd.f32 %v560_v5, %v559_v60  ;;  %v5491_v14 = vpop.f32.mrb[74].mxu0 }
 0x16c   :  { %v691_v16 = vsel %vm42_vm3, %v614_v8, 0.0  ;;  %v562_v21 = vsel %vm42_vm3, %v5491_v14, 0.0  ;;  %v615_v25 = vmul.f32 %v5491_v14, %v5491_v14  ;;  %v4296_v26 = vpop.f32.mrb[75].mxu0 }
 0x16d   :  { %v692_v28 = vadd.f32 %v691_v16, %v690_v3  ;;  %v563_v29 = vadd.f32 %v562_v21, %v561_v12 }
 0x16e   :  { %v693_v30 = vsel %vm42_vm3, %v615_v25, 0.0 }
 0x16f   :  { %v694_v33 = vadd.f32 %v693_v30, %v692_v28 }
 0x171   :  { %v5499_v34 = vpop.f32.mrb[76].mxu0 }
 0x172   :  { %6748 = vst [vmem:[#allocation7_spill] sm:$0xff] %v5499_v34  ;;  %v564_v39 = vsel %vm42_vm3, %v5499_v34, 0.0  ;;  %v616_v42 = vmul.f32 %v5499_v34, %v5499_v34  ;;  %v4299_v45 = vpop.f32.mrb[77].mxu0 }
 0x173   :  { %v565_v46 = vadd.f32 %v564_v39, %v563_v29  ;;  %v5505_v49 = vpop.f32.mrb[78].mxu0 }
 0x174   :  { %6749 = vst [vmem:[#allocation8_spill] sm:$0xff] %v5505_v49  ;;  %v695_v51 = vsel %vm42_vm3, %v616_v42, 0.0  ;;  %v566_v57 = vsel %vm42_vm3, %v5505_v49, 0.0  ;;  %v617_v58 = vmul.f32 %v5505_v49, %v5505_v49  ;;  %v4300_v59 = vpop.f32.mrb[79].mxu0 }
 0x175   :  { %v696_v60 = vadd.f32 %v695_v51, %v694_v33  ;;  %v567_v2 = vadd.f32 %v566_v57, %v565_v46 }
 0x176   :  { %v697_v3 = vsel %vm42_vm3, %v617_v58, 0.0 }
 0x177   :  { %v698_v5 = vadd.f32 %v697_v3, %v696_v60 }
 0x179   :  { %v482_v8 = vpop.f32.mrb[80].mxu0 }
 0x17a   :  { %v568_v10 = vsel %vm42_vm3, %v482_v8, 0.0  ;;  %v618_v12 = vmul.f32 %v482_v8, %v482_v8  ;;  %v4303_v16 = vpop.f32.mrb[81].mxu0 }
 0x17b   :  { %v569_v21 = vadd.f32 %v568_v10, %v567_v2  ;;  %v485_v25 = vpop.f32.mrb[82].mxu0 }
 0x17c   :  { %v699_v26 = vsel %vm42_vm3, %v618_v12, 0.0  ;;  %v570_v28 = vsel %vm42_vm3, %v485_v25, 0.0  ;;  %v619_v29 = vmul.f32 %v485_v25, %v485_v25  ;;  %v4304_v30 = vpop.f32.mrb[83].mxu0 }
 0x17d   :  { %v700_v39 = vadd.f32 %v699_v26, %v698_v5  ;;  %v571_v42 = vadd.f32 %v570_v28, %v569_v21  ;;  %v720_v26 = vlaneseq }
 0x17e   :  { %v701_v33 = vsel %vm42_vm3, %v619_v29, 0.0  ;;  %v713_v29 = vld [vmem:[%s6734_s5] sm:$0x1] }
 0x17f   :  { %v572_v45 = vrot.slane %v571_v42, 4  ;;  %v702_v46 = vadd.f32 %v701_v33, %v700_v39  ;;  %v721_v28 = vshrl.u32 %v720_v26, 7 }
 0x181   :  { %v573_v51 = vadd.f32 %v572_v45, %v571_v42  ;;  %v703_v57 = vrot.slane %v702_v46, 4  ;;  %v5520_v39 = vsub.s32 0, %v721_v28  ;;  %v714_v45 = vld [vmem:[%s6734_s5 + $0x1] sm:$0x1]  ;;  %v6750_v28 = vld [vmem:[#allocation7_spill] sm:$0xff] }
 0x183   :  { %v574_v58 = vrot.slane %v573_v51, 2  ;;  %v704_v59 = vadd.f32 %v703_v57, %v702_v46 }
 0x185   :  { %v575_v60 = vadd.f32 %v574_v58, %v573_v51  ;;  %v705_v3 = vrot.slane %v704_v59, 2 }
 0x187   :  { %v576_v2 = vrot.slane %v575_v60, 1  ;;  %v706_v10 = vadd.f32 %v705_v3, %v704_v59 }
 0x189   :  { %v577_v16 = vadd.f32 %v576_v2, %v575_v60  ;;  %v707_v12 = vrot.slane %v706_v10, 1 }
 0x18b   :  { %v708_v0 = vadd.f32 %v707_v12, %v706_v10  ;;  %v709_v49 = vmul.f32 0.0029761905, %v577_v16 }
 0x18d   :  { %v710_v34 = vmul.f32 0.0029761905, %v708_v0  ;;  %v711_v30 = vmul.f32 %v709_v49, %v709_v49 }
 0x18f   :  { %v712_v5 = vsub.f32 %v710_v34, %v711_v30 }
 0x191   :  { %v715_v21 = vadd.f32 1e-05, %v712_v5 }
 0x193   :  { %4967 = vrsqrt.f32 %v715_v21 }
 0x19d   :  { %v4968_v42 = vpop.eup %4967 }
 0x19e   :  { %v717_v33 = vmul.f32 %v4968_v42, %v713_v29  ;;  %v6751_v29 = vld [vmem:[#allocation8_spill] sm:$0xff] }
 0x1a0   :  { %v718_v46 = vmul.f32 %v717_v33, %v709_v49  ;;  %v723_v0 = vrot.slane %v717_v33, %v5520_v39 }
 0x1a2   :  { %v719_v34 = vsub.f32 %v714_v45, %v718_v46  ;;  %v764_v51 = vmul.f32 %v723_v0, %v482_v8  ;;  %v765_v57 = vmul.f32 %v723_v0, %v485_v25  ;;  %v724_v58 = vmul.f32 %v723_v0, %v5217_v24 }
 0x1a3   :  { %v725_v59 = vmul.f32 %v723_v0, %v5221_v27  ;;  %v726_v60 = vmul.f32 %v723_v0, %v5231_v36  ;;  %v727_v3 = vmul.f32 %v723_v0, %v5237_v41  ;;  %v728_v2 = vmul.f32 %v723_v0, %v5245_v50 }
 0x1a4   :  { %v5532_v10 = vrot.slane %v719_v34, %v5520_v39  ;;  %v729_v49 = vmul.f32 %v723_v0, %v5251_v55  ;;  %v730_v16 = vmul.f32 %v723_v0, %v5259_v1  ;;  %v731_v8 = vmul.f32 %v723_v0, %v5265_v6 }
 0x1a5   :  { %v732_v25 = vmul.f32 %v723_v0, %v5273_v15  ;;  %v733_v24 = vmul.f32 %v723_v0, %v5279_v20  ;;  %v734_v27 = vmul.f32 %v723_v0, %v5287_v31  ;;  %v735_v36 = vmul.f32 %v723_v0, %v5293_v37 }
 0x1a6   :  { %v810_v41 = vadd.f32 %v5532_v10, %v764_v51  ;;  %v811_v50 = vadd.f32 %v5532_v10, %v765_v57  ;;  %v736_v12 = vmul.f32 %v723_v0, %v5301_v47  ;;  %v737_v55 = vmul.f32 %v723_v0, %v5307_v53 }
 0x1a7   :  { %v738_v1 = vmul.f32 %v723_v0, %v5315_v63  ;;  %v739_v6 = vmul.f32 %v723_v0, %v5321_v7  ;;  %v740_v15 = vmul.f32 %v723_v0, %v5329_v17  ;;  %v741_v20 = vmul.f32 %v723_v0, %v5335_v23 }
 0x1a8   :  { %v852_v30 = vmax.f32 %v810_v41, 0.0  ;;  %v853_v31 = vmax.f32 %v811_v50, 0.0  ;;  %v742_v37 = vmul.f32 %v723_v0, %v5343_v35  ;;  %v743_v5 = vmul.f32 %v723_v0, %v5349_v43 }
 0x1a9   :  { %v744_v21 = vmul.f32 %v723_v0, %v5357_v56  ;;  %v745_v47 = vmul.f32 %v723_v0, %v5363_v61  ;;  %v746_v53 = vmul.f32 %v723_v0, %v5371_v11  ;;  %v747_v63 = vmul.f32 %v723_v0, %v5377_v18 }
 0x1aa   :  { %894 = vst.msk [vmem:[#allocation2 + $0x140] sm:$0xff] %vm42_vm3, %v852_v30  ;;  %895 = vst.msk [vmem:[#allocation2 + $0x148] sm:$0xff] %vm42_vm3, %v853_v31  ;;  %v748_v7 = vmul.f32 %v723_v0, %v5385_v32  ;;  %v749_v17 = vmul.f32 %v723_v0, %v5391_v40  ;;  %v750_v23 = vmul.f32 %v723_v0, %v5399_v54 }
 0x1ab   :  { %v751_v35 = vmul.f32 %v723_v0, %v5405_v62  ;;  %v752_v43 = vmul.f32 %v723_v0, %v5413_v13  ;;  %v753_v56 = vmul.f32 %v723_v0, %v5419_v22  ;;  %v754_v61 = vmul.f32 %v723_v0, %v5434_v44 }
 0x1ac   :  { %v755_v11 = vmul.f32 %v723_v0, %v5444_v52  ;;  %v756_v18 = vmul.f32 %v723_v0, %v5456_v9  ;;  %v757_v26 = vmul.f32 %v723_v0, %v5463_v19  ;;  %v758_v32 = vmul.f32 %v723_v0, %v5471_v38 }
 0x1ad   :  { %v759_v40 = vmul.f32 %v723_v0, %v5477_v48  ;;  %v760_v54 = vmul.f32 %v723_v0, %v5485_v4  ;;  %v761_v62 = vmul.f32 %v723_v0, %v5491_v14  ;;  %v762_v13 = vmul.f32 %v723_v0, %v6750_v28 }
 0x1ae   :  { %v763_v22 = vmul.f32 %v723_v0, %v6751_v29  ;;  %v770_v44 = vadd.f32 %v5532_v10, %v724_v58  ;;  %v771_v52 = vadd.f32 %v5532_v10, %v725_v59  ;;  %v772_v9 = vadd.f32 %v5532_v10, %v726_v60 }
 0x1af   :  { %v773_v19 = vadd.f32 %v5532_v10, %v727_v3  ;;  %v774_v38 = vadd.f32 %v5532_v10, %v728_v2  ;;  %v775_v48 = vadd.f32 %v5532_v10, %v729_v49  ;;  %v776_v4 = vadd.f32 %v5532_v10, %v730_v16 }
 0x1b0   :  { %v5581_v14 = vadd.f32 %v5532_v10, %v731_v8  ;;  %v5584_v42 = vadd.f32 %v5532_v10, %v732_v25  ;;  %v5587_v33 = vadd.f32 %v5532_v10, %v733_v24  ;;  %v5590_v45 = vadd.f32 %v5532_v10, %v734_v27 }
 0x1b1   :  { %v5593_v46 = vadd.f32 %v5532_v10, %v735_v36  ;;  %v936_v0 = vld [vmem:[#allocation2 + $0x140] ss:$2 sm:$0xff]  ;;  %v978_v34 = vld [vmem:[#allocation2 + $0x141] ss:$2 sm:$0xff]  ;;  %v5596_v51 = vadd.f32 %v5532_v10, %v736_v12  ;;  %v5599_v57 = vadd.f32 %v5532_v10, %v737_v55  ;;  %v5602_v58 = vadd.f32 %v5532_v10, %v738_v1 }
 0x1b2   :  { %v5605_v59 = vadd.f32 %v5532_v10, %v739_v6  ;;  %v999_v60 = vmax.f32 %v936_v0, %v978_v34  ;;  %v5608_v3 = vadd.f32 %v5532_v10, %v740_v15  ;;  %v5611_v2 = vadd.f32 %v5532_v10, %v741_v20 }
 0x1b3   :  { %v5614_v49 = vadd.f32 %v5532_v10, %v742_v37  ;;  %v5617_v16 = vadd.f32 %v5532_v10, %v743_v5  ;;  %v5620_v8 = vadd.f32 %v5532_v10, %v744_v21  ;;  %v5623_v25 = vadd.f32 %v5532_v10, %v745_v47 }
 0x1b4   :  { %v5626_v24 = vadd.f32 %v5532_v10, %v746_v53  ;;  %1020 = vst.msk [vmem:[#allocation3 + $0xa0] sm:$0xff] %vm42_vm3, %v999_v60  ;;  %v5630_v27 = vadd.f32 %v5532_v10, %v747_v63  ;;  %v5633_v36 = vadd.f32 %v5532_v10, %v748_v7  ;;  %v5636_v41 = vadd.f32 %v5532_v10, %v749_v17 }
 0x1b5   :  { %v5639_v50 = vadd.f32 %v5532_v10, %v750_v23  ;;  %v5642_v12 = vadd.f32 %v5532_v10, %v751_v35  ;;  %v5645_v55 = vadd.f32 %v5532_v10, %v752_v43  ;;  %v5648_v1 = vadd.f32 %v5532_v10, %v753_v56 }
 0x1b6   :  { %v5651_v6 = vadd.f32 %v5532_v10, %v754_v61  ;;  %v5654_v15 = vadd.f32 %v5532_v10, %v755_v11  ;;  %v5657_v20 = vadd.f32 %v5532_v10, %v756_v18  ;;  %v5660_v30 = vadd.f32 %v5532_v10, %v757_v26 }
 0x1b7   :  { %v5663_v31 = vadd.f32 %v5532_v10, %v758_v32  ;;  %v5666_v37 = vadd.f32 %v5532_v10, %v759_v40  ;;  %v5669_v5 = vadd.f32 %v5532_v10, %v760_v54  ;;  %v5672_v21 = vadd.f32 %v5532_v10, %v761_v62 }
 0x1b8   :  { %v5675_v47 = vadd.f32 %v5532_v10, %v762_v13  ;;  %v5678_v53 = vadd.f32 %v5532_v10, %v763_v22  ;;  %v812_v63 = vmax.f32 %v770_v44, 0.0  ;;  %v813_v7 = vmax.f32 %v771_v52, 0.0 }
 0x1b9   :  { %v814_v17 = vmax.f32 %v772_v9, 0.0  ;;  %v815_v23 = vmax.f32 %v773_v19, 0.0  ;;  %v816_v35 = vmax.f32 %v774_v38, 0.0  ;;  %v817_v43 = vmax.f32 %v775_v48, 0.0 }
 0x1ba   :  { %v818_v56 = vmax.f32 %v776_v4, 0.0  ;;  %v819_v61 = vmax.f32 %v5581_v14, 0.0  ;;  %v820_v11 = vmax.f32 %v5584_v42, 0.0  ;;  %v821_v18 = vmax.f32 %v5587_v33, 0.0  ;;  %854 = vst.msk [vmem:[#allocation2] sm:$0xff] %vm42_vm3, %v812_v63  ;;  %855 = vst.msk [vmem:[#allocation2 + $0x8] sm:$0xff] %vm42_vm3, %v813_v7 }
 0x1bb   :  { %v822_v26 = vmax.f32 %v5590_v45, 0.0  ;;  %856 = vst.msk [vmem:[#allocation2 + $0x10] sm:$0xff] %vm42_vm3, %v814_v17  ;;  %v823_v10 = vmax.f32 %v5593_v46, 0.0  ;;  %v824_v32 = vmax.f32 %v5596_v51, 0.0  ;;  %v825_v40 = vmax.f32 %v5599_v57, 0.0  ;;  %857 = vst.msk [vmem:[#allocation2 + $0x18] sm:$0xff] %vm42_vm3, %v815_v23 }
 0x1bc   :  { %v826_v54 = vmax.f32 %v5602_v58, 0.0  ;;  %858 = vst.msk [vmem:[#allocation2 + $0x20] sm:$0xff] %vm42_vm3, %v816_v35  ;;  %859 = vst.msk [vmem:[#allocation2 + $0x28] sm:$0xff] %vm42_vm3, %v817_v43  ;;  %v827_v62 = vmax.f32 %v5605_v59, 0.0  ;;  %v828_v28 = vmax.f32 %v5608_v3, 0.0  ;;  %v829_v13 = vmax.f32 %v5611_v2, 0.0 }
 0x1bd   :  { %860 = vst.msk [vmem:[#allocation2 + $0x30] sm:$0xff] %vm42_vm3, %v818_v56  ;;  %v830_v29 = vmax.f32 %v5614_v49, 0.0  ;;  %861 = vst.msk [vmem:[#allocation2 + $0x38] sm:$0xff] %vm42_vm3, %v819_v61  ;;  %v831_v22 = vmax.f32 %v5617_v16, 0.0  ;;  %v832_v44 = vmax.f32 %v5620_v8, 0.0  ;;  %v833_v52 = vmax.f32 %v5623_v25, 0.0 }
 0x1be   :  { %862 = vst.msk [vmem:[#allocation2 + $0x40] sm:$0xff] %vm42_vm3, %v820_v11  ;;  %863 = vst.msk [vmem:[#allocation2 + $0x48] sm:$0xff] %vm42_vm3, %v821_v18  ;;  %v834_v9 = vmax.f32 %v5626_v24, 0.0  ;;  %v835_v19 = vmax.f32 %v5630_v27, 0.0  ;;  %v836_v38 = vmax.f32 %v5633_v36, 0.0  ;;  %v837_v48 = vmax.f32 %v5636_v41, 0.0 }
 0x1bf   :  { %864 = vst.msk [vmem:[#allocation2 + $0x50] sm:$0xff] %vm42_vm3, %v822_v26  ;;  %865 = vst.msk [vmem:[#allocation2 + $0x58] sm:$0xff] %vm42_vm3, %v823_v10  ;;  %v838_v4 = vmax.f32 %v5639_v50, 0.0  ;;  %v839_v14 = vmax.f32 %v5642_v12, 0.0  ;;  %v840_v42 = vmax.f32 %v5645_v55, 0.0  ;;  %v841_v33 = vmax.f32 %v5648_v1, 0.0 }
 0x1c0   :  { %866 = vst.msk [vmem:[#allocation2 + $0x60] sm:$0xff] %vm42_vm3, %v824_v32  ;;  %867 = vst.msk [vmem:[#allocation2 + $0x68] sm:$0xff] %vm42_vm3, %v825_v40  ;;  %v842_v45 = vmax.f32 %v5651_v6, 0.0  ;;  %v843_v46 = vmax.f32 %v5654_v15, 0.0  ;;  %v844_v0 = vmax.f32 %v5657_v20, 0.0  ;;  %v845_v34 = vmax.f32 %v5660_v30, 0.0 }
 0x1c1   :  { %868 = vst.msk [vmem:[#allocation2 + $0x70] sm:$0xff] %vm42_vm3, %v826_v54  ;;  %869 = vst.msk [vmem:[#allocation2 + $0x78] sm:$0xff] %vm42_vm3, %v827_v62  ;;  %v846_v51 = vmax.f32 %v5663_v31, 0.0  ;;  %v847_v57 = vmax.f32 %v5666_v37, 0.0  ;;  %v848_v58 = vmax.f32 %v5669_v5, 0.0  ;;  %v849_v59 = vmax.f32 %v5672_v21, 0.0 }
 0x1c2   :  { %870 = vst.msk [vmem:[#allocation2 + $0x80] sm:$0xff] %vm42_vm3, %v828_v28  ;;  %871 = vst.msk [vmem:[#allocation2 + $0x88] sm:$0xff] %vm42_vm3, %v829_v13  ;;  %v850_v60 = vmax.f32 %v5675_v47, 0.0  ;;  %v896_v3 = vld [vmem:[#allocation2] ss:$2 sm:$0xff]  ;;  %v851_v2 = vmax.f32 %v5678_v53, 0.0 }
 0x1c3   :  { %872 = vst.msk [vmem:[#allocation2 + $0x90] sm:$0xff] %vm42_vm3, %v830_v29  ;;  %873 = vst.msk [vmem:[#allocation2 + $0x98] sm:$0xff] %vm42_vm3, %v831_v22  ;;  %v898_v49 = vld [vmem:[#allocation2 + $0x10] ss:$2 sm:$0xff]  ;;  %v900_v16 = vld [vmem:[#allocation2 + $0x20] ss:$2 sm:$0xff] }
 0x1c4   :  { %874 = vst.msk [vmem:[#allocation2 + $0xa0] sm:$0xff] %vm42_vm3, %v832_v44  ;;  %875 = vst.msk [vmem:[#allocation2 + $0xa8] sm:$0xff] %vm42_vm3, %v833_v52  ;;  %v938_v8 = vld [vmem:[#allocation2 + $0x1] ss:$2 sm:$0xff]  ;;  %v902_v25 = vld [vmem:[#allocation2 + $0x30] ss:$2 sm:$0xff] }
 0x1c5   :  { %876 = vst.msk [vmem:[#allocation2 + $0xb0] sm:$0xff] %vm42_vm3, %v834_v9  ;;  %877 = vst.msk [vmem:[#allocation2 + $0xb8] sm:$0xff] %vm42_vm3, %v835_v19  ;;  %v940_v24 = vld [vmem:[#allocation2 + $0x11] ss:$2 sm:$0xff]  ;;  %v979_v27 = vmax.f32 %v896_v3, %v938_v8  ;;  %v904_v36 = vld [vmem:[#allocation2 + $0x40] ss:$2 sm:$0xff] }
 0x1c6   :  { %878 = vst.msk [vmem:[#allocation2 + $0xc0] sm:$0xff] %vm42_vm3, %v836_v38  ;;  %879 = vst.msk [vmem:[#allocation2 + $0xc8] sm:$0xff] %vm42_vm3, %v837_v48  ;;  %v906_v41 = vld [vmem:[#allocation2 + $0x50] ss:$2 sm:$0xff]  ;;  %v942_v50 = vld [vmem:[#allocation2 + $0x21] ss:$2 sm:$0xff]  ;;  %v980_v12 = vmax.f32 %v898_v49, %v940_v24 }
 0x1c7   :  { %880 = vst.msk [vmem:[#allocation2 + $0xd0] sm:$0xff] %vm42_vm3, %v838_v4  ;;  %881 = vst.msk [vmem:[#allocation2 + $0xd8] sm:$0xff] %vm42_vm3, %v839_v14  ;;  %v908_v55 = vld [vmem:[#allocation2 + $0x60] ss:$2 sm:$0xff]  ;;  %v944_v6 = vld [vmem:[#allocation2 + $0x31] ss:$2 sm:$0xff]  ;;  %v981_v15 = vmax.f32 %v900_v16, %v942_v50 }
 0x1c8   :  { %882 = vst.msk [vmem:[#allocation2 + $0xe0] sm:$0xff] %vm42_vm3, %v840_v42  ;;  %883 = vst.msk [vmem:[#allocation2 + $0xe8] sm:$0xff] %vm42_vm3, %v841_v33  ;;  %v910_v1 = vld [vmem:[#allocation2 + $0x70] ss:$2 sm:$0xff]  ;;  %v946_v31 = vld [vmem:[#allocation2 + $0x41] ss:$2 sm:$0xff]  ;;  %v982_v37 = vmax.f32 %v902_v25, %v944_v6 }
 0x1c9   :  { %884 = vst.msk [vmem:[#allocation2 + $0xf0] sm:$0xff] %vm42_vm3, %v842_v45  ;;  %885 = vst.msk [vmem:[#allocation2 + $0xf8] sm:$0xff] %vm42_vm3, %v843_v46  ;;  %v912_v20 = vld [vmem:[#allocation2 + $0x80] ss:$2 sm:$0xff]  ;;  %v948_v53 = vld [vmem:[#allocation2 + $0x51] ss:$2 sm:$0xff]  ;;  %v983_v63 = vmax.f32 %v904_v36, %v946_v31 }
 0x1ca   :  { %886 = vst.msk [vmem:[#allocation2 + $0x100] sm:$0xff] %vm42_vm3, %v844_v0  ;;  %887 = vst.msk [vmem:[#allocation2 + $0x108] sm:$0xff] %vm42_vm3, %v845_v34  ;;  %v914_v30 = vld [vmem:[#allocation2 + $0x90] ss:$2 sm:$0xff]  ;;  %v950_v35 = vld [vmem:[#allocation2 + $0x61] ss:$2 sm:$0xff]  ;;  %v984_v43 = vmax.f32 %v906_v41, %v948_v53 }
 0x1cb   :  { %888 = vst.msk [vmem:[#allocation2 + $0x110] sm:$0xff] %vm42_vm3, %v846_v51  ;;  %889 = vst.msk [vmem:[#allocation2 + $0x118] sm:$0xff] %vm42_vm3, %v847_v57  ;;  %v916_v5 = vld [vmem:[#allocation2 + $0xa0] ss:$2 sm:$0xff]  ;;  %v952_v18 = vld [vmem:[#allocation2 + $0x71] ss:$2 sm:$0xff]  ;;  %v985_v26 = vmax.f32 %v908_v55, %v950_v35 }
 0x1cc   :  { %890 = vst.msk [vmem:[#allocation2 + $0x120] sm:$0xff] %vm42_vm3, %v848_v58  ;;  %891 = vst.msk [vmem:[#allocation2 + $0x128] sm:$0xff] %vm42_vm3, %v849_v59  ;;  %v918_v21 = vld [vmem:[#allocation2 + $0xb0] ss:$2 sm:$0xff]  ;;  %v954_v32 = vld [vmem:[#allocation2 + $0x81] ss:$2 sm:$0xff]  ;;  %v986_v54 = vmax.f32 %v910_v1, %v952_v18 }
 0x1cd   :  { %892 = vst.msk [vmem:[#allocation2 + $0x130] sm:$0xff] %vm42_vm3, %v850_v60  ;;  %893 = vst.msk [vmem:[#allocation2 + $0x138] sm:$0xff] %vm42_vm3, %v851_v2  ;;  %v920_v47 = vld [vmem:[#allocation2 + $0xc0] ss:$2 sm:$0xff]  ;;  %v956_v40 = vld [vmem:[#allocation2 + $0x91] ss:$2 sm:$0xff]  ;;  %v987_v29 = vmax.f32 %v912_v20, %v954_v32 }
 0x1ce   :  { %1000 = vst.msk [vmem:[#allocation3] sm:$0xff] %vm42_vm3, %v979_v27  ;;  %1001 = vst.msk [vmem:[#allocation3 + $0x8] sm:$0xff] %vm42_vm3, %v980_v12  ;;  %v922_v7 = vld [vmem:[#allocation2 + $0xd0] ss:$2 sm:$0xff]  ;;  %v958_v62 = vld [vmem:[#allocation2 + $0xa1] ss:$2 sm:$0xff]  ;;  %v988_v22 = vmax.f32 %v914_v30, %v956_v40 }
 0x1cf   :  { %1002 = vst.msk [vmem:[#allocation3 + $0x10] sm:$0xff] %vm42_vm3, %v981_v15  ;;  %v924_v17 = vld [vmem:[#allocation2 + $0xe0] ss:$2 sm:$0xff]  ;;  %1003 = vst.msk [vmem:[#allocation3 + $0x18] sm:$0xff] %vm42_vm3, %v982_v37  ;;  %v960_v28 = vld [vmem:[#allocation2 + $0xb1] ss:$2 sm:$0xff]  ;;  %v989_v19 = vmax.f32 %v916_v5, %v958_v62 }
 0x1d0   :  { %v926_v23 = vld [vmem:[#allocation2 + $0xf0] ss:$2 sm:$0xff]  ;;  %1004 = vst.msk [vmem:[#allocation3 + $0x20] sm:$0xff] %vm42_vm3, %v983_v63  ;;  %1005 = vst.msk [vmem:[#allocation3 + $0x28] sm:$0xff] %vm42_vm3, %v984_v43  ;;  %v962_v13 = vld [vmem:[#allocation2 + $0xc1] ss:$2 sm:$0xff]  ;;  %v990_v38 = vmax.f32 %v918_v21, %v960_v28 }
 0x1d1   :  { %v928_v56 = vld [vmem:[#allocation2 + $0x100] ss:$2 sm:$0xff]  ;;  %1006 = vst.msk [vmem:[#allocation3 + $0x30] sm:$0xff] %vm42_vm3, %v985_v26  ;;  %v964_v44 = vld [vmem:[#allocation2 + $0xd1] ss:$2 sm:$0xff]  ;;  %v991_v48 = vmax.f32 %v920_v47, %v962_v13  ;;  %1007 = vst.msk [vmem:[#allocation3 + $0x38] sm:$0xff] %vm42_vm3, %v986_v54 }
 0x1d2   :  { %v930_v61 = vld [vmem:[#allocation2 + $0x110] ss:$2 sm:$0xff]  ;;  %v966_v52 = vld [vmem:[#allocation2 + $0xe1] ss:$2 sm:$0xff]  ;;  %v968_v9 = vld [vmem:[#allocation2 + $0xf1] ss:$2 sm:$0xff]  ;;  %v992_v45 = vmax.f32 %v922_v7, %v964_v44 }
 0x1d3   :  { %v932_v11 = vld [vmem:[#allocation2 + $0x120] ss:$2 sm:$0xff]  ;;  %v970_v14 = vld [vmem:[#allocation2 + $0x101] ss:$2 sm:$0xff]  ;;  %v972_v42 = vld [vmem:[#allocation2 + $0x111] ss:$2 sm:$0xff]  ;;  %v993_v46 = vmax.f32 %v924_v17, %v966_v52  ;;  %v994_v0 = vmax.f32 %v926_v23, %v968_v9 }
 0x1d4   :  { %v934_v10 = vld [vmem:[#allocation2 + $0x130] ss:$2 sm:$0xff]  ;;  %v4935_v4 = vld [vmem:[%s6733_s2] sm:$0xff]   ;;  %1008 = vst.msk [vmem:[#allocation3 + $0x40] sm:$0xff] %vm42_vm3, %v987_v29  ;;  %1009 = vst.msk [vmem:[#allocation3 + $0x48] sm:$0xff] %vm42_vm3, %v988_v22  ;;  %v995_v51 = vmax.f32 %v928_v56, %v970_v14  ;;  %v996_v57 = vmax.f32 %v930_v61, %v972_v42  ;;  %v6752_v49 = vmov 0.0  }
 0x1d5   :  { %v974_v33 = vld [vmem:[#allocation2 + $0x121] ss:$2 sm:$0xff]  ;;  %v976_v34 = vld [vmem:[#allocation2 + $0x131] ss:$2 sm:$0xff]  ;;  %1010 = vst.msk [vmem:[#allocation3 + $0x50] sm:$0xff] %vm42_vm3, %v989_v19  ;;  %1011 = vst.msk [vmem:[#allocation3 + $0x58] sm:$0xff] %vm42_vm3, %v990_v38 }
 0x1d6   :  { %v997_v58 = vmax.f32 %v932_v11, %v974_v33  ;;  %1012 = vst.msk [vmem:[#allocation3 + $0x60] sm:$0xff] %vm42_vm3, %v991_v48  ;;  %v1061_v59 = vld [vmem:[#allocation3 + $0x1] sm:$0xff]  ;;  %v1062_v60 = vld [vmem:[#allocation3 + $0x9] sm:$0xff]  ;;  %v998_v3 = vmax.f32 %v934_v10, %v976_v34  ;;  %1013 = vst.msk [vmem:[#allocation3 + $0x68] sm:$0xff] %vm42_vm3, %v992_v45  ;;  %v4977_v38 = vmov 0  }
 0x1d7   :  { %1014 = vst.msk [vmem:[#allocation3 + $0x70] sm:$0xff] %vm42_vm3, %v993_v46  ;;  %1015 = vst.msk [vmem:[#allocation3 + $0x78] sm:$0xff] %vm42_vm3, %v994_v0  ;;  %v1082_v2 = vpack.c.bf16 %v1062_v60, %v1061_v59  ;;  %v4936_v16 = vld [vmem:[%s6733_s2 + $0x8] sm:$0xff]   ;;  %v4937_v24 = vld [vmem:[%s6733_s2 + $0x10] sm:$0xff]   ;;  %4907 = vset.pattern.permute.xlu0 %v4977_v38  ;;  %4908 = vset.pattern.permute.xlu1 %v4977_v38 }
 0x1d8   :  { %1016 = vst.msk [vmem:[#allocation3 + $0x80] sm:$0xff] %vm42_vm3, %v995_v51  ;;  %1017 = vst.msk [vmem:[#allocation3 + $0x88] sm:$0xff] %vm42_vm3, %v996_v57  ;;  %v1063_v8 = vld [vmem:[#allocation3 + $0x11] sm:$0xff]  ;;  %v1064_v25 = vld [vmem:[#allocation3 + $0x19] sm:$0xff] }
 0x1d9   :  { %1018 = vst.msk [vmem:[#allocation3 + $0x90] sm:$0xff] %vm42_vm3, %v997_v58  ;;  %1019 = vst.msk [vmem:[#allocation3 + $0x98] sm:$0xff] %vm42_vm3, %v998_v3  ;;  %4314 = vmatmul.mubr.msk.bf16.vlgmr.msra.gmra.mrb[0].mxu1 %vm42_vm3, %v1082_v2  ;;  %v1083_v27 = vpack.c.bf16 %v1064_v25, %v1063_v8  ;;  %v4938_v36 = vld [vmem:[%s6733_s2 + $0x18] sm:$0xff]   ;;  %v1067_v55 = vld [vmem:[#allocation3 + $0x31] sm:$0xff] }
 0x1da   :  { %4317 = vmatprep.mubr.msk.bf16.mxu1 %vm4976_vm1, %v6752_v49  ;;  %4358 = vmatpush3.bf16.msra.mxu1 %v4935_v4  ;;  %v1065_v41 = vld [vmem:[#allocation3 + $0x21] sm:$0xff]  ;;  %v1066_v50 = vld [vmem:[#allocation3 + $0x29] sm:$0xff]  ;;  %v4940_v62 = vld [vmem:[%s6733_s2 + $0x48] sm:$0xff]   ;;  %54 = vst.msk [vmem:[#allocation5 + $0x50] sm:$0x3f] %vm53_vm4, %v6752_v49 }
 0x1db   :  { %4359 = vmatprep.subr.bf16.mxu1 %v6752_v49  ;;  %v1084_v12 = vpack.c.bf16 %v1066_v50, %v1065_v41  ;;  %v1068_v1 = vld [vmem:[#allocation3 + $0x39] sm:$0xff]  ;;  %v1069_v15 = vld [vmem:[#allocation3 + $0x41] sm:$0xff]  ;;  %v4939_v40 = vld [vmem:[%s6733_s2 + $0x40] sm:$0xff]   ;;  %65 = vst.msk [vmem:[#allocation6 + $0x50] sm:$0x3f] %vm53_vm4, %v6752_v49 }
 0x1dc   :  { %v1085_v6 = vpack.c.bf16 %v1068_v1, %v1067_v55  ;;  %v1070_v20 = vld [vmem:[#allocation3 + $0x49] sm:$0xff]  ;;  %v1071_v31 = vld [vmem:[#allocation3 + $0x51] sm:$0xff]  ;;  %v1081_v18 = vld [vmem:[#allocation3 + $0xa1] sm:$0x3f] }
 0x1dd   :  { %v1086_v30 = vpack.c.bf16 %v1070_v20, %v1069_v15  ;;  %v1072_v37 = vld [vmem:[#allocation3 + $0x59] sm:$0xff]  ;;  %v1073_v21 = vld [vmem:[#allocation3 + $0x61] sm:$0xff]  ;;  %v1092_v26 = vpack.c.bf16 %v1081_v18, %v1081_v18  ;;  %v1023_v28 = vld [vmem:[#allocation3 + $0x10] sm:$0xff] }
 0x1de   :  { %4360 = vmatpush3.bf16.msra.mxu1 %v4936_v16  ;;  %v1087_v5 = vpack.c.bf16 %v1072_v37, %v1071_v31  ;;  %v1074_v47 = vld [vmem:[#allocation3 + $0x69] sm:$0xff]  ;;  %v1075_v63 = vld [vmem:[#allocation3 + $0x71] sm:$0xff]  ;;  %v1021_v10 = vld [vmem:[#allocation3] sm:$0xff] }
 0x1df   :  { %4361 = vmatprep.subr.bf16.mxu1 %v6752_v49  ;;  %v1088_v53 = vpack.c.bf16 %v1074_v47, %v1073_v21  ;;  %v1076_v7 = vld [vmem:[#allocation3 + $0x79] sm:$0xff]  ;;  %v1077_v23 = vld [vmem:[#allocation3 + $0x81] sm:$0xff]  ;;  %v1695_v48 = vld [vmem:[%s6735_s9] sm:$0xff] }
 0x1e0   :  { %v1089_v17 = vpack.c.bf16 %v1076_v7, %v1075_v63  ;;  %v1078_v35 = vld [vmem:[#allocation3 + $0x89] sm:$0xff]  ;;  %v1079_v56 = vld [vmem:[#allocation3 + $0x91] sm:$0xff]  ;;  %v1080_v61 = vld [vmem:[#allocation3 + $0x99] sm:$0xff]  ;;  %1718 = vperm.xlu0 %4907, %v1695_v48  }
 0x1e1   :  { %4318 = vmatmul.mubr.msk.bf16.gmra.mrb[4].mxu1 %vm42_vm3, %v1083_v27  ;;  %v1090_v43 = vpack.c.bf16 %v1078_v35, %v1077_v23  ;;  %v1091_v11 = vpack.c.bf16 %v1080_v61, %v1079_v56  ;;  %v1022_v32 = vld [vmem:[#allocation3 + $0x8] sm:$0xff]  ;;  %v1024_v13 = vld [vmem:[#allocation3 + $0x18] sm:$0xff]  ;;  %v4941_v29 = vld [vmem:[%s6733_s2 + $0x50] sm:$0xff]  }
 0x1e2   :  { %4321 = vmatprep.mubr.msk.bf16.mxu1 %vm4976_vm1, %v6752_v49  ;;  %4362 = vmatpush3.bf16.msra.mxu1 %v4937_v24  ;;  %v1042_v54 = vpack.c.bf16 %v1022_v32, %v1021_v10  ;;  %v1043_v22 = vpack.c.bf16 %v1024_v13, %v1023_v28  ;;  %v4942_v44 = vld [vmem:[%s6733_s2 + $0x58] sm:$0xff]   ;;  %v1025_v52 = vld [vmem:[#allocation3 + $0x20] sm:$0xff]  ;;  %v1027_v4 = vld [vmem:[#allocation3 + $0x30] sm:$0xff] }
 0x1e3   :  { %4363 = vmatprep.subr.bf16.mxu1 %v6752_v49  ;;  %v1026_v9 = vld [vmem:[#allocation3 + $0x28] sm:$0xff]  ;;  %v1028_v14 = vld [vmem:[#allocation3 + $0x38] sm:$0xff]  ;;  %v1697_v33 = vld [vmem:[%s6735_s9 + $0x10] sm:$0xff] }
 0x1e4   :  { %v1044_v19 = vpack.c.bf16 %v1026_v9, %v1025_v52  ;;  %v1045_v42 = vpack.c.bf16 %v1028_v14, %v1027_v4  ;;  %v1696_v45 = vld [vmem:[%s6735_s9 + $0x8] sm:$0xff]  ;;  %1728 = vperm.xlu1 %4908, %v1697_v33   ;;  %v1698_v46 = vld [vmem:[%s6735_s9 + $0x18] sm:$0xff]  ;;  %v1029_v0 = vld [vmem:[#allocation3 + $0x40] sm:$0xff] }
 0x1e5   :  { %1723 = vperm.xlu0 %4907, %v1696_v45   ;;  %v1030_v34 = vld [vmem:[#allocation3 + $0x48] sm:$0xff]  ;;  %v1699_v51 = vld [vmem:[%s6735_s9 + $0x20] sm:$0xff]  ;;  %v1700_v58 = vld [vmem:[%s6735_s9 + $0x28] sm:$0xff] }
 0x1e6   :  { %4364 = vmatpush3.bf16.msra.mxu1 %v4938_v36  ;;  %v1046_v57 = vpack.c.bf16 %v1030_v34, %v1029_v0  ;;  %v1701_v59 = vld [vmem:[%s6735_s9 + $0x30] sm:$0xff]  ;;  %v1702_v60 = vld [vmem:[%s6735_s9 + $0x38] sm:$0xff]  ;;  %v1031_v3 = vld [vmem:[#allocation3 + $0x50] sm:$0xff] }
 0x1e7   :  { %4409 = vmatprep.subr.bf16.mxu1 %v6752_v49  ;;  %v1032_v2 = vld [vmem:[#allocation3 + $0x58] sm:$0xff]  ;;  %v1703_v16 = vld [vmem:[%s6735_s9 + $0x40] sm:$0xff]  ;;  %v1705_v24 = vld [vmem:[%s6735_s9 + $0x50] sm:$0xff] }
 0x1e8   :  { %1733 = vperm.xlu1 %4908, %v1698_v46   ;;  %v1047_v8 = vpack.c.bf16 %v1032_v2, %v1031_v3  ;;  %v1704_v25 = vld [vmem:[%s6735_s9 + $0x48] sm:$0xff]  ;;  %v1706_v27 = vld [vmem:[%s6735_s9 + $0x58] sm:$0xff]  ;;  %v1033_v36 = vld [vmem:[#allocation3 + $0x60] sm:$0xff] }
 0x1e9   :  { %4322 = vmatmul.mubr.msk.bf16.gmra.mrb[8].mxu1 %vm42_vm3, %v1084_v12  ;;  %1738 = vperm.xlu0 %4907, %v1699_v51   ;;  %v1034_v41 = vld [vmem:[#allocation3 + $0x68] sm:$0xff]  ;;  %v1707_v50 = vld [vmem:[%s6735_s9 + $0x60] sm:$0xff]  ;;  %v1708_v55 = vld [vmem:[%s6735_s9 + $0x68] sm:$0xff] }
 0x1ea   :  { %4325 = vmatprep.mubr.msk.bf16.mxu1 %vm4976_vm1, %v6752_v49  ;;  %v1048_v12 = vpack.c.bf16 %v1034_v41, %v1033_v36  ;;  %v1709_v1 = vld [vmem:[%s6735_s9 + $0x70] sm:$0xff]  ;;  %v1035_v15 = vld [vmem:[#allocation3 + $0x70] sm:$0xff]  ;;  %v1036_v20 = vld [vmem:[#allocation3 + $0x78] sm:$0xff] }
 0x1eb   :  { %v1049_v31 = vpack.c.bf16 %v1036_v20, %v1035_v15  ;;  %v1712_v37 = vld [vmem:[%s6735_s9 + $0x88] sm:$0xff]  ;;  %v1714_v21 = vld [vmem:[%s6735_s9 + $0x98] sm:$0xff]  ;;  %v1037_v47 = vld [vmem:[#allocation3 + $0x80] sm:$0xff] }
 0x1ec   :  { %1743 = vperm.xlu1 %4908, %v1700_v58   ;;  %v1715_v63 = vld [vmem:[%s6735_s9 + $0xa0] sm:$0x3f]  ;;  %v2133_v23 = vld [vmem:[%s6736_s10 + $0x8] sm:$0xff]  ;;  %v2134_v35 = vld [vmem:[%s6736_s10 + $0x10] sm:$0xff] }
 0x1ed   :  { %1748 = vperm.xlu0 %4907, %v1701_v59   ;;  %v1040_v56 = vld [vmem:[#allocation3 + $0x98] sm:$0xff]  ;;  %v2135_v61 = vld [vmem:[%s6736_s10 + $0x18] sm:$0xff]  ;;  %v2136_v18 = vld [vmem:[%s6736_s10 + $0x20] sm:$0xff] }
 0x1ee   :  { %v2138_v10 = vld [vmem:[%s6736_s10 + $0x30] sm:$0xff]  ;;  %v2141_v28 = vld [vmem:[%s6736_s10 + $0x48] sm:$0xff]  ;;  %v1461_v48 = vld [vmem:[#allocation3 + $0x2a] sm:$0xff] }
 0x1ef   :  { %v1041_v32 = vld [vmem:[#allocation3 + $0xa0] sm:$0x3f]  ;;  %v1458_v52 = vld [vmem:[#allocation3 + $0x12] sm:$0xff]  ;;  %v1465_v46 = vld [vmem:[#allocation3 + $0x4a] sm:$0xff] }
 0x1f0   :  { %1753 = vperm.xlu1 %4908, %v1702_v60   ;;  %v2142_v13 = vld [vmem:[%s6736_s10 + $0x50] sm:$0xf]  ;;  %v1462_v14 = vld [vmem:[#allocation3 + $0x32] sm:$0xff]  ;;  %v1469_v59 = vld [vmem:[#allocation3 + $0x6a] sm:$0xff] }
 0x1f1   :  { %4326 = vmatmul.mubr.msk.bf16.gmra.mrb[12].mxu1 %vm42_vm3, %v1085_v6  ;;  %1758 = vperm.xlu0 %4907, %v1703_v16   ;;  %v1710_v6 = vld [vmem:[%s6735_s9 + $0x78] sm:$0xff]  ;;  %v1459_v9 = vld [vmem:[#allocation3 + $0x1a] sm:$0xff]  ;;  %v1466_v34 = vld [vmem:[#allocation3 + $0x52] sm:$0xff] }
 0x1f2   :  { %4329 = vmatprep.mubr.msk.bf16.mxu1 %vm4976_vm1, %v6752_v49  ;;  %v1460_v38 = vld [vmem:[#allocation3 + $0x22] sm:$0xff]  ;;  %v1467_v51 = vld [vmem:[#allocation3 + $0x5a] sm:$0xff]  ;;  %v1470_v3 = vld [vmem:[#allocation3 + $0x72] sm:$0xff] }
 0x1f3   :  { %v1479_v4 = vpack.c.bf16 %v1461_v48, %v1460_v38  ;;  %v1464_v45 = vld [vmem:[#allocation3 + $0x42] sm:$0xff]  ;;  %v1471_v2 = vld [vmem:[#allocation3 + $0x7a] sm:$0xff] }
 0x1f4   :  { %1763 = vperm.xlu1 %4908, %v1704_v25   ;;  %v1481_v0 = vpack.c.bf16 %v1465_v46, %v1464_v45  ;;  %v1468_v58 = vld [vmem:[#allocation3 + $0x62] sm:$0xff]  ;;  %v1484_v16 = vpack.c.bf16 %v1471_v2, %v1470_v3  ;;  %v1473_v25 = vld [vmem:[#allocation3 + $0x8a] sm:$0xff]  ;;  %v1475_v36 = vld [vmem:[#allocation3 + $0x9a] sm:$0xff] }
 0x1f5   :  { %1768 = vperm.xlu0 %4907, %v1705_v24   ;;  %v1483_v60 = vpack.c.bf16 %v1469_v59, %v1468_v58 }
 0x1f8   :  { %1773 = vperm.xlu1 %4908, %v1706_v27   ;;  %v1474_v27 = vld [vmem:[#allocation3 + $0x92] sm:$0xff] }
 0x1f9   :  { %4330 = vmatmul.mubr.msk.bf16.gmra.mrb[16].mxu1 %vm42_vm3, %v1086_v30  ;;  %1778 = vperm.xlu0 %4907, %v1707_v50   ;;  %v1711_v30 = vld [vmem:[%s6735_s9 + $0x80] sm:$0xff]  ;;  %v1486_v41 = vpack.c.bf16 %v1475_v36, %v1474_v27  ;;  %v1476_v50 = vld [vmem:[#allocation3 + $0xa2] sm:$0x3f] }
 0x1fa   :  { %4333 = vmatprep.mubr.msk.bf16.mxu1 %vm4976_vm1, %v6752_v49 }
 0x1fc   :  { %1783 = vperm.xlu1 %4908, %v1708_v55   ;;  %v4943_v55 = vld [vmem:[%s6737_s3 + $0x20] sm:$0xff]  }
 0x1fd   :  { %1788 = vperm.xlu0 %4907, %v1709_v1   ;;  %4461 = vmatprep.subr.bf16.mxu0 %v4943_v55 }
 0x1fe   :  { %4462 = vmatpush3.bf16.msra.mxu0 %v4943_v55 }
 0x200   :  { %1793 = vperm.xlu1 %4908, %v1710_v6  }
 0x201   :  { %4334 = vmatmul.mubr.msk.bf16.gmra.mrb[20].mxu1 %vm42_vm3, %v1087_v5  ;;  %1798 = vperm.xlu0 %4907, %v1711_v30   ;;  %v1713_v5 = vld [vmem:[%s6735_s9 + $0x90] sm:$0xff] }
 0x202   :  { %4337 = vmatprep.mubr.msk.bf16.mxu1 %vm4976_vm1, %v6752_v49 }
 0x204   :  { %1803 = vperm.xlu1 %4908, %v1712_v37  }
 0x205   :  { %1808 = vperm.xlu0 %4907, %v1713_v5  }
 0x208   :  { %1813 = vperm.xlu1 %4908, %v1714_v21  }
 0x209   :  { %4338 = vmatmul.mubr.msk.bf16.gmra.mrb[24].mxu1 %vm42_vm3, %v1088_v53  ;;  %v1038_v53 = vld [vmem:[#allocation3 + $0x88] sm:$0xff]  ;;  %1818 = vperm.xlu0 %4907, %v1715_v63  }
 0x20a   :  { %4341 = vmatprep.mubr.msk.bf16.mxu1 %vm4976_vm1, %v6752_v49  ;;  %v1050_v7 = vpack.c.bf16 %v1038_v53, %v1037_v47 }
 0x20d   :  { %2604 = vperm.xlu0 %4907, %v2133_v23  }
 0x211   :  { %4342 = vmatmul.mubr.msk.bf16.gmra.mrb[28].mxu1 %vm42_vm3, %v1089_v17  ;;  %v2132_v17 = vld [vmem:[%s6736_s10] sm:$0xff]  ;;  %2614 = vperm.xlu0 %4907, %v2135_v61  }
 0x212   :  { %4345 = vmatprep.mubr.msk.bf16.mxu1 %vm4976_vm1, %v6752_v49  ;;  %2599 = vperm.xlu1 %4908, %v2132_v17  }
 0x216   :  { %2609 = vperm.xlu1 %4908, %v2134_v35  }
 0x219   :  { %4346 = vmatmul.mubr.msk.bf16.gmra.mrb[32].mxu1 %vm42_vm3, %v1090_v43  ;;  %v1039_v43 = vld [vmem:[#allocation3 + $0x90] sm:$0xff] }
 0x21a   :  { %4349 = vmatprep.mubr.msk.bf16.mxu1 %vm4976_vm1, %v6752_v49  ;;  %2619 = vperm.xlu1 %4908, %v2136_v18  }
 0x21e   :  { %2629 = vperm.xlu1 %4908, %v2138_v10  }
 0x221   :  { %4350 = vmatmul.mubr.msk.bf16.gmra.mrb[36].mxu1 %vm42_vm3, %v1091_v11  ;;  %v1051_v11 = vpack.c.bf16 %v1040_v56, %v1039_v43 }
 0x222   :  { %4353 = vmatprep.mubr.msk.bf16.mxu1 %vm4976_vm1, %v6752_v49 }
 0x229   :  { %4354 = vmatmul.mubr.msk.bf16.gmra.mrb[40].mxu1 %vm42_vm3, %v1092_v26  ;;  %v2137_v26 = vld [vmem:[%s6736_s10 + $0x28] sm:$0xff] }
 0x22a   :  { %4365 = vmatprep.mubr.msk.bf16.mxu1 %vm4976_vm1, %v6752_v49  ;;  %2624 = vperm.xlu0 %4907, %v2137_v26  }
 0x231   :  { %4366 = vmatmul.mubr.msk.bf16.vlgmr.msra.gmra.mrb[0].mxu1 %vm42_vm3, %v1042_v54  ;;  %v1052_v54 = vpack.c.bf16 %v1041_v32, %v1041_v32 }
 0x232   :  { %4369 = vmatprep.mubr.msk.bf16.mxu1 %vm4976_vm1, %v6752_v49  ;;  %4410 = vmatpush3.bf16.msra.mxu1 %v4939_v40  ;;  %v2139_v40 = vld [vmem:[%s6736_s10 + $0x38] sm:$0xff] }
 0x233   :  { %4411 = vmatprep.subr.bf16.mxu1 %v6752_v49  ;;  %2634 = vperm.xlu0 %4907, %v2139_v40  }
 0x236   :  { %4412 = vmatpush3.bf16.msra.mxu1 %v4940_v62  ;;  %v2140_v62 = vld [vmem:[%s6736_s10 + $0x40] sm:$0xff] }
 0x237   :  { %4413 = vmatprep.subr.bf16.mxu1 %v6752_v49  ;;  %2639 = vperm.xlu1 %4908, %v2140_v62  }
 0x238   :  { %2644 = vperm.xlu0 %4907, %v2141_v28  }
 0x239   :  { %4370 = vmatmul.mubr.msk.bf16.gmra.mrb[4].mxu1 %vm42_vm3, %v1043_v22  ;;  %v1457_v22 = vld [vmem:[#allocation3 + $0xa] sm:$0xff] }
 0x23a   :  { %4373 = vmatprep.mubr.msk.bf16.mxu1 %vm4976_vm1, %v6752_v49  ;;  %4414 = vmatpush3.bf16.msra.mxu1 %v4941_v29  ;;  %v1456_v29 = vld [vmem:[#allocation3 + $0x2] sm:$0xff] }
 0x23b   :  { %4415 = vmatprep.subr.bf16.mxu1 %v6752_v49  ;;  %2649 = vperm.xlu1 %4908, %v2142_v13  }
 0x23e   :  { %4416 = vmatpush3.bf16.msra.mxu1 %v4942_v44  ;;  %v1477_v44 = vpack.c.bf16 %v1457_v22, %v1456_v29 }
 0x241   :  { %4374 = vmatmul.mubr.msk.bf16.gmra.mrb[8].mxu1 %vm42_vm3, %v1044_v19  ;;  %v1478_v19 = vpack.c.bf16 %v1459_v9, %v1458_v52  ;;  %v4944_v9 = vld [vmem:[%s6737_s3 + $0x28] sm:$0xff]  }
 0x242   :  { %4377 = vmatprep.mubr.msk.bf16.mxu1 %vm4976_vm1, %v6752_v49  ;;  %4463 = vmatprep.subr.bf16.mxu0 %v4944_v9 }
 0x243   :  { %4464 = vmatpush3.bf16.msra.mxu0 %v4944_v9 }
 0x249   :  { %4378 = vmatmul.mubr.msk.bf16.gmra.mrb[12].mxu1 %vm42_vm3, %v1045_v42  ;;  %v1463_v42 = vld [vmem:[#allocation3 + $0x3a] sm:$0xff] }
 0x24a   :  { %4381 = vmatprep.mubr.msk.bf16.mxu1 %vm4976_vm1, %v6752_v49  ;;  %v1480_v33 = vpack.c.bf16 %v1463_v42, %v1462_v14 }
 0x251   :  { %4382 = vmatmul.mubr.msk.bf16.gmra.mrb[16].mxu1 %vm42_vm3, %v1046_v57  ;;  %v1482_v57 = vpack.c.bf16 %v1467_v51, %v1466_v34 }
 0x252   :  { %4385 = vmatprep.mubr.msk.bf16.mxu1 %vm4976_vm1, %v6752_v49 }
 0x259   :  { %4386 = vmatmul.mubr.msk.bf16.gmra.mrb[20].mxu1 %vm42_vm3, %v1047_v8  ;;  %v1472_v8 = vld [vmem:[#allocation3 + $0x82] sm:$0xff] }
 0x25a   :  { %4389 = vmatprep.mubr.msk.bf16.mxu1 %vm4976_vm1, %v6752_v49  ;;  %v1485_v24 = vpack.c.bf16 %v1473_v25, %v1472_v8 }
 0x25f   :  { %v1719_v1 = vpop.permute.xlu0 %1718 }
 0x261   :  { %4390 = vmatmul.mubr.msk.bf16.gmra.mrb[24].mxu1 %vm42_vm3, %v1048_v12  ;;  %v1487_v12 = vpack.c.bf16 %v1476_v50, %v1476_v50 }
 0x262   :  { %4393 = vmatprep.mubr.msk.bf16.mxu1 %vm4976_vm1, %v6752_v49 }
 0x263   :  { %v1729_v47 = vpop.permute.xlu1 %1728 }
 0x264   :  { %v1724_v30 = vpop.permute.xlu0 %1723 }
 0x267   :  { %v1734_v18 = vpop.permute.xlu1 %1733 }
 0x268   :  { %v1739_v38 = vpop.permute.xlu0 %1738 }
 0x269   :  { %4394 = vmatmul.mubr.msk.bf16.gmra.mrb[28].mxu1 %vm42_vm3, %v1049_v31 }
 0x26a   :  { %4397 = vmatprep.mubr.msk.bf16.mxu1 %vm4976_vm1, %v6752_v49 }
 0x26c   :  { %v1749_v25 = vpop.permute.xlu0 %1748 }
 0x271   :  { %4398 = vmatmul.mubr.msk.bf16.gmra.mrb[32].mxu1 %vm42_vm3, %v1050_v7 }
 0x272   :  { %4401 = vmatprep.mubr.msk.bf16.mxu1 %vm4976_vm1, %v6752_v49 }
 0x279   :  { %4402 = vmatmul.mubr.msk.bf16.gmra.mrb[36].mxu1 %vm42_vm3, %v1051_v11 }
 0x27a   :  { %4405 = vmatprep.mubr.msk.bf16.mxu1 %vm4976_vm1, %v6752_v49 }
 0x281   :  { %4406 = vmatmul.mubr.msk.bf16.gmra.mrb[40].mxu1 %vm42_vm3, %v1052_v54 }
 0x282   :  { %4417 = vmatprep.mubr.msk.bf16.mxu1 %vm4976_vm1, %v6752_v49 }
 0x289   :  { %4418 = vmatmul.mubr.msk.bf16.vlgmr.msra.gmra.mrb[0].mxu1 %vm42_vm3, %v1477_v44 }
 0x28a   :  { %4421 = vmatprep.mubr.msk.bf16.mxu1 %vm4976_vm1, %v6752_v49 }
 0x291   :  { %4422 = vmatmul.mubr.msk.bf16.gmra.mrb[4].mxu1 %vm42_vm3, %v1478_v19  ;;  %v4945_v19 = vld [vmem:[%s6737_s3 + $0x30] sm:$0xff]  }
 0x292   :  { %4425 = vmatprep.mubr.msk.bf16.mxu1 %vm4976_vm1, %v6752_v49  ;;  %4465 = vmatprep.subr.bf16.mxu0 %v4945_v19 }
 0x293   :  { %4466 = vmatpush3.bf16.msra.mxu0 %v4945_v19 }
 0x299   :  { %4426 = vmatmul.mubr.msk.bf16.gmra.mrb[8].mxu1 %vm42_vm3, %v1479_v4 }
 0x29a   :  { %4429 = vmatprep.mubr.msk.bf16.mxu1 %vm4976_vm1, %v6752_v49 }
 0x2a1   :  { %4430 = vmatmul.mubr.msk.bf16.gmra.mrb[12].mxu1 %vm42_vm3, %v1480_v33  ;;  %v1744_v33 = vpop.permute.xlu1 %1743 }
 0x2a2   :  { %4433 = vmatprep.mubr.msk.bf16.mxu1 %vm4976_vm1, %v6752_v49 }
 0x2a5   :  { %v1754_v50 = vpop.permute.xlu1 %1753 }
 0x2a9   :  { %4434 = vmatmul.mubr.msk.bf16.gmra.mrb[16].mxu1 %vm42_vm3, %v1481_v0 }
 0x2aa   :  { %4437 = vmatprep.mubr.msk.bf16.mxu1 %vm4976_vm1, %v6752_v49 }
 0x2b1   :  { %4438 = vmatmul.mubr.msk.bf16.gmra.mrb[20].mxu1 %vm42_vm3, %v1482_v57  ;;  %v4946_v57 = vld [vmem:[%s6737_s3 + $0x38] sm:$0xff]  }
 0x2b2   :  { %4441 = vmatprep.mubr.msk.bf16.mxu1 %vm4976_vm1, %v6752_v49  ;;  %4467 = vmatprep.subr.bf16.mxu0 %v4946_v57 }
 0x2b3   :  { %4468 = vmatpush3.bf16.msra.mxu0 %v4946_v57 }
 0x2b9   :  { %4442 = vmatmul.mubr.msk.bf16.gmra.mrb[24].mxu1 %vm42_vm3, %v1483_v60 }
 0x2ba   :  { %4445 = vmatprep.mubr.msk.bf16.mxu1 %vm4976_vm1, %v6752_v49 }
 0x2c1   :  { %4446 = vmatmul.mubr.msk.bf16.gmra.mrb[28].mxu1 %vm42_vm3, %v1484_v16 }
 0x2c2   :  { %4449 = vmatprep.mubr.msk.bf16.mxu1 %vm4976_vm1, %v6752_v49 }
 0x2c9   :  { %4450 = vmatmul.mubr.msk.bf16.gmra.mrb[32].mxu1 %vm42_vm3, %v1485_v24 }
 0x2ca   :  { %4453 = vmatprep.mubr.msk.bf16.mxu1 %vm4976_vm1, %v6752_v49 }
 0x2d1   :  { %4454 = vmatmul.mubr.msk.bf16.gmra.mrb[36].mxu1 %vm42_vm3, %v1486_v41 }
 0x2d2   :  { %4457 = vmatprep.mubr.msk.bf16.mxu1 %vm4976_vm1, %v6752_v49 }
 0x2d9   :  { %4458 = vmatmul.mubr.msk.bf16.gmra.mrb[40].mxu1 %vm42_vm3, %v1487_v12 }
 0x2da   :  { %4603 = vmatprep.mubr.msk.f32.mxu1 %vm4976_vm1, %v6752_v49 }
 0x35c   :  { %v6006_v6 = vpop.f32.mrb[0].mxu1 }
 0x35d   :  { %v1821_v15 = vmul.f32 %v1719_v1, %v6006_v6  ;;  %v4419_v20 = vpop.f32.mrb[1].mxu1 }
 0x35e   :  { %v6009_v31 = vpop.f32.mrb[2].mxu1 }
 0x35f   :  { %v1889_v37 = vmul.f32 %v1821_v15, %v1821_v15  ;;  %v1822_v5 = vmul.f32 %v1724_v30, %v6009_v31  ;;  %v4420_v21 = vpop.f32.mrb[3].mxu1  ;;  %v1842_v53 = vsel %vm42_vm3, %v1821_v15, 0.0 }
 0x361   :  { %v1843_v63 = vsel %vm42_vm3, %v1822_v5, 0.0  ;;  %v1890_v7 = vmul.f32 %v1822_v5, %v1822_v5  ;;  %v1910_v23 = vsel %vm42_vm3, %v1889_v37, 0.0 }
 0x362   :  { %v1844_v17 = vadd.f32 %v1843_v63, %v1842_v53 }
 0x363   :  { %v1911_v35 = vsel %vm42_vm3, %v1890_v7, 0.0  ;;  %v1759_v7 = vpop.permute.xlu0 %1758 }
 0x364   :  { %v1912_v43 = vadd.f32 %v1911_v35, %v1910_v23  ;;  %v6016_v56 = vpop.f32.mrb[4].mxu1 }
 0x365   :  { %v1823_v61 = vmul.f32 %v1729_v47, %v6016_v56  ;;  %v4423_v11 = vpop.f32.mrb[5].mxu1 }
 0x366   :  { %v6019_v26 = vpop.f32.mrb[6].mxu1 }
 0x367   :  { %v1845_v10 = vsel %vm42_vm3, %v1823_v61, 0.0  ;;  %v1891_v32 = vmul.f32 %v1823_v61, %v1823_v61  ;;  %v1824_v40 = vmul.f32 %v1734_v18, %v6019_v26  ;;  %v4424_v54 = vpop.f32.mrb[7].mxu1  ;;  %v1764_v61 = vpop.permute.xlu1 %1763 }
 0x368   :  { %v1846_v62 = vadd.f32 %v1845_v10, %v1844_v17  ;;  %v1769_v9 = vpop.permute.xlu0 %1768 }
 0x369   :  { %v1913_v28 = vsel %vm42_vm3, %v1891_v32, 0.0  ;;  %v1847_v13 = vsel %vm42_vm3, %v1824_v40, 0.0  ;;  %v1892_v29 = vmul.f32 %v1824_v40, %v1824_v40 }
 0x36a   :  { %v1914_v22 = vadd.f32 %v1913_v28, %v1912_v43  ;;  %v1848_v44 = vadd.f32 %v1847_v13, %v1846_v62  ;;  %v6065_v62 = vld [vmem:[%s6737_s3] sm:$0xff]  }
 0x36b   :  { %v1915_v52 = vsel %vm42_vm3, %v1892_v29, 0.0  ;;  %4481 = vmatprep.subr.bf16.mxu0 %v6065_v62 }
 0x36c   :  { %v1916_v48 = vadd.f32 %v1915_v52, %v1914_v22  ;;  %v6032_v4 = vpop.f32.mrb[8].mxu1 }
 0x36d   :  { %v1825_v14 = vmul.f32 %v1739_v38, %v6032_v4  ;;  %v4427_v42 = vpop.f32.mrb[9].mxu1 }
 0x36e   :  { %v6035_v45 = vpop.f32.mrb[10].mxu1  ;;  %v1774_v42 = vpop.permute.xlu1 %1773 }
 0x36f   :  { %v1849_v46 = vsel %vm42_vm3, %v1825_v14, 0.0  ;;  %v1893_v0 = vmul.f32 %v1825_v14, %v1825_v14  ;;  %v1826_v34 = vmul.f32 %v1744_v33, %v6035_v45  ;;  %v4428_v51 = vpop.f32.mrb[11].mxu1 }
 0x370   :  { %v1850_v58 = vadd.f32 %v1849_v46, %v1848_v44 }
 0x371   :  { %v1917_v59 = vsel %vm42_vm3, %v1893_v0, 0.0  ;;  %v1851_v60 = vsel %vm42_vm3, %v1826_v34, 0.0  ;;  %v1894_v3 = vmul.f32 %v1826_v34, %v1826_v34 }
 0x372   :  { %v1918_v2 = vadd.f32 %v1917_v59, %v1916_v48  ;;  %v1852_v16 = vadd.f32 %v1851_v60, %v1850_v58 }
 0x373   :  { %v1919_v8 = vsel %vm42_vm3, %v1894_v3, 0.0 }
 0x374   :  { %v1920_v24 = vadd.f32 %v1919_v8, %v1918_v2  ;;  %v6045_v27 = vpop.f32.mrb[12].mxu1  ;;  %v1779_v8 = vpop.permute.xlu0 %1778 }
 0x375   :  { %v1827_v36 = vmul.f32 %v1749_v25, %v6045_v27  ;;  %v4431_v41 = vpop.f32.mrb[13].mxu1 }
 0x376   :  { %v6048_v12 = vpop.f32.mrb[14].mxu1 }
 0x377   :  { %v1853_v55 = vsel %vm42_vm3, %v1827_v36, 0.0  ;;  %v1895_v1 = vmul.f32 %v1827_v36, %v1827_v36  ;;  %v1828_v15 = vmul.f32 %v1754_v50, %v6048_v12  ;;  %v4432_v20 = vpop.f32.mrb[15].mxu1  ;;  %v1784_v50 = vpop.permute.xlu1 %1783 }
 0x378   :  { %v1854_v30 = vadd.f32 %v1853_v55, %v1852_v16 }
 0x379   :  { %v1921_v37 = vsel %vm42_vm3, %v1895_v1, 0.0  ;;  %v1855_v5 = vsel %vm42_vm3, %v1828_v15, 0.0  ;;  %v1896_v21 = vmul.f32 %v1828_v15, %v1828_v15 }
 0x37a   :  { %v1922_v47 = vadd.f32 %v1921_v37, %v1920_v24  ;;  %v1856_v53 = vadd.f32 %v1855_v5, %v1854_v30 }
 0x37b   :  { %v1923_v63 = vsel %vm42_vm3, %v1896_v21, 0.0 }
 0x37c   :  { %v1924_v17 = vadd.f32 %v1923_v63, %v1922_v47  ;;  %v6055_v23 = vpop.f32.mrb[16].mxu1 }
 0x37d   :  { %v1829_v35 = vmul.f32 %v1759_v7, %v6055_v23  ;;  %v4435_v43 = vpop.f32.mrb[17].mxu1 }
 0x37e   :  { %v6058_v11 = vpop.f32.mrb[18].mxu1 }
 0x37f   :  { %v1857_v18 = vsel %vm42_vm3, %v1829_v35, 0.0  ;;  %v1897_v10 = vmul.f32 %v1829_v35, %v1829_v35  ;;  %v1830_v32 = vmul.f32 %v1764_v61, %v6058_v11  ;;  %v4436_v40 = vpop.f32.mrb[19].mxu1 }
 0x380   :  { %v1858_v54 = vadd.f32 %v1857_v18, %v1856_v53 }
 0x381   :  { %v1925_v28 = vsel %vm42_vm3, %v1897_v10, 0.0  ;;  %v1859_v13 = vsel %vm42_vm3, %v1830_v32, 0.0  ;;  %v1898_v29 = vmul.f32 %v1830_v32, %v1830_v32  ;;  %v1794_v10 = vpop.permute.xlu1 %1793 }
 0x382   :  { %v1926_v22 = vadd.f32 %v1925_v28, %v1924_v17  ;;  %v1860_v44 = vadd.f32 %v1859_v13, %v1858_v54  ;;  %v1789_v17 = vpop.permute.xlu0 %1788 }
 0x383   :  { %v1927_v52 = vsel %vm42_vm3, %v1898_v29, 0.0 }
 0x384   :  { %v1928_v19 = vadd.f32 %v1927_v52, %v1926_v22  ;;  %v6071_v38 = vpop.f32.mrb[20].mxu1 }
 0x385   :  { %v1831_v48 = vmul.f32 %v1769_v9, %v6071_v38  ;;  %v4439_v14 = vpop.f32.mrb[21].mxu1 }
 0x386   :  { %v6074_v33 = vpop.f32.mrb[22].mxu1  ;;  %v1799_v14 = vpop.permute.xlu0 %1798 }
 0x387   :  { %v1861_v46 = vsel %vm42_vm3, %v1831_v48, 0.0  ;;  %v1899_v0 = vmul.f32 %v1831_v48, %v1831_v48  ;;  %v1832_v34 = vmul.f32 %v1774_v42, %v6074_v33  ;;  %v4440_v51 = vpop.f32.mrb[23].mxu1 }
 0x388   :  { %v1862_v57 = vadd.f32 %v1861_v46, %v1860_v44  ;;  %v1804_v51 = vpop.permute.xlu1 %1803 }
 0x389   :  { %v1929_v58 = vsel %vm42_vm3, %v1899_v0, 0.0  ;;  %v1863_v59 = vsel %vm42_vm3, %v1832_v34, 0.0  ;;  %v1900_v60 = vmul.f32 %v1832_v34, %v1832_v34 }
 0x38a   :  { %v1930_v3 = vadd.f32 %v1929_v58, %v1928_v19  ;;  %v1864_v2 = vadd.f32 %v1863_v59, %v1862_v57 }
 0x38b   :  { %v1931_v16 = vsel %vm42_vm3, %v1900_v60, 0.0 }
 0x38c   :  { %v1932_v25 = vadd.f32 %v1931_v16, %v1930_v3  ;;  %v6081_v24 = vpop.f32.mrb[24].mxu1 }
 0x38d   :  { %v1833_v36 = vmul.f32 %v1779_v8, %v6081_v24  ;;  %v4443_v41 = vpop.f32.mrb[25].mxu1 }
 0x38e   :  { %v6084_v55 = vpop.f32.mrb[26].mxu1 }
 0x38f   :  { %v1865_v1 = vsel %vm42_vm3, %v1833_v36, 0.0  ;;  %v1901_v15 = vmul.f32 %v1833_v36, %v1833_v36  ;;  %v1834_v20 = vmul.f32 %v1784_v50, %v6084_v55  ;;  %v4444_v30 = vpop.f32.mrb[27].mxu1 }
 0x390   :  { %v1866_v37 = vadd.f32 %v1865_v1, %v1864_v2  ;;  %v1809_v1 = vpop.permute.xlu0 %1808 }
 0x391   :  { %v1933_v5 = vsel %vm42_vm3, %v1901_v15, 0.0  ;;  %v1867_v21 = vsel %vm42_vm3, %v1834_v20, 0.0  ;;  %v1902_v47 = vmul.f32 %v1834_v20, %v1834_v20 }
 0x392   :  { %v1934_v53 = vadd.f32 %v1933_v5, %v1932_v25  ;;  %v1868_v63 = vadd.f32 %v1867_v21, %v1866_v37  ;;  %v1814_v5 = vpop.permute.xlu1 %1813 }
 0x393   :  { %v1935_v7 = vsel %vm42_vm3, %v1902_v47, 0.0 }
 0x394   :  { %v1936_v35 = vadd.f32 %v1935_v7, %v1934_v53  ;;  %v6091_v43 = vpop.f32.mrb[28].mxu1 }
 0x395   :  { %v1835_v61 = vmul.f32 %v1789_v17, %v6091_v43  ;;  %v4447_v18 = vpop.f32.mrb[29].mxu1 }
 0x396   :  { %v6094_v32 = vpop.f32.mrb[30].mxu1 }
 0x397   :  { %v1869_v40 = vsel %vm42_vm3, %v1835_v61, 0.0  ;;  %v1903_v54 = vmul.f32 %v1835_v61, %v1835_v61  ;;  %v1836_v28 = vmul.f32 %v1794_v10, %v6094_v32  ;;  %v4448_v13 = vpop.f32.mrb[31].mxu1 }
 0x398   :  { %v1870_v29 = vadd.f32 %v1869_v40, %v1868_v63 }
 0x399   :  { %v1937_v22 = vsel %vm42_vm3, %v1903_v54, 0.0  ;;  %v1871_v44 = vsel %vm42_vm3, %v1836_v28, 0.0  ;;  %v1904_v52 = vmul.f32 %v1836_v28, %v1836_v28  ;;  %v1819_v28 = vpop.permute.xlu0 %1818 }
 0x39a   :  { %v1938_v9 = vadd.f32 %v1937_v22, %v1936_v35  ;;  %v1872_v19 = vadd.f32 %v1871_v44, %v1870_v29 }
 0x39b   :  { %v1939_v48 = vsel %vm42_vm3, %v1904_v52, 0.0 }
 0x39c   :  { %v1940_v42 = vadd.f32 %v1939_v48, %v1938_v9  ;;  %v6101_v46 = vpop.f32.mrb[32].mxu1 }
 0x39d   :  { %v1837_v0 = vmul.f32 %v1799_v14, %v6101_v46  ;;  %v4451_v34 = vpop.f32.mrb[33].mxu1 }
 0x39e   :  { %v6104_v57 = vpop.f32.mrb[34].mxu1 }
 0x39f   :  { %v1873_v58 = vsel %vm42_vm3, %v1837_v0, 0.0  ;;  %v1905_v59 = vmul.f32 %v1837_v0, %v1837_v0  ;;  %v1838_v60 = vmul.f32 %v1804_v51, %v6104_v57  ;;  %v4452_v3 = vpop.f32.mrb[35].mxu1 }
 0x3a0   :  { %v1874_v2 = vadd.f32 %v1873_v58, %v1872_v19 }
 0x3a1   :  { %v1941_v16 = vsel %vm42_vm3, %v1905_v59, 0.0  ;;  %v1875_v8 = vsel %vm42_vm3, %v1838_v60, 0.0  ;;  %v1906_v25 = vmul.f32 %v1838_v60, %v1838_v60 }
 0x3a2   :  { %v1942_v36 = vadd.f32 %v1941_v16, %v1940_v42  ;;  %v1876_v41 = vadd.f32 %v1875_v8, %v1874_v2 }
 0x3a3   :  { %v1943_v50 = vsel %vm42_vm3, %v1906_v25, 0.0 }
 0x3a4   :  { %v1944_v15 = vadd.f32 %v1943_v50, %v1942_v36  ;;  %v1660_v20 = vpop.f32.mrb[36].mxu1 }
 0x3a5   :  { %v1839_v30 = vmul.f32 %v1809_v1, %v1660_v20  ;;  %v4455_v37 = vpop.f32.mrb[37].mxu1 }
 0x3a6   :  { %v1663_v21 = vpop.f32.mrb[38].mxu1 }
 0x3a7   :  { %v1877_v47 = vsel %vm42_vm3, %v1839_v30, 0.0  ;;  %v1907_v53 = vmul.f32 %v1839_v30, %v1839_v30  ;;  %v1840_v63 = vmul.f32 %v1814_v5, %v1663_v21  ;;  %v4456_v7 = vpop.f32.mrb[39].mxu1  ;;  %v1961_v5 = vld [vmem:[%s6738_s6] sm:$0x1] }
 0x3a8   :  { %v1878_v17 = vadd.f32 %v1877_v47, %v1876_v41 }
 0x3a9   :  { %v1945_v35 = vsel %vm42_vm3, %v1907_v53, 0.0  ;;  %v1879_v61 = vsel %vm42_vm3, %v1840_v63, 0.0  ;;  %v1908_v18 = vmul.f32 %v1840_v63, %v1840_v63  ;;  %v1962_v63 = vld [vmem:[%s6738_s6 + $0x1] sm:$0x1] }
 0x3aa   :  { %v1946_v10 = vadd.f32 %v1945_v35, %v1944_v15  ;;  %v1880_v40 = vadd.f32 %v1879_v61, %v1878_v17 }
 0x3ab   :  { %v1947_v54 = vsel %vm42_vm3, %v1908_v18, 0.0 }
 0x3ac   :  { %v1948_v13 = vadd.f32 %v1947_v54, %v1946_v10  ;;  %v1668_v29 = vpop.f32.mrb[40].mxu1 }
 0x3ad   :  { %v1841_v22 = vmul.f32 %v1819_v28, %v1668_v29  ;;  %v4459_v44 = vpop.f32.mrb[41].mxu1 }
 0x3ae   :  { %v1671_v52 = vpop.f32.mrb[42].mxu1 }
 0x3af   :  { %v1881_v9 = vsel %vm53_vm4, %v1841_v22, 0.0  ;;  %v1909_v19 = vmul.f32 %v1841_v22, %v1841_v22  ;;  %v4460_v48 = vpop.f32.mrb[43].mxu1 }
 0x3b0   :  { %v1882_v14 = vadd.f32 %v1881_v9, %v1880_v40 }
 0x3b1   :  { %v1949_v42 = vsel %vm53_vm4, %v1909_v19, 0.0 }
 0x3b2   :  { %v1883_v0 = vrot.slane %v1882_v14, 4  ;;  %v1950_v34 = vadd.f32 %v1949_v42, %v1948_v13 }
 0x3b4   :  { %v1884_v51 = vadd.f32 %v1883_v0, %v1882_v14  ;;  %v1951_v58 = vrot.slane %v1950_v34, 4 }
 0x3b6   :  { %v1885_v59 = vrot.slane %v1884_v51, 2  ;;  %v1952_v60 = vadd.f32 %v1951_v58, %v1950_v34 }
 0x3b8   :  { %v1886_v3 = vadd.f32 %v1885_v59, %v1884_v51  ;;  %v1953_v2 = vrot.slane %v1952_v60, 2 }
 0x3ba   :  { %v1887_v16 = vrot.slane %v1886_v3, 1  ;;  %v1954_v8 = vadd.f32 %v1953_v2, %v1952_v60 }
 0x3bc   :  { %v1888_v25 = vadd.f32 %v1887_v16, %v1886_v3  ;;  %v1955_v36 = vrot.slane %v1954_v8, 1 }
 0x3be   :  { %v1956_v41 = vadd.f32 %v1955_v36, %v1954_v8  ;;  %v1957_v50 = vmul.f32 0.0060975607, %v1888_v25 }
 0x3c0   :  { %v1958_v1 = vmul.f32 0.0060975607, %v1956_v41  ;;  %v1959_v15 = vmul.f32 %v1957_v50, %v1957_v50 }
 0x3c2   :  { %v1960_v30 = vsub.f32 %v1958_v1, %v1959_v15 }
 0x3c4   :  { %v1963_v37 = vadd.f32 1e-05, %v1960_v30 }
 0x3c6   :  { %4969 = vrsqrt.f32 %v1963_v37 }
 0x3d0   :  { %v4970_v47 = vpop.eup %4969 }
 0x3d1   :  { %v1965_v53 = vmul.f32 %v4970_v47, %v1961_v5 }
 0x3d3   :  { %v1966_v7 = vmul.f32 %v1965_v53, %v1957_v50  ;;  %v6124_v17 = vrot.slane %v1965_v53, %v5520_v39 }
 0x3d5   :  { %v1967_v35 = vsub.f32 %v1962_v63, %v1966_v7  ;;  %v1982_v61 = vmul.f32 %v6124_v17, %v6071_v38  ;;  %v1986_v18 = vmul.f32 %v6124_v17, %v6091_v43  ;;  %v1987_v10 = vmul.f32 %v6124_v17, %v6094_v32 }
 0x3d6   :  { %v1988_v40 = vmul.f32 %v6124_v17, %v6101_v46  ;;  %v1989_v54 = vmul.f32 %v6124_v17, %v6104_v57  ;;  %v1990_v28 = vmul.f32 %v6124_v17, %v1660_v20  ;;  %v1991_v13 = vmul.f32 %v6124_v17, %v1663_v21 }
 0x3d7   :  { %v1992_v22 = vmul.f32 %v6124_v17, %v1668_v29  ;;  %v6140_v38 = vrot.slane %v1967_v35, %v5520_v39  ;;  %v1972_v43 = vmul.f32 %v6124_v17, %v6006_v6  ;;  %v1973_v32 = vmul.f32 %v6124_v17, %v6009_v31 }
 0x3d8   :  { %v1974_v46 = vmul.f32 %v6124_v17, %v6016_v56  ;;  %v1975_v57 = vmul.f32 %v6124_v17, %v6019_v26  ;;  %v1976_v20 = vmul.f32 %v6124_v17, %v6032_v4  ;;  %v1977_v21 = vmul.f32 %v6124_v17, %v6035_v45 }
 0x3d9   :  { %v2007_v29 = vadd.f32 %v6140_v38, %v1982_v61  ;;  %v2011_v44 = vadd.f32 %v6140_v38, %v1986_v18  ;;  %v2012_v6 = vadd.f32 %v6140_v38, %v1987_v10  ;;  %v2013_v31 = vadd.f32 %v6140_v38, %v1988_v40 }
 0x3da   :  { %v2014_v52 = vadd.f32 %v6140_v38, %v1989_v54  ;;  %v2015_v56 = vadd.f32 %v6140_v38, %v1990_v28  ;;  %v2016_v26 = vadd.f32 %v6140_v38, %v1991_v13  ;;  %v2017_v9 = vadd.f32 %v6140_v38, %v1992_v22 }
 0x3db   :  { %v2028_v4 = vmax.f32 %v2007_v29, 0.0  ;;  %v2032_v19 = vmax.f32 %v2011_v44, 0.0  ;;  %v2033_v48 = vmax.f32 %v2012_v6, 0.0  ;;  %v2034_v45 = vmax.f32 %v2013_v31, 0.0 }
 0x3dc   :  { %v2035_v14 = vmax.f32 %v2014_v52, 0.0  ;;  %v2036_v42 = vmax.f32 %v2015_v56, 0.0  ;;  %v2037_v0 = vmax.f32 %v2016_v26, 0.0  ;;  %v2038_v34 = vmax.f32 %v2017_v9, 0.0 }
 0x3dd   :  { %2049 = vst.msk [vmem:[#allocation4 + $0x50] sm:$0xff] %vm42_vm3, %v2028_v4  ;;  %2053 = vst.msk [vmem:[#allocation4 + $0x70] sm:$0xff] %vm42_vm3, %v2032_v19  ;;  %v1997_v51 = vadd.f32 %v6140_v38, %v1972_v43  ;;  %v1998_v58 = vadd.f32 %v6140_v38, %v1973_v32  ;;  %v1999_v59 = vadd.f32 %v6140_v38, %v1974_v46 }
 0x3de   :  { %2054 = vst.msk [vmem:[#allocation4 + $0x78] sm:$0xff] %vm42_vm3, %v2033_v48  ;;  %2055 = vst.msk [vmem:[#allocation4 + $0x80] sm:$0xff] %vm42_vm3, %v2034_v45  ;;  %v2000_v60 = vadd.f32 %v6140_v38, %v1975_v57  ;;  %v2001_v3 = vadd.f32 %v6140_v38, %v1976_v20  ;;  %v2002_v2 = vadd.f32 %v6140_v38, %v1977_v21 }
 0x3df   :  { %2056 = vst.msk [vmem:[#allocation4 + $0x88] sm:$0xff] %vm42_vm3, %v2035_v14  ;;  %2057 = vst.msk [vmem:[#allocation4 + $0x90] sm:$0xff] %vm42_vm3, %v2036_v42  ;;  %v1978_v16 = vmul.f32 %v6124_v17, %v6045_v27  ;;  %v1979_v8 = vmul.f32 %v6124_v17, %v6048_v12  ;;  %v2018_v25 = vmax.f32 %v1997_v51, 0.0  ;;  %v2019_v36 = vmax.f32 %v1998_v58, 0.0 }
 0x3e0   :  { %2058 = vst.msk [vmem:[#allocation4 + $0x98] sm:$0xff] %vm42_vm3, %v2037_v0  ;;  %v2020_v41 = vmax.f32 %v1999_v59, 0.0  ;;  %v2021_v50 = vmax.f32 %v2000_v60, 0.0  ;;  %v2022_v1 = vmax.f32 %v2001_v3, 0.0  ;;  %v2023_v15 = vmax.f32 %v2002_v2, 0.0 }
 0x3e1   :  { %2059 = vst.msk [vmem:[#allocation4 + $0xa0] sm:$0x3f] %vm53_vm4, %v2038_v34  ;;  %v2003_v30 = vadd.f32 %v6140_v38, %v1978_v16  ;;  %v2004_v37 = vadd.f32 %v6140_v38, %v1979_v8  ;;  %v1980_v27 = vmul.f32 %v6124_v17, %v6055_v23  ;;  %v1981_v12 = vmul.f32 %v6124_v17, %v6058_v11 }
 0x3e2   :  { %2039 = vst.msk [vmem:[#allocation4] sm:$0xff] %vm42_vm3, %v2018_v25  ;;  %2040 = vst.msk [vmem:[#allocation4 + $0x8] sm:$0xff] %vm42_vm3, %v2019_v36  ;;  %v1983_v5 = vmul.f32 %v6124_v17, %v6074_v33  ;;  %v1984_v47 = vmul.f32 %v6124_v17, %v6081_v24  ;;  %v1985_v7 = vmul.f32 %v6124_v17, %v6084_v55 }
 0x3e3   :  { %2041 = vst.msk [vmem:[#allocation4 + $0x10] sm:$0xff] %vm42_vm3, %v2020_v41  ;;  %2042 = vst.msk [vmem:[#allocation4 + $0x18] sm:$0xff] %vm42_vm3, %v2021_v50  ;;  %v2024_v53 = vmax.f32 %v2003_v30, 0.0  ;;  %v2025_v63 = vmax.f32 %v2004_v37, 0.0  ;;  %v2005_v23 = vadd.f32 %v6140_v38, %v1980_v27  ;;  %v2006_v11 = vadd.f32 %v6140_v38, %v1981_v12  ;;  %v4948_v30 = vld [vmem:[%s6737_s3 + $0x8] sm:$0xff]   ;;  %v4949_v27 = vld [vmem:[%s6737_s3 + $0x10] sm:$0xff]  }
 0x3e4   :  { %2043 = vst.msk [vmem:[#allocation4 + $0x20] sm:$0xff] %vm42_vm3, %v2022_v1  ;;  %2044 = vst.msk [vmem:[#allocation4 + $0x28] sm:$0xff] %vm42_vm3, %v2023_v15  ;;  %v2008_v35 = vadd.f32 %v6140_v38, %v1983_v5  ;;  %v2009_v33 = vadd.f32 %v6140_v38, %v1984_v47  ;;  %v2070_v61 = vld [vmem:[#allocation4 + $0x50] ss:$2 sm:$0x1]  ;;  %v2010_v18 = vadd.f32 %v6140_v38, %v1985_v7 }
 0x3e5   :  { %v2082_v24 = vld [vmem:[#allocation4 + $0x51] ss:$2 sm:$0x1]  ;;  %2045 = vst.msk [vmem:[#allocation4 + $0x30] sm:$0xff] %vm42_vm3, %v2024_v53  ;;  %2046 = vst.msk [vmem:[#allocation4 + $0x38] sm:$0xff] %vm42_vm3, %v2025_v63  ;;  %v2026_v13 = vmax.f32 %v2005_v23, 0.0 }
 0x3e6   :  { %v2088_v10 = vmax.f32 %v2070_v61, %v2082_v24  ;;  %v2101_v40 = vld [vmem:[#allocation4 + $0x74] ss:$2 sm:$0xff]  ;;  %v2103_v54 = vld [vmem:[#allocation4 + $0x84] ss:$2 sm:$0xff]  ;;  %v2113_v28 = vld [vmem:[#allocation4 + $0x75] ss:$2 sm:$0xff] }
 0x3e7   :  { %v2115_v22 = vld [vmem:[#allocation4 + $0x85] ss:$2 sm:$0xff]  ;;  %v2122_v32 = vmax.f32 %v2101_v40, %v2113_v28  ;;  %v2027_v46 = vmax.f32 %v2006_v11, 0.0  ;;  %v2029_v57 = vmax.f32 %v2008_v35, 0.0  ;;  %v2030_v6 = vmax.f32 %v2009_v33, 0.0  ;;  %2047 = vst.msk [vmem:[#allocation4 + $0x40] sm:$0xff] %vm42_vm3, %v2026_v13 }
 0x3e8   :  { %v2105_v55 = vld [vmem:[#allocation4 + $0x94] ss:$2 sm:$0xff]  ;;  %v2107_v17 = vld [vmem:[#allocation4 + $0xa4] ss:$2 sm:$0x1]  ;;  %v2123_v21 = vmax.f32 %v2103_v54, %v2115_v22  ;;  %v2031_v19 = vmax.f32 %v2010_v18, 0.0 }
 0x3e9   :  { %2095 = vst.msk [vmem:[#allocation5 + $0x29] sm:$0x1] %vm2094_vm5, %v2088_v10  ;;  %v2117_v43 = vld [vmem:[#allocation4 + $0x95] ss:$2 sm:$0xff]  ;;  %v2060_v44 = vld [vmem:[#allocation4] ss:$2 sm:$0xff] }
 0x3ea   :  { %v2119_v20 = vld [vmem:[#allocation4 + $0xa5] ss:$2 sm:$0x1]  ;;  %v2124_v29 = vmax.f32 %v2105_v55, %v2117_v43  ;;  %2128 = vst.msk [vmem:[#allocation5 + $0x3c] sm:$0xff] %vm42_vm3, %v2122_v32  ;;  %v2062_v31 = vld [vmem:[#allocation4 + $0x10] ss:$2 sm:$0xff] }
 0x3eb   :  { %v2125_v38 = vmax.f32 %v2107_v17, %v2119_v20  ;;  %v2064_v52 = vld [vmem:[#allocation4 + $0x20] ss:$2 sm:$0xff]  ;;  %v2072_v56 = vld [vmem:[#allocation4 + $0x1] ss:$2 sm:$0xff]  ;;  %2048 = vst.msk [vmem:[#allocation4 + $0x48] sm:$0xff] %vm42_vm3, %v2027_v46  ;;  %2050 = vst.msk [vmem:[#allocation4 + $0x58] sm:$0xff] %vm42_vm3, %v2029_v57 }
 0x3ec   :  { %2129 = vst.msk [vmem:[#allocation5 + $0x44] sm:$0xff] %vm42_vm3, %v2123_v21  ;;  %2130 = vst.msk [vmem:[#allocation5 + $0x4c] sm:$0xff] %vm42_vm3, %v2124_v29  ;;  %v2074_v26 = vld [vmem:[#allocation4 + $0x11] ss:$2 sm:$0xff]  ;;  %v2076_v9 = vld [vmem:[#allocation4 + $0x21] ss:$2 sm:$0xff]  ;;  %v2083_v4 = vmax.f32 %v2060_v44, %v2072_v56 }
 0x3ed   :  { %2051 = vst.msk [vmem:[#allocation4 + $0x60] sm:$0xff] %vm42_vm3, %v2030_v6  ;;  %v2084_v48 = vmax.f32 %v2062_v31, %v2074_v26  ;;  %v2085_v45 = vmax.f32 %v2064_v52, %v2076_v9  ;;  %v2066_v14 = vld [vmem:[#allocation4 + $0x30] ss:$2 sm:$0xff]  ;;  %v2078_v42 = vld [vmem:[#allocation4 + $0x31] ss:$2 sm:$0xff]  ;;  %2052 = vst.msk [vmem:[#allocation4 + $0x68] sm:$0xff] %vm42_vm3, %v2031_v19 }
 0x3ee   :  { %2131 = vst.msk [vmem:[#allocation5 + $0x54] sm:$0x1] %vm2094_vm5, %v2125_v38  ;;  %v2086_v0 = vmax.f32 %v2066_v14, %v2078_v42  ;;  %v4951_v35 = vld [vmem:[%s6737_s3 + $0x40] sm:$0xff]   ;;  %v4952_v13 = vld [vmem:[%s6737_s3 + $0x48] sm:$0xff]   ;;  %v4953_v43 = vld [vmem:[%s6737_s3 + $0x50] sm:$0xff]  }
 0x3ef   :  { %2089 = vst.msk [vmem:[#allocation5 + $0x1] sm:$0xff] %vm42_vm3, %v2083_v4  ;;  %2090 = vst.msk [vmem:[#allocation5 + $0x9] sm:$0xff] %vm42_vm3, %v2084_v48  ;;  %v4954_v29 = vld [vmem:[%s6737_s3 + $0x58] sm:$0xff]  }
 0x3f0   :  { %2091 = vst.msk [vmem:[#allocation5 + $0x11] sm:$0xff] %vm42_vm3, %v2085_v45  ;;  %2092 = vst.msk [vmem:[#allocation5 + $0x19] sm:$0xff] %vm42_vm3, %v2086_v0 }
 0x3f2   :  { %v2068_v34 = vld [vmem:[#allocation4 + $0x40] ss:$2 sm:$0xff]  ;;  %v2080_v51 = vld [vmem:[#allocation4 + $0x41] ss:$2 sm:$0xff] }
 0x3f3   :  { %v2087_v58 = vmax.f32 %v2068_v34, %v2080_v51  ;;  %v2176_v47 = vld [vmem:[#allocation5 + $0x41] sm:$0xff]  ;;  %v2177_v53 = vld [vmem:[#allocation5 + $0x49] sm:$0xff] }
 0x3f4   :  { %v2097_v59 = vld [vmem:[#allocation4 + $0x54] ss:$2 sm:$0xff]  ;;  %v2109_v60 = vld [vmem:[#allocation4 + $0x55] ss:$2 sm:$0xff]  ;;  %v2099_v16 = vld [vmem:[#allocation4 + $0x64] ss:$2 sm:$0xff]  ;;  %v2183_v11 = vpack.c.bf16 %v2177_v53, %v2176_v47 }
 0x3f5   :  { %v2120_v3 = vmax.f32 %v2097_v59, %v2109_v60  ;;  %2093 = vst.msk [vmem:[#allocation5 + $0x21] sm:$0xff] %vm42_vm3, %v2087_v58  ;;  %v2111_v8 = vld [vmem:[#allocation4 + $0x65] ss:$2 sm:$0xff]  ;;  %v2178_v33 = vld [vmem:[#allocation5 + $0x51] sm:$0xf] }
 0x3f6   :  { %v2168_v2 = vld [vmem:[#allocation5 + $0x1] sm:$0xff]  ;;  %v2169_v25 = vld [vmem:[#allocation5 + $0x9] sm:$0xff]  ;;  %v2121_v41 = vmax.f32 %v2099_v16, %v2111_v8  ;;  %v2184_v18 = vpack.c.bf16 %v2178_v33, %v2178_v33  ;;  %v2448_v59 = vld [vmem:[#allocation5 + $0x52] sm:$0xf] }
 0x3f7   :  { %v2170_v36 = vld [vmem:[#allocation5 + $0x11] sm:$0xff]  ;;  %2126 = vst.msk [vmem:[#allocation5 + $0x2c] sm:$0xff] %vm42_vm3, %v2120_v3  ;;  %v2179_v50 = vpack.c.bf16 %v2169_v25, %v2168_v2  ;;  %v2171_v1 = vld [vmem:[#allocation5 + $0x19] sm:$0xff]  ;;  %v2144_v24 = vld [vmem:[#allocation5 + $0x8] sm:$0xff]  ;;  %v2454_v60 = vpack.c.bf16 %v2448_v59, %v2448_v59 }
 0x3f8   :  { %v2180_v15 = vpack.c.bf16 %v2171_v1, %v2170_v36  ;;  %2127 = vst.msk [vmem:[#allocation5 + $0x34] sm:$0xff] %vm42_vm3, %v2121_v41  ;;  %v2143_v61 = vld [vmem:[#allocation5] sm:$0xff]  ;;  %v2145_v40 = vld [vmem:[#allocation5 + $0x10] sm:$0xff]  ;;  %v2146_v54 = vld [vmem:[#allocation5 + $0x18] sm:$0xff]  ;;  %v6280_v36 = vpop.permute.xlu1 %2599  ;;  %v6282_v41 = vpop.permute.xlu0 %2604 }
 0x3f9   :  { %4469 = vmatprep.mubr.msk.bf16.mxu0 %vm42_vm3, %v2179_v50  ;;  %v2154_v10 = vpack.c.bf16 %v2144_v24, %v2143_v61  ;;  %v2155_v28 = vpack.c.bf16 %v2146_v54, %v2145_v40  ;;  %v2151_v57 = vld [vmem:[#allocation5 + $0x40] sm:$0xff]  ;;  %v2152_v20 = vld [vmem:[#allocation5 + $0x48] sm:$0xff]  ;;  %v2153_v6 = vld [vmem:[#allocation5 + $0x50] sm:$0xf] }
 0x3fa   :  { %4470 = vmatmul.mubr.msk.bf16.vlgmr.msra.gmra.mrb[84].mxu0 %vm42_vm3, %v2180_v15  ;;  %v2158_v44 = vpack.c.bf16 %v2152_v20, %v2151_v57  ;;  %v2438_v38 = vld [vmem:[#allocation5 + $0x2] sm:$0xff]  ;;  %v2439_v31 = vld [vmem:[#allocation5 + $0xa] sm:$0xff]  ;;  %v2159_v52 = vpack.c.bf16 %v2153_v6, %v2153_v6  ;;  %v2440_v26 = vld [vmem:[#allocation5 + $0x12] sm:$0xff] }
 0x3fb   :  { %4482 = vmatpush3.bf16.msra.mxu0 %v6065_v62  ;;  %v4950_v62 = vld [vmem:[%s6737_s3 + $0x18] sm:$0xff]   ;;  %v2449_v56 = vpack.c.bf16 %v2439_v31, %v2438_v38  ;;  %v2446_v0 = vld [vmem:[#allocation5 + $0x42] sm:$0xff]  ;;  %v2447_v34 = vld [vmem:[#allocation5 + $0x4a] sm:$0xff] }
 0x3fc   :  { %v2172_v37 = vld [vmem:[#allocation5 + $0x21] sm:$0xff]  ;;  %4483 = vmatprep.subr.bf16.mxu0 %v4948_v30  ;;  %v2453_v58 = vpack.c.bf16 %v2447_v34, %v2446_v0  ;;  %v4957_v16 = vld [vmem:[%s6739_s4 + $0x30] sm:$0xff]   ;;  %v4958_v8 = vld [vmem:[%s6739_s4 + $0x38] sm:$0xff]   ;;  %v6284_v50 = vpop.permute.xlu1 %2609  ;;  %v6286_v1 = vpop.permute.xlu0 %2614 }
 0x3fd   :  { %v2147_v55 = vld [vmem:[#allocation5 + $0x20] sm:$0xff]  ;;  %v4956_v2 = vld [vmem:[%s6739_s4 + $0x28] sm:$0xff]  }
 0x3fe   :  { %v2173_v12 = vld [vmem:[#allocation5 + $0x29] sm:$0xff]  ;;  %v2441_v9 = vld [vmem:[#allocation5 + $0x1a] sm:$0xff] }
 0x3ff   :  { %v2181_v5 = vpack.c.bf16 %v2173_v12, %v2172_v37  ;;  %v2174_v63 = vld [vmem:[#allocation5 + $0x31] sm:$0xff]  ;;  %v2175_v7 = vld [vmem:[#allocation5 + $0x39] sm:$0xff]  ;;  %4484 = vmatpush3.bf16.msra.mxu0 %v4948_v30  ;;  %v2148_v17 = vld [vmem:[#allocation5 + $0x28] sm:$0xff]  ;;  %v2450_v48 = vpack.c.bf16 %v2441_v9, %v2440_v26 }
 0x400   :  { %v2182_v23 = vpack.c.bf16 %v2175_v7, %v2174_v63  ;;  %4485 = vmatprep.subr.bf16.mxu0 %v4949_v27  ;;  %v2156_v22 = vpack.c.bf16 %v2148_v17, %v2147_v55  ;;  %v2149_v32 = vld [vmem:[#allocation5 + $0x30] sm:$0xff]  ;;  %v2150_v46 = vld [vmem:[#allocation5 + $0x38] sm:$0xff]  ;;  %v2442_v4 = vld [vmem:[#allocation5 + $0x22] sm:$0xff]  ;;  %v6288_v15 = vpop.permute.xlu1 %2619 }
 0x401   :  { %4473 = vmatprep.mubr.msk.bf16.mxu0 %vm42_vm3, %v2181_v5  ;;  %v2157_v21 = vpack.c.bf16 %v2150_v46, %v2149_v32  ;;  %v2443_v19 = vld [vmem:[#allocation5 + $0x2a] sm:$0xff]  ;;  %v2444_v14 = vld [vmem:[#allocation5 + $0x32] sm:$0xff]  ;;  %v2445_v42 = vld [vmem:[#allocation5 + $0x3a] sm:$0xff] }
 0x402   :  { %4474 = vmatmul.mubr.msk.bf16.gmra.mrb[88].mxu0 %vm42_vm3, %v2182_v23  ;;  %v2451_v45 = vpack.c.bf16 %v2443_v19, %v2442_v4  ;;  %v2452_v51 = vpack.c.bf16 %v2445_v42, %v2444_v14  ;;  %v4955_v3 = vld [vmem:[%s6739_s4 + $0x20] sm:$0xff]   ;;  %v6306_v23 = vpop.permute.xlu0 %2624 }
 0x403   :  { %4477 = vmatprep.mubr.msk.bf16.mxu0 %vm42_vm3, %v2183_v11  ;;  %4486 = vmatpush3.bf16.msra.mxu0 %v4949_v27  ;;  %v6277_v25 = vld [vmem:[%s6739_s4] sm:$0xff]  }
 0x404   :  { %4487 = vmatprep.subr.bf16.mxu0 %v4950_v62 }
 0x407   :  { %4488 = vmatpush3.bf16.msra.mxu0 %v4950_v62  ;;  %v6308_v62 = vpop.permute.xlu1 %2629 }
 0x408   :  { %4501 = vmatprep.subr.bf16.mxu0 %v4951_v35 }
 0x40a   :  { %4478 = vmatmul.mubr.msk.bf16.gmra.mrb[92].mxu0 %vm42_vm3, %v2184_v18 }
 0x40b   :  { %4489 = vmatprep.mubr.msk.bf16.mxu0 %vm42_vm3, %v2154_v10  ;;  %v6331_v6 = vpop.permute.xlu1 %2639 }
 0x412   :  { %4490 = vmatmul.mubr.msk.bf16.vlgmr.msra.gmra.mrb[84].mxu0 %vm42_vm3, %v2155_v28 }
 0x413   :  { %4493 = vmatprep.mubr.msk.bf16.mxu0 %vm42_vm3, %v2156_v22  ;;  %4502 = vmatpush3.bf16.msra.mxu0 %v4951_v35 }
 0x414   :  { %4503 = vmatprep.subr.bf16.mxu0 %v4952_v13 }
 0x417   :  { %4504 = vmatpush3.bf16.msra.mxu0 %v4952_v13 }
 0x418   :  { %4505 = vmatprep.subr.bf16.mxu0 %v4953_v43 }
 0x41a   :  { %4494 = vmatmul.mubr.msk.bf16.gmra.mrb[88].mxu0 %vm42_vm3, %v2157_v21 }
 0x41b   :  { %4497 = vmatprep.mubr.msk.bf16.mxu0 %vm42_vm3, %v2158_v44  ;;  %4506 = vmatpush3.bf16.msra.mxu0 %v4953_v43  ;;  %v6329_v44 = vpop.permute.xlu0 %2634 }
 0x41c   :  { %4507 = vmatprep.subr.bf16.mxu0 %v4954_v29 }
 0x41f   :  { %4508 = vmatpush3.bf16.msra.mxu0 %v4954_v29 }
 0x420   :  { %4521 = vmatprep.subr.bf16.mxu0 %v4955_v3 }
 0x422   :  { %4498 = vmatmul.mubr.msk.bf16.gmra.mrb[92].mxu0 %vm42_vm3, %v2159_v52 }
 0x423   :  { %4509 = vmatprep.mubr.msk.bf16.mxu0 %vm42_vm3, %v2449_v56 }
 0x42a   :  { %4510 = vmatmul.mubr.msk.bf16.vlgmr.msra.gmra.mrb[84].mxu0 %vm42_vm3, %v2450_v48 }
 0x42b   :  { %4513 = vmatprep.mubr.msk.bf16.mxu0 %vm42_vm3, %v2451_v45  ;;  %4522 = vmatpush3.bf16.msra.mxu0 %v4955_v3 }
 0x42c   :  { %4523 = vmatprep.subr.bf16.mxu0 %v4956_v2 }
 0x42f   :  { %4524 = vmatpush3.bf16.msra.mxu0 %v4956_v2  ;;  %v6345_v2 = vpop.permute.xlu1 %2649 }
 0x430   :  { %4525 = vmatprep.subr.bf16.mxu0 %v4957_v16 }
 0x432   :  { %4514 = vmatmul.mubr.msk.bf16.gmra.mrb[88].mxu0 %vm42_vm3, %v2452_v51 }
 0x433   :  { %4517 = vmatprep.mubr.msk.bf16.mxu0 %vm42_vm3, %v2453_v58  ;;  %4526 = vmatpush3.bf16.msra.mxu0 %v4957_v16 }
 0x434   :  { %4527 = vmatprep.subr.bf16.mxu0 %v4958_v8 }
 0x437   :  { %4528 = vmatpush3.bf16.msra.mxu0 %v4958_v8 }
 0x438   :  { %4541 = vmatprep.subr.bf16.mxu0 %v6277_v25 }
 0x43a   :  { %4518 = vmatmul.mubr.msk.bf16.gmra.mrb[92].mxu0 %vm42_vm3, %v2454_v60 }
 0x4fd   :  { %v6290_v30 = vpop.f32.mrb[84].mxu0 }
 0x4fe   :  { %v6292_v37 = vpop.f32.mrb[85].mxu0  ;;  %v2654_v27 = vmul.f32 %v6290_v30, %v6284_v50 }
 0x4ff   :  { %v2652_v12 = vmul.f32 %v6280_v36, %v6292_v37  ;;  %v6298_v5 = vpop.f32.mrb[86].mxu0 }
 0x500   :  { %v6300_v47 = vpop.f32.mrb[87].mxu0  ;;  %v2655_v63 = vmul.f32 %v6298_v5, %v6286_v1  ;;  %v2693_v11 = vmul.f32 %v2654_v27, %v2654_v27  ;;  %v2666_v18 = vsel %vm42_vm3, %v2654_v27, 0.0 }
 0x501   :  { %v2691_v53 = vmul.f32 %v2652_v12, %v2652_v12  ;;  %v2653_v7 = vmul.f32 %v6282_v41, %v6300_v47  ;;  %v2663_v35 = vsel %vm42_vm3, %v2652_v12, 0.0 }
 0x502   :  { %v2694_v40 = vmul.f32 %v2655_v63, %v2655_v63  ;;  %v2705_v22 = vsel %vm42_vm3, %v2693_v11, 0.0  ;;  %v2668_v43 = vsel %vm42_vm3, %v2655_v63, 0.0 }
 0x503   :  { %v2664_v33 = vsel %vm42_vm3, %v2653_v7, 0.0  ;;  %v2692_v61 = vmul.f32 %v2653_v7, %v2653_v7  ;;  %v2702_v10 = vsel %vm42_vm3, %v2691_v53, 0.0  ;;  %v6349_v53 = vpop.permute.xlu0 %2644 }
 0x504   :  { %v2665_v24 = vadd.f32 %v2664_v33, %v2663_v35  ;;  %v2707_v38 = vsel %vm42_vm3, %v2694_v40, 0.0 }
 0x505   :  { %v2703_v54 = vsel %vm42_vm3, %v2692_v61, 0.0  ;;  %v6315_v55 = vpop.f32.mrb[88].mxu0 }
 0x506   :  { %v2667_v17 = vadd.f32 %v2666_v18, %v2665_v24  ;;  %v2704_v28 = vadd.f32 %v2703_v54, %v2702_v10  ;;  %v6317_v13 = vpop.f32.mrb[89].mxu0  ;;  %v2658_v20 = vmul.f32 %v6315_v55, %v6308_v62 }
 0x507   :  { %v2656_v32 = vmul.f32 %v6288_v15, %v6317_v13  ;;  %v6323_v46 = vpop.f32.mrb[90].mxu0 }
 0x508   :  { %v2706_v57 = vadd.f32 %v2705_v22, %v2704_v28  ;;  %v2669_v21 = vadd.f32 %v2668_v43, %v2667_v17  ;;  %v6327_v29 = vpop.f32.mrb[91].mxu0  ;;  %v2659_v4 = vmul.f32 %v6323_v46, %v6329_v44  ;;  %v2697_v45 = vmul.f32 %v2658_v20, %v2658_v20 }
 0x509   :  { %v2670_v31 = vsel %vm42_vm3, %v2656_v32, 0.0  ;;  %v2695_v52 = vmul.f32 %v2656_v32, %v2656_v32  ;;  %v2657_v56 = vmul.f32 %v6306_v23, %v6327_v29  ;;  %v2674_v34 = vsel %vm42_vm3, %v2658_v20, 0.0 }
 0x50a   :  { %v2671_v26 = vadd.f32 %v2670_v31, %v2669_v21  ;;  %v2708_v9 = vadd.f32 %v2707_v38, %v2706_v57  ;;  %v2698_v58 = vmul.f32 %v2659_v4, %v2659_v4  ;;  %v2676_v16 = vsel %vm42_vm3, %v2659_v4, 0.0 }
 0x50b   :  { %v2709_v19 = vsel %vm42_vm3, %v2695_v52, 0.0  ;;  %v2672_v48 = vsel %vm42_vm3, %v2657_v56, 0.0  ;;  %v2696_v0 = vmul.f32 %v2657_v56, %v2657_v56  ;;  %v2713_v63 = vsel %vm42_vm3, %v2697_v45, 0.0 }
 0x50c   :  { %v2710_v14 = vadd.f32 %v2709_v19, %v2708_v9  ;;  %v2673_v42 = vadd.f32 %v2672_v48, %v2671_v26  ;;  %v2715_v10 = vsel %vm42_vm3, %v2698_v58, 0.0 }
 0x50d   :  { %v6342_v51 = vpop.f32.mrb[92].mxu0  ;;  %v2711_v60 = vsel %vm42_vm3, %v2696_v0, 0.0 }
 0x50e   :  { %v2675_v59 = vadd.f32 %v2674_v34, %v2673_v42  ;;  %v2572_v3 = vpop.f32.mrb[93].mxu0  ;;  %v2712_v8 = vadd.f32 %v2711_v60, %v2710_v14  ;;  %v2662_v7 = vmul.f32 %v6342_v51, %v6345_v2 }
 0x50f   :  { %v2660_v27 = vmul.f32 %v6331_v6, %v2572_v3  ;;  %v4520_v12 = vpop.f32.mrb[94].mxu0 }
 0x510   :  { %v2677_v11 = vadd.f32 %v2676_v16, %v2675_v59  ;;  %v2575_v35 = vpop.f32.mrb[95].mxu0  ;;  %v2714_v33 = vadd.f32 %v2713_v63, %v2712_v8  ;;  %v2701_v43 = vmul.f32 %v2662_v7, %v2662_v7  ;;  %v2683_v57 = vsel %vm2682_vm6, %v2662_v7, 0.0  ;;  %v2733_v63 = vld [vmem:[%s6740_s7] sm:$0x1] }
 0x511   :  { %v2678_v61 = vsel %vm42_vm3, %v2660_v27, 0.0  ;;  %v2699_v24 = vmul.f32 %v2660_v27, %v2660_v27  ;;  %v2661_v18 = vmul.f32 %v6349_v53, %v2575_v35 }
 0x512   :  { %v2679_v40 = vadd.f32 %v2678_v61, %v2677_v11  ;;  %v2716_v54 = vadd.f32 %v2715_v10, %v2714_v33  ;;  %v2721_v52 = vsel %vm2682_vm6, %v2701_v43, 0.0  ;;  %v2734_v33 = vld [vmem:[%s6740_s7 + $0x1] sm:$0x1] }
 0x513   :  { %v2717_v17 = vsel %vm42_vm3, %v2699_v24, 0.0  ;;  %v2680_v28 = vsel %vm42_vm3, %v2661_v18, 0.0  ;;  %v2700_v22 = vmul.f32 %v2661_v18, %v2661_v18 }
 0x514   :  { %v2681_v32 = vadd.f32 %v2680_v28, %v2679_v40  ;;  %v2718_v20 = vadd.f32 %v2717_v17, %v2716_v54 }
 0x515   :  { %v2719_v21 = vsel %vm42_vm3, %v2700_v22, 0.0 }
 0x516   :  { %v2684_v38 = vadd.f32 %v2683_v57, %v2681_v32  ;;  %v2720_v31 = vadd.f32 %v2719_v21, %v2718_v20 }
 0x518   :  { %v2685_v56 = vrot.slane %v2684_v38, 4  ;;  %v2722_v26 = vadd.f32 %v2721_v52, %v2720_v31 }
 0x51a   :  { %v2686_v9 = vadd.f32 %v2685_v56, %v2684_v38  ;;  %v2723_v4 = vrot.slane %v2722_v26, 4 }
 0x51c   :  { %v2687_v19 = vrot.slane %v2686_v9, 2  ;;  %v2724_v48 = vadd.f32 %v2723_v4, %v2722_v26 }
 0x51e   :  { %v2688_v45 = vadd.f32 %v2687_v19, %v2686_v9  ;;  %v2725_v14 = vrot.slane %v2724_v48, 2 }
 0x520   :  { %v2689_v42 = vrot.slane %v2688_v45, 1  ;;  %v2726_v0 = vadd.f32 %v2725_v14, %v2724_v48 }
 0x522   :  { %v2690_v34 = vadd.f32 %v2689_v42, %v2688_v45  ;;  %v2727_v58 = vrot.slane %v2726_v0, 1 }
 0x524   :  { %v2729_v59 = vmul.f32 0.0121951215, %v2690_v34  ;;  %v2728_v60 = vadd.f32 %v2727_v58, %v2726_v0 }
 0x526   :  { %v2731_v16 = vmul.f32 %v2729_v59, %v2729_v59  ;;  %v2730_v8 = vmul.f32 0.0121951215, %v2728_v60 }
 0x528   :  { %v2732_v27 = vsub.f32 %v2730_v8, %v2731_v16 }
 0x52a   :  { %v2735_v12 = vadd.f32 1e-05, %v2732_v27 }
 0x52c   :  { %4971 = vrsqrt.f32 %v2735_v12 }
 0x536   :  { %v4972_v7 = vpop.eup %4971 }
 0x537   :  { %v2737_v11 = vmul.f32 %v4972_v7, %v2733_v63 }
 0x539   :  { %v2738_v61 = vmul.f32 %v2737_v11, %v2729_v59  ;;  %v2743_v24 = vrot.slane %v2737_v11, %v5520_v39 }
 0x53b   :  { %v2739_v18 = vsub.f32 %v2734_v33, %v2738_v61  ;;  %v2750_v10 = vmul.f32 %v6315_v55, %v2743_v24  ;;  %v2751_v40 = vmul.f32 %v6323_v46, %v2743_v24  ;;  %v2752_v54 = vmul.f32 %v2743_v24, %v2572_v3 }
 0x53c   :  { %v2753_v17 = vmul.f32 %v2743_v24, %v2575_v35  ;;  %v2744_v28 = vmul.f32 %v2743_v24, %v6292_v37  ;;  %v2745_v22 = vmul.f32 %v2743_v24, %v6300_v47  ;;  %v2746_v43 = vmul.f32 %v6290_v30, %v2743_v24 }
 0x53d   :  { %v2758_v32 = vrot.slane %v2739_v18, %v5520_v39  ;;  %v2747_v57 = vmul.f32 %v6298_v5, %v2743_v24  ;;  %v2748_v20 = vmul.f32 %v2743_v24, %v6317_v13  ;;  %v2749_v21 = vmul.f32 %v2743_v24, %v6327_v29 }
 0x53e   :  { %v2754_v55 = vmul.f32 %v6342_v51, %v2743_v24 }
 0x53f   :  { %v2765_v38 = vadd.f32 %v2758_v32, %v2750_v10  ;;  %v2766_v46 = vadd.f32 %v2758_v32, %v2751_v40  ;;  %v2767_v3 = vadd.f32 %v2758_v32, %v2752_v54  ;;  %v2768_v35 = vadd.f32 %v2758_v32, %v2753_v17  ;;  %v4960_v40 = vld [vmem:[%s6739_s4 + $0x8] sm:$0xff]  }
 0x540   :  { %v2759_v31 = vadd.f32 %v2758_v32, %v2744_v28  ;;  %v2760_v37 = vadd.f32 %v2758_v32, %v2745_v22  ;;  %v2761_v52 = vadd.f32 %v2758_v32, %v2746_v43  ;;  %v2762_v47 = vadd.f32 %v2758_v32, %v2747_v57  ;;  %v4961_v22 = vld [vmem:[%s6739_s4 + $0x10] sm:$0xff]  }
 0x541   :  { %v2776_v56 = vmax.f32 %v2765_v38, 0.0  ;;  %v2777_v30 = vmax.f32 %v2766_v46, 0.0  ;;  %v2778_v26 = vmax.f32 %v2767_v3, 0.0  ;;  %v2779_v9 = vmax.f32 %v2768_v35, 0.0  ;;  %v4963_v38 = vld [vmem:[%s6739_s4 + $0x40] sm:$0xff]  }
 0x542   :  { %v2770_v4 = vmax.f32 %v2759_v31, 0.0  ;;  %v2771_v5 = vmax.f32 %v2760_v37, 0.0  ;;  %v2772_v19 = vmax.f32 %v2761_v52, 0.0  ;;  %v2773_v13 = vmax.f32 %v2762_v47, 0.0 }
 0x543   :  { %v2787_v29 = vmul.f32 %v2776_v56, %v6308_v62  ;;  %v2788_v51 = vmul.f32 %v2777_v30, %v6329_v44  ;;  %v2789_v48 = vmul.f32 %v2778_v26, %v6331_v6  ;;  %v2790_v45 = vmul.f32 %v2779_v9, %v6349_v53  ;;  %v4964_v9 = vld [vmem:[%s6739_s4 + $0x48] sm:$0xff]  }
 0x544   :  { %v2781_v14 = vmul.f32 %v2770_v4, %v6280_v36  ;;  %v2782_v42 = vmul.f32 %v2771_v5, %v6282_v41  ;;  %v2783_v0 = vmul.f32 %v2772_v19, %v6284_v50  ;;  %v2784_v34 = vmul.f32 %v2773_v13, %v6286_v1  ;;  %v4965_v5 = vld [vmem:[%s6739_s4 + $0x50] sm:$0xff]  }
 0x545   :  { %2798 = vst.msk [vmem:[#allocation6 + $0x31] sm:$0xff] %vm42_vm3, %v2787_v29  ;;  %2799 = vst.msk [vmem:[#allocation6 + $0x39] sm:$0xff] %vm42_vm3, %v2788_v51  ;;  %v2763_v58 = vadd.f32 %v2758_v32, %v2748_v20  ;;  %v2764_v59 = vadd.f32 %v2758_v32, %v2749_v21  ;;  %v2769_v60 = vadd.f32 %v2758_v32, %v2754_v55  ;;  %v4962_v55 = vld [vmem:[%s6739_s4 + $0x18] sm:$0xff]  }
 0x546   :  { %2800 = vst.msk [vmem:[#allocation6 + $0x41] sm:$0xff] %vm42_vm3, %v2789_v48  ;;  %2801 = vst.msk [vmem:[#allocation6 + $0x49] sm:$0xff] %vm42_vm3, %v2790_v45  ;;  %v4966_v45 = vld [vmem:[%s6739_s4 + $0x58] sm:$0xff]  }
 0x547   :  { %2792 = vst.msk [vmem:[#allocation6 + $0x1] sm:$0xff] %vm42_vm3, %v2781_v14  ;;  %2793 = vst.msk [vmem:[#allocation6 + $0x9] sm:$0xff] %vm42_vm3, %v2782_v42  ;;  %v2774_v16 = vmax.f32 %v2763_v58, 0.0  ;;  %v2775_v8 = vmax.f32 %v2764_v59, 0.0  ;;  %v2780_v27 = vmax.f32 %v2769_v60, 0.0 }
 0x548   :  { %2794 = vst.msk [vmem:[#allocation6 + $0x11] sm:$0xff] %vm42_vm3, %v2783_v0  ;;  %2795 = vst.msk [vmem:[#allocation6 + $0x19] sm:$0xff] %vm42_vm3, %v2784_v34 }
 0x549   :  { %v2785_v12 = vmul.f32 %v2774_v16, %v6288_v15  ;;  %v2786_v63 = vmul.f32 %v2775_v8, %v6306_v23  ;;  %v2791_v7 = vmul.f32 %v2780_v27, %v6345_v2 }
 0x54b   :  { %2796 = vst.msk [vmem:[#allocation6 + $0x21] sm:$0xff] %vm42_vm3, %v2785_v12  ;;  %2797 = vst.msk [vmem:[#allocation6 + $0x29] sm:$0xff] %vm42_vm3, %v2786_v63 }
 0x54c   :  { %2802 = vst.msk [vmem:[#allocation6 + $0x51] sm:$0xf] %vm2682_vm6, %v2791_v7  ;;  %v2834_v43 = vld [vmem:[#allocation6 + $0x31] sm:$0xff]  ;;  %v2835_v32 = vld [vmem:[#allocation6 + $0x39] sm:$0xff] }
 0x54d   :  { %v2836_v57 = vld [vmem:[#allocation6 + $0x41] sm:$0xff]  ;;  %v2837_v20 = vld [vmem:[#allocation6 + $0x49] sm:$0xff]  ;;  %v2842_v21 = vpack.c.bf16 %v2835_v32, %v2834_v43  ;;  %v2810_v13 = vld [vmem:[#allocation6 + $0x38] sm:$0xff] }
 0x54e   :  { %v2828_v11 = vld [vmem:[#allocation6 + $0x1] sm:$0xff]  ;;  %v2829_v33 = vld [vmem:[#allocation6 + $0x9] sm:$0xff]  ;;  %v3104_v7 = vld [vmem:[#allocation6 + $0x32] sm:$0xff] }
 0x54f   :  { %v2830_v61 = vld [vmem:[#allocation6 + $0x11] sm:$0xff]  ;;  %v2839_v24 = vpack.c.bf16 %v2829_v33, %v2828_v11  ;;  %v2831_v18 = vld [vmem:[#allocation6 + $0x19] sm:$0xff]  ;;  %v2804_v35 = vld [vmem:[#allocation6 + $0x8] sm:$0xff] }
 0x550   :  { %v2840_v10 = vpack.c.bf16 %v2831_v18, %v2830_v61  ;;  %v2803_v3 = vld [vmem:[#allocation6] sm:$0xff]  ;;  %v2805_v52 = vld [vmem:[#allocation6 + $0x10] sm:$0xff]  ;;  %v2806_v47 = vld [vmem:[#allocation6 + $0x18] sm:$0xff] }
 0x551   :  { %4529 = vmatprep.mubr.msk.bf16.mxu0 %vm42_vm3, %v2839_v24  ;;  %v2814_v37 = vpack.c.bf16 %v2804_v35, %v2803_v3  ;;  %v2815_v26 = vpack.c.bf16 %v2806_v47, %v2805_v52  ;;  %v2811_v29 = vld [vmem:[#allocation6 + $0x40] sm:$0xff]  ;;  %v2812_v51 = vld [vmem:[#allocation6 + $0x48] sm:$0xff]  ;;  %v3100_v60 = vld [vmem:[#allocation6 + $0x12] sm:$0xff] }
 0x552   :  { %4530 = vmatmul.mubr.msk.bf16.vlgmr.msra.gmra.mrb[96].mxu0 %vm42_vm3, %v2840_v10  ;;  %v2832_v54 = vld [vmem:[#allocation6 + $0x21] sm:$0xff]  ;;  %v2833_v17 = vld [vmem:[#allocation6 + $0x29] sm:$0xff]  ;;  %v2818_v14 = vpack.c.bf16 %v2812_v51, %v2811_v29 }
 0x553   :  { %4542 = vmatpush3.bf16.msra.mxu0 %v6277_v25  ;;  %v2841_v28 = vpack.c.bf16 %v2833_v17, %v2832_v54  ;;  %v2843_v25 = vpack.c.bf16 %v2837_v20, %v2836_v57  ;;  %v2838_v46 = vld [vmem:[#allocation6 + $0x51] sm:$0xf]  ;;  %v2807_v56 = vld [vmem:[#allocation6 + $0x20] sm:$0xff]  ;;  %v2808_v30 = vld [vmem:[#allocation6 + $0x28] sm:$0xff]  ;;  %v4978_v54 = vmov 0.0|0.0  }
 0x554   :  { %4543 = vmatprep.subr.bf16.mxu0 %v4960_v40  ;;  %v2844_v31 = vpack.c.bf16 %v2838_v46, %v2838_v46  ;;  %v2816_v4 = vpack.c.bf16 %v2808_v30, %v2807_v56  ;;  %v2809_v19 = vld [vmem:[#allocation6 + $0x30] sm:$0xff]  ;;  %v3098_v0 = vld [vmem:[#allocation6 + $0x2] sm:$0xff]  ;;  %v3101_v16 = vld [vmem:[#allocation6 + $0x1a] sm:$0xff]  ;;  %4710 = vmatprep.subr.bf16.mxu1 %v4978_v54 }
 0x555   :  { %4533 = vmatprep.mubr.msk.bf16.mxu0 %vm42_vm3, %v2841_v28  ;;  %v2817_v48 = vpack.c.bf16 %v2810_v13, %v2809_v19  ;;  %v2813_v42 = vld [vmem:[#allocation6 + $0x50] sm:$0xf]  ;;  %v3102_v8 = vld [vmem:[#allocation6 + $0x22] sm:$0xff]  ;;  %v3110_v12 = vpack.c.bf16 %v3101_v16, %v3100_v60  ;;  %v3105_v11 = vld [vmem:[#allocation6 + $0x3a] sm:$0xff] }
 0x556   :  { %v3099_v34 = vld [vmem:[#allocation6 + $0xa] sm:$0xff]  ;;  %v2819_v58 = vpack.c.bf16 %v2813_v42, %v2813_v42  ;;  %v3106_v33 = vld [vmem:[#allocation6 + $0x42] sm:$0xff]  ;;  %v3112_v24 = vpack.c.bf16 %v3105_v11, %v3104_v7  ;;  %v3108_v10 = vld [vmem:[#allocation6 + $0x52] sm:$0xf] }
 0x557   :  { %4544 = vmatpush3.bf16.msra.mxu0 %v4960_v40  ;;  %v3109_v59 = vpack.c.bf16 %v3099_v34, %v3098_v0  ;;  %v3103_v27 = vld [vmem:[#allocation6 + $0x2a] sm:$0xff]  ;;  %v3114_v40 = vpack.c.bf16 %v3108_v10, %v3108_v10 }
 0x558   :  { %4545 = vmatprep.subr.bf16.mxu0 %v4961_v22  ;;  %v3111_v63 = vpack.c.bf16 %v3103_v27, %v3102_v8  ;;  %v3107_v61 = vld [vmem:[#allocation6 + $0x4a] sm:$0xff] }
 0x559   :  { %v3113_v18 = vpack.c.bf16 %v3107_v61, %v3106_v33 }
 0x55a   :  { %4534 = vmatmul.mubr.msk.bf16.gmra.mrb[100].mxu0 %vm42_vm3, %v2842_v21 }
 0x55b   :  { %4537 = vmatprep.mubr.msk.bf16.mxu0 %vm42_vm3, %v2843_v25  ;;  %4546 = vmatpush3.bf16.msra.mxu0 %v4961_v22 }
 0x55c   :  { %4547 = vmatprep.subr.bf16.mxu0 %v4962_v55 }
 0x55f   :  { %4548 = vmatpush3.bf16.msra.mxu0 %v4962_v55 }
 0x560   :  { %4561 = vmatprep.subr.bf16.mxu0 %v4963_v38 }
 0x562   :  { %4538 = vmatmul.mubr.msk.bf16.gmra.mrb[104].mxu0 %vm42_vm3, %v2844_v31 }
 0x563   :  { %4549 = vmatprep.mubr.msk.bf16.mxu0 %vm42_vm3, %v2814_v37 }
 0x56a   :  { %4550 = vmatmul.mubr.msk.bf16.vlgmr.msra.gmra.mrb[96].mxu0 %vm42_vm3, %v2815_v26 }
 0x56b   :  { %4553 = vmatprep.mubr.msk.bf16.mxu0 %vm42_vm3, %v2816_v4  ;;  %4562 = vmatpush3.bf16.msra.mxu0 %v4963_v38 }
 0x56c   :  { %4563 = vmatprep.subr.bf16.mxu0 %v4964_v9 }
 0x56f   :  { %4564 = vmatpush3.bf16.msra.mxu0 %v4964_v9 }
 0x570   :  { %4565 = vmatprep.subr.bf16.mxu0 %v4965_v5 }
 0x572   :  { %4554 = vmatmul.mubr.msk.bf16.gmra.mrb[100].mxu0 %vm42_vm3, %v2817_v48 }
 0x573   :  { %4557 = vmatprep.mubr.msk.bf16.mxu0 %vm42_vm3, %v2818_v14  ;;  %4566 = vmatpush3.bf16.msra.mxu0 %v4965_v5 }
 0x574   :  { %4567 = vmatprep.subr.bf16.mxu0 %v4966_v45 }
 0x577   :  { %4568 = vmatpush3.bf16.msra.mxu0 %v4966_v45 }
 0x578   :  { %4740 = vmatprep.subr.bf16.mxu0 %v4978_v54 }
 0x57a   :  { %4558 = vmatmul.mubr.msk.bf16.gmra.mrb[104].mxu0 %vm42_vm3, %v2819_v58 }
 0x57b   :  { %4569 = vmatprep.mubr.msk.bf16.mxu0 %vm42_vm3, %v3109_v59 }
 0x582   :  { %4570 = vmatmul.mubr.msk.bf16.vlgmr.msra.gmra.mrb[96].mxu0 %vm42_vm3, %v3110_v12 }
 0x583   :  { %4573 = vmatprep.mubr.msk.bf16.mxu0 %vm42_vm3, %v3111_v63 }
 0x58a   :  { %4574 = vmatmul.mubr.msk.bf16.gmra.mrb[100].mxu0 %vm42_vm3, %v3112_v24 }
 0x58b   :  { %4577 = vmatprep.mubr.msk.bf16.mxu0 %vm42_vm3, %v3113_v18 }
 0x592   :  { %4578 = vmatmul.mubr.msk.bf16.gmra.mrb[104].mxu0 %vm42_vm3, %v3114_v40 }
 0x593   :  { %4689 = vmatprep.mubr.msk.f32.mxu0 %vm4976_vm1, %v6752_v49 }
 0x655   :  { %v6445_v17 = vpop.f32.mrb[96].mxu0 }
 0x656   :  { %v6447_v28 = vpop.f32.mrb[97].mxu0  ;;  %v3259_v22 = vmul.f32 %v6445_v17, %v6284_v50 }
 0x657   :  { %v3257_v43 = vmul.f32 %v6447_v28, %v6280_v36  ;;  %v6453_v32 = vpop.f32.mrb[98].mxu0 }
 0x658   :  { %v6455_v57 = vpop.f32.mrb[99].mxu0  ;;  %v3260_v21 = vmul.f32 %v6453_v32, %v6286_v1  ;;  %v3299_v25 = vmul.f32 %v3259_v22, %v3259_v22  ;;  %v3272_v36 = vsel %vm3268_vm7, %v3259_v22, 0.0 }
 0x659   :  { %v3297_v20 = vmul.f32 %v3257_v43, %v3257_v43  ;;  %v3258_v55 = vmul.f32 %v6455_v57, %v6282_v41  ;;  %v3269_v38 = vsel %vm3268_vm7, %v3257_v43, 0.0 }
 0x65a   :  { %v3300_v31 = vmul.f32 %v3260_v21, %v3260_v21  ;;  %v3311_v41 = vsel %vm3268_vm7, %v3299_v25, 0.0  ;;  %v3274_v30 = vsel %vm3268_vm7, %v3260_v21, 0.0 }
 0x65b   :  { %v3270_v50 = vsel %vm3268_vm7, %v3258_v55, 0.0  ;;  %v3298_v46 = vmul.f32 %v3258_v55, %v3258_v55  ;;  %v3308_v35 = vsel %vm3268_vm7, %v3297_v20, 0.0 }
 0x65c   :  { %v3271_v3 = vadd.f32 %v3270_v50, %v3269_v38  ;;  %v3313_v29 = vsel %vm3268_vm7, %v3300_v31, 0.0 }
 0x65d   :  { %v3309_v37 = vsel %vm3268_vm7, %v3298_v46, 0.0  ;;  %v6466_v52 = vpop.f32.mrb[100].mxu0 }
 0x65e   :  { %v3273_v1 = vadd.f32 %v3272_v36, %v3271_v3  ;;  %v3310_v47 = vadd.f32 %v3309_v37, %v3308_v35  ;;  %v6468_v56 = vpop.f32.mrb[101].mxu0  ;;  %v3263_v5 = vmul.f32 %v6466_v52, %v6308_v62 }
 0x65f   :  { %v3261_v26 = vmul.f32 %v6468_v56, %v6288_v15  ;;  %v6474_v9 = vpop.f32.mrb[102].mxu0 }
 0x660   :  { %v3312_v4 = vadd.f32 %v3311_v41, %v3310_v47  ;;  %v3275_v19 = vadd.f32 %v3274_v30, %v3273_v1  ;;  %v6478_v13 = vpop.f32.mrb[103].mxu0  ;;  %v3264_v15 = vmul.f32 %v6474_v9, %v6329_v44  ;;  %v3303_v34 = vmul.f32 %v3263_v5, %v3263_v5 }
 0x661   :  { %v3276_v51 = vsel %vm3268_vm7, %v3261_v26, 0.0  ;;  %v3301_v48 = vmul.f32 %v3261_v26, %v3261_v26  ;;  %v3262_v45 = vmul.f32 %v6478_v13, %v6306_v23  ;;  %v3280_v16 = vsel %vm3268_vm7, %v3263_v5, 0.0 }
 0x662   :  { %v3277_v14 = vadd.f32 %v3276_v51, %v3275_v19  ;;  %v3314_v42 = vadd.f32 %v3313_v29, %v3312_v4  ;;  %v3304_v27 = vmul.f32 %v3264_v15, %v3264_v15  ;;  %v3282_v7 = vsel %vm3268_vm7, %v3264_v15, 0.0 }
 0x663   :  { %v3315_v0 = vsel %vm3268_vm7, %v3301_v48, 0.0  ;;  %v3278_v62 = vsel %vm3268_vm7, %v3262_v45, 0.0  ;;  %v3302_v60 = vmul.f32 %v3262_v45, %v3262_v45  ;;  %v3319_v61 = vsel %vm3268_vm7, %v3303_v34, 0.0 }
 0x664   :  { %v3316_v58 = vadd.f32 %v3315_v0, %v3314_v42  ;;  %v3279_v59 = vadd.f32 %v3278_v62, %v3277_v14  ;;  %v3321_v21 = vsel %vm3268_vm7, %v3304_v27, 0.0 }
 0x665   :  { %v6489_v8 = vpop.f32.mrb[104].mxu0  ;;  %v3317_v23 = vsel %vm3268_vm7, %v3302_v60, 0.0 }
 0x666   :  { %v3281_v12 = vadd.f32 %v3280_v16, %v3279_v59  ;;  %v3232_v63 = vpop.f32.mrb[105].mxu0  ;;  %v3318_v44 = vadd.f32 %v3317_v23, %v3316_v58  ;;  %v3267_v24 = vmul.f32 %v6489_v8, %v6345_v2  ;;  %v3339_v58 = vld [vmem:[%s6741_s8] sm:$0x1]  ;;  %v3340_v16 = vld [vmem:[%s6741_s8 + $0x1] sm:$0x1] }
 0x667   :  { %v3265_v11 = vmul.f32 %v3232_v63, %v6331_v6  ;;  %v4580_v33 = vpop.f32.mrb[106].mxu0 }
 0x668   :  { %v3283_v18 = vadd.f32 %v3282_v7, %v3281_v12  ;;  %v3235_v10 = vpop.f32.mrb[107].mxu0  ;;  %v3320_v40 = vadd.f32 %v3319_v61, %v3318_v44  ;;  %v3307_v46 = vmul.f32 %v3267_v24, %v3267_v24  ;;  %v3289_v3 = vsel %vm3288_vm8, %v3267_v24, 0.0 }
 0x669   :  { %v3284_v22 = vsel %vm3268_vm7, %v3265_v11, 0.0  ;;  %v3305_v43 = vmul.f32 %v3265_v11, %v3265_v11  ;;  %v3266_v20 = vmul.f32 %v3235_v10, %v6349_v53 }
 0x66a   :  { %v3285_v55 = vadd.f32 %v3284_v22, %v3283_v18  ;;  %v3322_v25 = vadd.f32 %v3321_v21, %v3320_v40  ;;  %v3327_v1 = vsel %vm3288_vm8, %v3307_v46, 0.0 }
 0x66b   :  { %v3323_v6 = vsel %vm3268_vm7, %v3305_v43, 0.0  ;;  %v3286_v38 = vsel %vm3268_vm7, %v3266_v20, 0.0  ;;  %v3306_v50 = vmul.f32 %v3266_v20, %v3266_v20 }
 0x66c   :  { %v3287_v2 = vadd.f32 %v3286_v38, %v3285_v55  ;;  %v3324_v36 = vadd.f32 %v3323_v6, %v3322_v25 }
 0x66d   :  { %v3325_v35 = vsel %vm3268_vm7, %v3306_v50, 0.0 }
 0x66e   :  { %v3290_v31 = vadd.f32 %v3289_v3, %v3287_v2  ;;  %v3326_v37 = vadd.f32 %v3325_v35, %v3324_v36 }
 0x670   :  { %v3291_v53 = vrot.slane %v3290_v31, 4  ;;  %v3328_v47 = vadd.f32 %v3327_v1, %v3326_v37 }
 0x672   :  { %v3292_v41 = vadd.f32 %v3291_v53, %v3290_v31  ;;  %v3329_v30 = vrot.slane %v3328_v47, 4 }
 0x674   :  { %v3293_v26 = vrot.slane %v3292_v41, 2  ;;  %v3330_v4 = vadd.f32 %v3329_v30, %v3328_v47  ;;  %v4023_v30 = vld [vmem:[%s6742_s11 + $0x70] sm:$0xff] }
 0x676   :  { %v3294_v5 = vadd.f32 %v3293_v26, %v3292_v41  ;;  %v3331_v19 = vrot.slane %v3330_v4, 2  ;;  %v3387_v41 = vld [vmem:[%s6742_s11] sm:$0xff]  ;;  %v3388_v26 = vld [vmem:[%s6742_s11 + $0x8] sm:$0xff] }
 0x678   :  { %v3295_v29 = vrot.slane %v3294_v5, 1  ;;  %v3332_v51 = vadd.f32 %v3331_v19, %v3330_v4  ;;  %v4024_v4 = vld [vmem:[%s6742_s11 + $0x78] sm:$0xff]  ;;  %v4025_v19 = vld [vmem:[%s6742_s11 + $0x80] sm:$0xff] }
 0x67a   :  { %v3296_v48 = vadd.f32 %v3295_v29, %v3294_v5  ;;  %v3333_v45 = vrot.slane %v3332_v51, 1  ;;  %v3389_v5 = vld [vmem:[%s6742_s11 + $0x10] sm:$0xff]  ;;  %v3390_v29 = vld [vmem:[%s6742_s11 + $0x18] sm:$0xff] }
 0x67c   :  { %v3335_v14 = vmul.f32 0.0121951215, %v3296_v48  ;;  %v3334_v42 = vadd.f32 %v3333_v45, %v3332_v51  ;;  %v4026_v51 = vld [vmem:[%s6742_s11 + $0x88] sm:$0xff]  ;;  %v3391_v48 = vld [vmem:[%s6742_s11 + $0x20] sm:$0xff]  ;;  %v4027_v45 = vld [vmem:[%s6742_s11 + $0x90] sm:$0xff] }
 0x67e   :  { %v3337_v15 = vmul.f32 %v3335_v14, %v3335_v14  ;;  %v3336_v0 = vmul.f32 0.0121951215, %v3334_v42  ;;  %v4028_v42 = vld [vmem:[%s6742_s11 + $0x98] sm:$0xff] }
 0x680   :  { %v3338_v62 = vsub.f32 %v3336_v0, %v3337_v15  ;;  %v3393_v15 = vld [vmem:[%s6742_s11 + $0x30] sm:$0x3]  ;;  %v4008_v0 = vld [vmem:[%s6742_s11 + $0x38] sm:$0xff] }
 0x682   :  { %v3341_v34 = vadd.f32 1e-05, %v3338_v62  ;;  %v4009_v62 = vld [vmem:[%s6742_s11 + $0x40] sm:$0xff] }
 0x684   :  { %4973 = vrsqrt.f32 %v3341_v34  ;;  %v4010_v34 = vld [vmem:[%s6742_s11 + $0x48] sm:$0xff] }
 0x68e   :  { %v4974_v59 = vpop.eup %4973 }
 0x68f   :  { %v3343_v60 = vmul.f32 %v4974_v59, %v3339_v58  ;;  %v4011_v58 = vld [vmem:[%s6742_s11 + $0x50] sm:$0xff]  ;;  %v4012_v59 = vld [vmem:[%s6742_s11 + $0x58] sm:$0xff] }
 0x691   :  { %v3344_v27 = vmul.f32 %v3343_v60, %v3335_v14  ;;  %v3349_v12 = vrot.slane %v3343_v60, %v5520_v39  ;;  %v3392_v14 = vld [vmem:[%s6742_s11 + $0x28] sm:$0xff]  ;;  %v4013_v60 = vld [vmem:[%s6742_s11 + $0x60] sm:$0xff] }
 0x693   :  { %v3345_v23 = vsub.f32 %v3340_v16, %v3344_v27  ;;  %v3358_v7 = vmul.f32 %v3349_v12, %v3232_v63  ;;  %v3359_v44 = vmul.f32 %v3349_v12, %v3235_v10  ;;  %v3350_v11 = vmul.f32 %v3349_v12, %v6447_v28  ;;  %v4029_v16 = vld [vmem:[%s6742_s11 + $0xa0] sm:$0x3] }
 0x694   :  { %v3351_v33 = vmul.f32 %v3349_v12, %v6455_v57  ;;  %v3352_v61 = vmul.f32 %v6445_v17, %v3349_v12  ;;  %v3353_v24 = vmul.f32 %v6453_v32, %v3349_v12  ;;  %v3354_v18 = vmul.f32 %v3349_v12, %v6468_v56 }
 0x695   :  { %v3364_v40 = vrot.slane %v3345_v23, %v5520_v39  ;;  %v3355_v22 = vmul.f32 %v3349_v12, %v6478_v13  ;;  %v3356_v43 = vmul.f32 %v6466_v52, %v3349_v12  ;;  %v3357_v20 = vmul.f32 %v6474_v9, %v3349_v12 }
 0x696   :  { %v3360_v63 = vmul.f32 %v6489_v8, %v3349_v12 }
 0x697   :  { %v3373_v10 = vadd.f32 %v3364_v40, %v3358_v7  ;;  %v3374_v28 = vadd.f32 %v3364_v40, %v3359_v44  ;;  %v3365_v21 = vadd.f32 %v3364_v40, %v3350_v11  ;;  %v3366_v57 = vadd.f32 %v3364_v40, %v3351_v33 }
 0x698   :  { %v3367_v55 = vadd.f32 %v3364_v40, %v3352_v61  ;;  %v3368_v17 = vadd.f32 %v3364_v40, %v3353_v24  ;;  %v3369_v25 = vadd.f32 %v3364_v40, %v3354_v18  ;;  %v3370_v32 = vadd.f32 %v3364_v40, %v3355_v22 }
 0x699   :  { %v3384_v6 = vmax.f32 %v3373_v10, 0.0  ;;  %v3385_v56 = vmax.f32 %v3374_v28, 0.0  ;;  %v3376_v38 = vmax.f32 %v3365_v21, 0.0  ;;  %v3377_v39 = vmax.f32 %v3366_v57, 0.0 }
 0x69a   :  { %v3378_v50 = vmax.f32 %v3367_v55, 0.0  ;;  %v3379_v13 = vmax.f32 %v3368_v17, 0.0  ;;  %v3380_v46 = vmax.f32 %v3369_v25, 0.0  ;;  %v3381_v52 = vmax.f32 %v3370_v32, 0.0 }
 0x69b   :  { %v6520_v2 = vpack.c.bf16 %v3385_v56, %v3384_v6  ;;  %v6522_v9 = vpack.c.bf16 %v3377_v39, %v3376_v38  ;;  %v3371_v8 = vadd.f32 %v3364_v40, %v3356_v43  ;;  %v3372_v3 = vadd.f32 %v3364_v40, %v3357_v20 }
 0x69c   :  { %v6524_v36 = vpack.c.bf16 %v3379_v13, %v3378_v50  ;;  %v6526_v35 = vpack.c.bf16 %v3381_v52, %v3380_v46  ;;  %v3375_v31 = vadd.f32 %v3364_v40, %v3360_v63 }
 0x69d   :  { %4712 = vmatpush3.bf16.msra.mxu1 %v6522_v9  ;;  %4742 = vmatpush3.bf16.msra.mxu0 %v6522_v9  ;;  %v3382_v37 = vmax.f32 %v3371_v8, 0.0  ;;  %v3383_v1 = vmax.f32 %v3372_v3, 0.0 }
 0x69e   :  { %4713 = vmatprep.subr.bf16.mxu1 %v4978_v54  ;;  %4743 = vmatprep.subr.bf16.mxu0 %v4978_v54  ;;  %v6550_v47 = vmax.f32 %v3375_v31, 0.0 }
 0x69f   :  { %v6532_v53 = vpack.c.bf16 %v3383_v1, %v3382_v37 }
 0x6a1   :  { %4715 = vmatpush3.bf16.msra.mxu1 %v6524_v36  ;;  %4745 = vmatpush3.bf16.msra.mxu0 %v6524_v36 }
 0x6a2   :  { %4716 = vmatprep.subr.bf16.mxu1 %v4978_v54  ;;  %4746 = vmatprep.subr.bf16.mxu0 %v4978_v54 }
 0x6a5   :  { %4718 = vmatpush3.bf16.msra.mxu1 %v6526_v35  ;;  %4748 = vmatpush3.bf16.msra.mxu0 %v6526_v35 }
 0x6a6   :  { %4719 = vmatprep.subr.bf16.mxu1 %v4978_v54  ;;  %4749 = vmatprep.subr.bf16.mxu0 %v4978_v54 }
 0x6a9   :  { %4721 = vmatpush3.bf16.msra.mxu1 %v6532_v53  ;;  %4751 = vmatpush3.bf16.msra.mxu0 %v6532_v53 }
 0x6aa   :  { %4722 = vmatprep.subr.bf16.mxu1 %v4978_v54  ;;  %4752 = vmatprep.subr.bf16.mxu0 %v4978_v54 }
 0x6ad   :  { %4724 = vmatpush3.bf16.msra.mxu1 %v6520_v2  ;;  %4754 = vmatpush3.bf16.msra.mxu0 %v6520_v2 }
 0x6ae   :  { %4601 = vmatprep.subr.mxu1 %v6752_v49  ;;  %4687 = vmatprep.subr.mxu0 %v6752_v49 }
 0x6b1   :  { %4602 = vmatpush3.msk.msra.mxu1 %vm3416_vm9, %v6550_v47  ;;  %4688 = vmatpush3.msk.msra.mxu0 %vm3416_vm9, %v6550_v47 }
 0x6b2   :  { %4604 = vmatmul.mubr.msk.f32.vlgmr.msra.gmra.mrb[44].mxu1 %vm3394_vm10, %v3387_v41  ;;  %4725 = vmatprep.subr.bf16.mxu1 %v4978_v54 }
 0x6b3   :  { %4727 = vmatpush3.bf16.msra.mxu1 %v6522_v9  ;;  %4606 = vmatprep.mubr.msk.f32.mxu1 %vm4976_vm1, %v6752_v49 }
 0x6b4   :  { %4728 = vmatprep.subr.bf16.mxu1 %v4978_v54  ;;  %4690 = vmatmul.mubr.msk.f32.vlgmr.msra.gmra.mrb[108].mxu0 %vm3394_vm10, %v4023_v30 }
 0x6b5   :  { %4692 = vmatprep.mubr.msk.f32.mxu0 %vm4976_vm1, %v6752_v49 }
 0x6b6   :  { %4607 = vmatmul.mubr.msk.f32.gmra.mrb[46].mxu1 %vm3394_vm10, %v3388_v26 }
 0x6b7   :  { %4730 = vmatpush3.bf16.msra.mxu1 %v6524_v36  ;;  %4609 = vmatprep.mubr.msk.f32.mxu1 %vm4976_vm1, %v6752_v49 }
 0x6b8   :  { %4731 = vmatprep.subr.bf16.mxu1 %v4978_v54  ;;  %4693 = vmatmul.mubr.msk.f32.gmra.mrb[110].mxu0 %vm3394_vm10, %v4024_v4 }
 0x6b9   :  { %4695 = vmatprep.mubr.msk.f32.mxu0 %vm4976_vm1, %v6752_v49 }
 0x6ba   :  { %4610 = vmatmul.mubr.msk.f32.gmra.mrb[48].mxu1 %vm3394_vm10, %v3389_v5 }
 0x6bb   :  { %4733 = vmatpush3.bf16.msra.mxu1 %v6526_v35  ;;  %4612 = vmatprep.mubr.msk.f32.mxu1 %vm4976_vm1, %v6752_v49 }
 0x6bc   :  { %4734 = vmatprep.subr.bf16.mxu1 %v4978_v54  ;;  %4696 = vmatmul.mubr.msk.f32.gmra.mrb[112].mxu0 %vm3394_vm10, %v4025_v19 }
 0x6bd   :  { %4698 = vmatprep.mubr.msk.f32.mxu0 %vm4976_vm1, %v6752_v49 }
 0x6be   :  { %4613 = vmatmul.mubr.msk.f32.gmra.mrb[50].mxu1 %vm3394_vm10, %v3390_v29 }
 0x6bf   :  { %4736 = vmatpush3.bf16.msra.mxu1 %v6532_v53  ;;  %4615 = vmatprep.mubr.msk.f32.mxu1 %vm4976_vm1, %v6752_v49 }
 0x6c0   :  { %4737 = vmatprep.subr.bf16.mxu1 %v4978_v54  ;;  %4699 = vmatmul.mubr.msk.f32.gmra.mrb[114].mxu0 %vm3394_vm10, %v4026_v51 }
 0x6c1   :  { %4701 = vmatprep.mubr.msk.f32.mxu0 %vm4976_vm1, %v6752_v49 }
 0x6c2   :  { %4616 = vmatmul.mubr.msk.f32.gmra.mrb[52].mxu1 %vm3394_vm10, %v3391_v48 }
 0x6c3   :  { %4739 = vmatpush3.bf16.msra.mxu1 %v6520_v2  ;;  %4618 = vmatprep.mubr.msk.f32.mxu1 %vm4976_vm1, %v6752_v49 }
 0x6c4   :  { %4644 = vmatprep.subr.mxu1 %v6752_v49  ;;  %4702 = vmatmul.mubr.msk.f32.gmra.mrb[116].mxu0 %vm3394_vm10, %v4027_v45 }
 0x6c5   :  { %4704 = vmatprep.mubr.msk.f32.mxu0 %vm4976_vm1, %v6752_v49 }
 0x6c6   :  { %4619 = vmatmul.mubr.msk.f32.gmra.mrb[54].mxu1 %vm3394_vm10, %v3392_v14 }
 0x6c7   :  { %4645 = vmatpush3.msk.msra.mxu1 %vm3416_vm9, %v6550_v47  ;;  %4621 = vmatprep.mubr.msk.f32.mxu1 %vm4976_vm1, %v6752_v49 }
 0x6c8   :  { %4755 = vmatprep.subr.bf16.mxu1 %v4978_v54  ;;  %4705 = vmatmul.mubr.msk.f32.gmra.mrb[118].mxu0 %vm3394_vm10, %v4028_v42 }
 0x6ca   :  { %4622 = vmatmul.mubr.msk.f32.gmra.mrb[56].mxu1 %vm3394_vm10, %v3393_v15 }
 0x6cb   :  { %4646 = vmatprep.mubr.msk.f32.mxu1 %vm4976_vm1, %v6752_v49 }
 0x6ce   :  { %4647 = vmatmul.mubr.msk.f32.vlgmr.msra.gmra.mrb[58].mxu1 %vm3394_vm10, %v4008_v0 }
 0x6cf   :  { %4761 = vmatpush3.bf16.msra.mxu1 %v6522_v9  ;;  %4649 = vmatprep.mubr.msk.f32.mxu1 %vm4976_vm1, %v6752_v49 }
 0x6d0   :  { %4756 = vmatprep.subr.bf16.mxu1 %v4978_v54 }
 0x6d2   :  { %4650 = vmatmul.mubr.msk.f32.gmra.mrb[60].mxu1 %vm3394_vm10, %v4009_v62 }
 0x6d3   :  { %4762 = vmatpush3.bf16.msra.mxu1 %v6524_v36  ;;  %4652 = vmatprep.mubr.msk.f32.mxu1 %vm4976_vm1, %v6752_v49 }
 0x6d4   :  { %4757 = vmatprep.subr.bf16.mxu1 %v4978_v54 }
 0x6d6   :  { %4653 = vmatmul.mubr.msk.f32.gmra.mrb[62].mxu1 %vm3394_vm10, %v4010_v34 }
 0x6d7   :  { %4763 = vmatpush3.bf16.msra.mxu1 %v6526_v35  ;;  %4655 = vmatprep.mubr.msk.f32.mxu1 %vm4976_vm1, %v6752_v49 }
 0x6d8   :  { %4758 = vmatprep.subr.bf16.mxu1 %v4978_v54 }
 0x6da   :  { %4656 = vmatmul.mubr.msk.f32.gmra.mrb[64].mxu1 %vm3394_vm10, %v4011_v58 }
 0x6db   :  { %4764 = vmatpush3.bf16.msra.mxu1 %v6532_v53  ;;  %4658 = vmatprep.mubr.msk.f32.mxu1 %vm4976_vm1, %v6752_v49 }
 0x6dc   :  { %4759 = vmatprep.subr.bf16.mxu1 %v4978_v54  ;;  %v4014_v54 = vld [vmem:[%s6742_s11 + $0x68] sm:$0x3] }
 0x6de   :  { %4659 = vmatmul.mubr.msk.f32.gmra.mrb[66].mxu1 %vm3394_vm10, %v4012_v59 }
 0x6df   :  { %4765 = vmatpush3.bf16.msra.mxu1 %v6520_v2  ;;  %4661 = vmatprep.mubr.msk.f32.mxu1 %vm4976_vm1, %v6752_v49 }
 0x6e0   :  { %4760 = vmatprep.subr.mxu1 %v6752_v49 }
 0x6e2   :  { %4662 = vmatmul.mubr.msk.f32.gmra.mrb[68].mxu1 %vm3394_vm10, %v4013_v60 }
 0x6e3   :  { %4766 = vmatpush3.msk.msra.mxu1 %vm3416_vm9, %v6550_v47  ;;  %4664 = vmatprep.mubr.msk.f32.mxu1 %vm4976_vm1, %v6752_v49 }
 0x6e6   :  { %4665 = vmatmul.mubr.msk.f32.gmra.mrb[70].mxu1 %vm3394_vm10, %v4014_v54 }
 0x6e7   :  { %4707 = vmatprep.mubr.msk.f32.mxu1 %vm4976_vm1, %v6752_v49 }
 0x6ea   :  { %4708 = vmatmul.mubr.msk.f32.vlgmr.msra.gmra.mrb[72].mxu1 %vm3394_vm10, %v4029_v16 }
 0x785   :  { %v3486_v27 = vpop.f32.mrb[44].mxu1 }
 0x786   :  { %v4605_v12 = vpop.f32.mrb[45].mxu1 }
 0x787   :  { %v3751_v23 = vpop.f32.mrb[108].mxu0 }
 0x788   :  { %v4691_v7 = vpop.f32.mrb[109].mxu0 }
 0x789   :  { %v3491_v44 = vpop.f32.mrb[46].mxu1 }
 0x78a   :  { %v4608_v11 = vpop.f32.mrb[47].mxu1 }
 0x78b   :  { %v3756_v33 = vpop.f32.mrb[110].mxu0 }
 0x78c   :  { %v4694_v61 = vpop.f32.mrb[111].mxu0 }
 0x78d   :  { %v3496_v24 = vpop.f32.mrb[48].mxu1 }
 0x78e   :  { %v4611_v18 = vpop.f32.mrb[49].mxu1 }
 0x78f   :  { %v3761_v40 = vpop.f32.mrb[112].mxu0 }
 0x790   :  { %v4697_v22 = vpop.f32.mrb[113].mxu0 }
 0x791   :  { %v3501_v43 = vpop.f32.mrb[50].mxu1 }
 0x792   :  { %v4614_v49 = vpop.f32.mrb[51].mxu1 }
 0x793   :  { %v3766_v20 = vpop.f32.mrb[114].mxu0 }
 0x794   :  { %v4700_v63 = vpop.f32.mrb[115].mxu0 }
 0x795   :  { %v3506_v10 = vpop.f32.mrb[52].mxu1 }
 0x796   :  { %v4617_v28 = vpop.f32.mrb[53].mxu1 }
 0x797   :  { %v3771_v21 = vpop.f32.mrb[116].mxu0 }
 0x798   :  { %v4703_v57 = vpop.f32.mrb[117].mxu0 }
 0x799   :  { %v3511_v55 = vpop.f32.mrb[54].mxu1 }
 0x79a   :  { %v4620_v17 = vpop.f32.mrb[55].mxu1 }
 0x79b   :  { %v3776_v25 = vpop.f32.mrb[118].mxu0 }
 0x79c   :  { %v4706_v32 = vpop.f32.mrb[119].mxu0 }
 0x79d   :  { %v3516_v6 = vpop.f32.mrb[56].mxu1 }
 0x79e   :  { %v4623_v56 = vpop.f32.mrb[57].mxu1 }
 0x7a1   :  { %v3615_v38 = vpop.f32.mrb[58].mxu1 }
 0x7a2   :  { %v3649_v39 = vmax.f32 %v3486_v27, %v3615_v38  ;;  %v4648_v50 = vpop.f32.mrb[59].mxu1 }
 0x7a4   :  { %v3785_v13 = vmax.f32 %v3649_v39, %v3751_v23 }
 0x7a5   :  { %v3620_v46 = vpop.f32.mrb[60].mxu1 }
 0x7a6   :  { %3792 = vst.msk [vmem:[%s6743_s12] sm:$0xff] %vm3268_vm7, %v3785_v13  ;;  %v3650_v52 = vmax.f32 %v3491_v44, %v3620_v46  ;;  %v4651_v2 = vpop.f32.mrb[61].mxu1 }
 0x7a8   :  { %v3786_v9 = vmax.f32 %v3650_v52, %v3756_v33 }
 0x7a9   :  { %v3625_v8 = vpop.f32.mrb[62].mxu1 }
 0x7aa   :  { %3793 = vst.msk [vmem:[%s6743_s12 + $0x8] sm:$0xff] %vm3268_vm7, %v3786_v9  ;;  %v3651_v3 = vmax.f32 %v3496_v24, %v3625_v8  ;;  %v4654_v36 = vpop.f32.mrb[63].mxu1 }
 0x7ac   :  { %v3787_v35 = vmax.f32 %v3651_v3, %v3761_v40 }
 0x7ad   :  { %v3630_v31 = vpop.f32.mrb[64].mxu1 }
 0x7ae   :  { %3794 = vst.msk [vmem:[%s6743_s12 + $0x10] sm:$0xff] %vm3268_vm7, %v3787_v35  ;;  %v3652_v37 = vmax.f32 %v3501_v43, %v3630_v31  ;;  %v4657_v1 = vpop.f32.mrb[65].mxu1 }
 0x7b0   :  { %v3788_v53 = vmax.f32 %v3652_v37, %v3766_v20 }
 0x7b1   :  { %v3635_v47 = vpop.f32.mrb[66].mxu1 }
 0x7b2   :  { %3795 = vst.msk [vmem:[%s6743_s12 + $0x18] sm:$0xff] %vm3268_vm7, %v3788_v53  ;;  %v3653_v41 = vmax.f32 %v3506_v10, %v3635_v47  ;;  %v4660_v30 = vpop.f32.mrb[67].mxu1 }
 0x7b4   :  { %v3789_v26 = vmax.f32 %v3653_v41, %v3771_v21 }
 0x7b5   :  { %v3640_v4 = vpop.f32.mrb[68].mxu1 }
 0x7b6   :  { %3796 = vst.msk [vmem:[%s6743_s12 + $0x20] sm:$0xff] %vm3268_vm7, %v3789_v26  ;;  %v3654_v5 = vmax.f32 %v3511_v55, %v3640_v4  ;;  %v4663_v19 = vpop.f32.mrb[69].mxu1 }
 0x7b8   :  { %v3790_v29 = vmax.f32 %v3654_v5, %v3776_v25 }
 0x7b9   :  { %v3645_v51 = vpop.f32.mrb[70].mxu1 }
 0x7ba   :  { %3797 = vst.msk [vmem:[%s6743_s12 + $0x28] sm:$0xff] %vm3268_vm7, %v3790_v29  ;;  %v3655_v48 = vmax.f32 %v3516_v6, %v3645_v51  ;;  %v4666_v45 = vpop.f32.mrb[71].mxu1 }
 0x7bd   :  { %v3781_v14 = vpop.f32.mrb[72].mxu1 }
 0x7be   :  { %v3791_v42 = vmax.f32 %v3655_v48, %v3781_v14  ;;  %v4709_v15 = vpop.f32.mrb[73].mxu1 }
 0x7c0   :  { %3799 = vst.msk [vmem:[%s6743_s12 + $0x30] sm:$0x3] %vm3798_vm11, %v3791_v42 }

</bundles_post_ra>
